<compile_context>
chip_gen: v7x
topology: tpu7x:2x2x1
jax: 0.10.0
libtpu: 0.0.40
codegen_flags: <defaults>
</compile_context>

<pallas_src>
import jax
import jax.numpy as jnp
from jax import lax
from jax.experimental import pallas as pl
from jax.experimental.pallas import tpu as pltpu


# ----------------------------------------------------------------------------
# Pallas kernels
# ----------------------------------------------------------------------------
def _bilstm_kernel(mask_ref, gx_ref, whh_f_ref, whh_r_ref,
                   out_ref, hn_ref, cn_ref):
    """Fused bidirectional LSTM recurrence for one layer.

    mask_ref  : [T, B, 1] f32 (1.0 where t < length else 0.0)
    gx_ref    : [T, B, 8H] f32 precomputed x @ [W_ih_fwd | W_ih_rev] + bias
    whh_*_ref : [H, 4H] bf16 recurrent weights (fwd / rev)
    out_ref   : [T, B, 2H] f32, fwd in [:, :, :H], rev in [:, :, H:]
    hn_ref, cn_ref : [2, B, H] f32 final states (row 0 = fwd, row 1 = rev)
    """
    T = gx_ref.shape[0]
    B = gx_ref.shape[1]
    H4 = gx_ref.shape[2] // 2
    H = H4 // 4

    whh_f = whh_f_ref[...]
    whh_r = whh_r_ref[...]

    def lstm_cell(gates, c_prev):
        i_g = jax.nn.sigmoid(gates[:, 0:H])
        f_g = jax.nn.sigmoid(gates[:, H:2 * H])
        g_g = jnp.tanh(gates[:, 2 * H:3 * H])
        o_g = jax.nn.sigmoid(gates[:, 3 * H:4 * H])
        c_new = f_g * c_prev + i_g * g_g
        h_new = o_g * jnp.tanh(c_new)
        return h_new, c_new

    def body(s, carry):
        h_f, c_f, h_r, c_r = carry
        t_r = T - 1 - s

        gx_f = gx_ref[s]            # [B, 8H]
        gx_r = gx_ref[t_r]          # [B, 8H]
        m_f = mask_ref[s]           # [B, 1]
        m_r = mask_ref[t_r]         # [B, 1]

        gates_f = gx_f[:, :H4] + jnp.dot(
            h_f.astype(whh_f.dtype), whh_f, preferred_element_type=jnp.float32)
        gates_r = gx_r[:, H4:] + jnp.dot(
            h_r.astype(whh_r.dtype), whh_r, preferred_element_type=jnp.float32)

        hf_new, cf_new = lstm_cell(gates_f, c_f)
        hr_new, cr_new = lstm_cell(gates_r, c_r)

        # pad_packed_sequence semantics: zeros at padded positions.
        out_ref[s, :, 0:H] = m_f * hf_new
        out_ref[t_r, :, H:] = m_r * hr_new

        # Only advance the state on valid (packed) steps.
        h_f = h_f + m_f * (hf_new - h_f)
        c_f = c_f + m_f * (cf_new - c_f)
        h_r = h_r + m_r * (hr_new - h_r)
        c_r = c_r + m_r * (cr_new - c_r)
        return h_f, c_f, h_r, c_r

    zeros = jnp.zeros((B, H), jnp.float32)
    h_f, c_f, h_r, c_r = lax.fori_loop(
        0, T, body, (zeros, zeros, zeros, zeros), unroll=True)

    hn_ref[0] = h_f
    hn_ref[1] = h_r
    cn_ref[0] = c_f
    cn_ref[1] = c_r


def _fc_heads_kernel(hx_ref, cx_ref, wh_ref, bh_ref, wc_ref, bc_ref,
                     h_out_ref, c_out_ref):
    """Fused fc_hidden and fc_cell heads: tanh(x @ W^T + b) for both."""
    h_out_ref[...] = jnp.tanh(
        jnp.dot(hx_ref[...], wh_ref[...], preferred_element_type=jnp.float32)
        + bh_ref[...])
    c_out_ref[...] = jnp.tanh(
        jnp.dot(cx_ref[...], wc_ref[...], preferred_element_type=jnp.float32)
        + bc_ref[...])


# ----------------------------------------------------------------------------
# Wrappers around pallas_call
# ----------------------------------------------------------------------------
def _full_spec(shape):
    # full-array block (satisfies the (8,128) rule by equaling the array dims)
    return pl.BlockSpec(shape, lambda i: (0,) * len(shape))


def bilstm_layer(x_tbf, mask_tb1, w_ih_f, w_hh_f, b_f, w_ih_r, w_hh_r, b_r):
    """One fused bidirectional LSTM layer.

    x_tbf : [T, B, F] f32 time-major input.
    Returns (out [T, B, 2H] f32, h_n [2, B, H], c_n [2, B, H]).
    """
    T, B, F = x_tbf.shape
    H = w_hh_f.shape[1]          # torch layout [4H, H]
    H4 = 4 * H

    # Hoisted input projection: one [T*B, F] @ [F, 8H] bf16 matmul (f32 acc),
    # both directions fused, bias folded in.  Done in XLA so the recurrence
    # kernel only carries the serial h @ W_hh chain.
    w_ih_cat = jnp.concatenate(
        [jnp.transpose(w_ih_f), jnp.transpose(w_ih_r)], axis=1)      # [F, 8H]
    b_cat = jnp.concatenate([b_f, b_r]).astype(jnp.float32)          # [8H]
    xf = x_tbf.reshape(T * B, F).astype(jnp.bfloat16)
    gx = jnp.dot(xf, w_ih_cat.astype(jnp.bfloat16),
                 preferred_element_type=jnp.float32) + b_cat[None, :]
    gx = gx.reshape(T, B, 2 * H4)                                    # [T,B,8H]

    whh_f_t = jnp.transpose(w_hh_f).astype(jnp.bfloat16)             # [H, 4H]
    whh_r_t = jnp.transpose(w_hh_r).astype(jnp.bfloat16)             # [H, 4H]

    out, hn, cn = pl.pallas_call(
        _bilstm_kernel,
        out_shape=(
            jax.ShapeDtypeStruct((T, B, 2 * H), jnp.float32),
            jax.ShapeDtypeStruct((2, B, H), jnp.float32),
            jax.ShapeDtypeStruct((2, B, H), jnp.float32),
        ),
        grid_spec=pltpu.PrefetchScalarGridSpec(
            num_scalar_prefetch=0,
            grid=(1,),
            in_specs=[
                _full_spec((T, B, 1)),
                _full_spec((T, B, 2 * H4)),
                _full_spec((H, H4)),
                _full_spec((H, H4)),
            ],
            out_specs=(
                _full_spec((T, B, 2 * H)),
                _full_spec((2, B, H)),
                _full_spec((2, B, H)),
            ),
        ),
        compiler_params=pltpu.CompilerParams(
            dimension_semantics=("arbitrary",)),
    )(mask_tb1, gx, whh_f_t, whh_r_t)
    return out, hn, cn


def fc_heads(hx, cx, fc_hidden_params, fc_cell_params):
    """Fused tanh(Linear) heads for hidden and cell (single pallas_call)."""
    wH, bH = fc_hidden_params        # wH: [H, 2H] torch Linear layout
    wC, bC = fc_cell_params
    N, Fin = hx.shape
    Fout = wH.shape[0]
    return pl.pallas_call(
        _fc_heads_kernel,
        out_shape=(jax.ShapeDtypeStruct((N, Fout), jnp.float32),
                   jax.ShapeDtypeStruct((N, Fout), jnp.float32)),
        grid_spec=pltpu.PrefetchScalarGridSpec(
            num_scalar_prefetch=0,
            grid=(1,),
            in_specs=[
                _full_spec((N, Fin)), _full_spec((N, Fin)),
                _full_spec((Fin, Fout)), _full_spec((1, Fout)),
                _full_spec((Fin, Fout)), _full_spec((1, Fout)),
            ],
            out_specs=(_full_spec((N, Fout)), _full_spec((N, Fout))),
        ),
    )(hx.astype(jnp.bfloat16), cx.astype(jnp.bfloat16),
      jnp.transpose(wH).astype(jnp.bfloat16),
      bH.reshape(1, Fout).astype(jnp.float32),
      jnp.transpose(wC).astype(jnp.bfloat16),
      bC.reshape(1, Fout).astype(jnp.float32))


# ----------------------------------------------------------------------------
# Encoder forward (glue in plain JAX, hot path in Pallas)
# ----------------------------------------------------------------------------
def init_params(key, input_dim, embedding_dim, hidden_dim, num_layers):
    keys = iter(jax.random.split(key, 8 + num_layers * 2 * 4))
    nk = lambda: next(keys)
    bound = 1.0 / float(hidden_dim) ** 0.5
    params = {
        'embedding': jax.random.normal(nk(), (input_dim, embedding_dim),
                                       jnp.float32)
    }
    rnn = {}
    for l in range(num_layers):
        in_sz = embedding_dim if l == 0 else 2 * hidden_dim
        for d in range(2):  # 0 = forward, 1 = reverse
            w_ih = jax.random.uniform(nk(), (4 * hidden_dim, in_sz),
                                      jnp.float32, -bound, bound)
            w_hh = jax.random.uniform(nk(), (4 * hidden_dim, hidden_dim),
                                      jnp.float32, -bound, bound)
            b_ih = jax.random.uniform(nk(), (4 * hidden_dim,),
                                      jnp.float32, -bound, bound)
            b_hh = jax.random.uniform(nk(), (4 * hidden_dim,),
                                      jnp.float32, -bound, bound)
            rnn[(l, d)] = (w_ih, w_hh, b_ih + b_hh)
    params['rnn'] = rnn
    fin = 2 * hidden_dim
    fbound = 1.0 / float(fin) ** 0.5
    params['fc_hidden'] = (
        jax.random.uniform(nk(), (hidden_dim, fin), jnp.float32, -fbound, fbound),
        jax.random.uniform(nk(), (hidden_dim,), jnp.float32, -fbound, fbound))
    params['fc_cell'] = (
        jax.random.uniform(nk(), (hidden_dim, fin), jnp.float32, -fbound, fbound),
        jax.random.uniform(nk(), (hidden_dim,), jnp.float32, -fbound, fbound))
    return params


def encoder_forward(params, src, src_lengths, *, num_layers, hidden_dim,
                    out_len):
    """Mirrors Encoder.forward (rnn_type='lstm', eval mode => dropout = id)."""
    B, T = src.shape
    # Embedding lookup (gather) kept in plain JAX glue; dropout is identity.
    embedded = jnp.take(params['embedding'], src, axis=0)        # [B, T, E]

    # Time-major once for the whole stack; transpose back once at the end.
    x = jnp.transpose(embedded, (1, 0, 2)).astype(jnp.float32)   # [T, B, E]

    # Validity mask precomputed once, shared by all layers / directions.
    lengths = src_lengths.astype(jnp.int32)
    mask = (jnp.arange(T, dtype=jnp.int32)[:, None] < lengths[None, :])
    mask = mask.astype(jnp.float32)[:, :, None]                  # [T, B, 1]

    h_list, c_list = [], []   # PyTorch h_n order: index = layer*2 + direction
    for l in range(num_layers):
        w_ih_f, w_hh_f, b_f = params['rnn'][(l, 0)]
        w_ih_r, w_hh_r, b_r = params['rnn'][(l, 1)]
        x, hn, cn = bilstm_layer(x, mask, w_ih_f, w_hh_f, b_f,
                                 w_ih_r, w_hh_r, b_r)            # x: [T, B, 2H]
        h_list += [hn[0], hn[1]]
        c_list += [cn[0], cn[1]]
        # inter-layer dropout is identity in eval mode

    # pad_packed_sequence pads only up to max(src_lengths)
    outputs = jnp.transpose(x, (1, 0, 2))[:, :out_len, :]        # [B, out_len, 2H]

    h_n = jnp.stack(h_list, axis=0)                              # [2L, B, H]
    c_n = jnp.stack(c_list, axis=0)
    # NOTE: this slicing intentionally replicates the reference module's own
    # `hidden[0:num_layers]` / `hidden[num_layers:]` concat (for num_layers=2
    # it pairs layer0-fwd with layer1-fwd, exactly as the PyTorch code does).
    hidden_cat = jnp.concatenate([h_n[:num_layers], h_n[num_layers:]], axis=2)
    cell_cat = jnp.concatenate([c_n[:num_layers], c_n[num_layers:]], axis=2)

    hidden, cell = fc_heads(hidden_cat.reshape(-1, 2 * hidden_dim),
                            cell_cat.reshape(-1, 2 * hidden_dim),
                            params['fc_hidden'], params['fc_cell'])
    hidden = hidden.reshape(num_layers, B, hidden_dim)
    cell = cell.reshape(num_layers, B, hidden_dim)
    return outputs, (hidden, cell)


# ----------------------------------------------------------------------------
if __name__ == "__main__":
    INPUT_DIM = 50       # vocab size
    EMBEDDING_DIM = 16
    HIDDEN_DIM = 32
    NUM_LAYERS = 2
    BATCH = 2
    SRC_LEN = 8

    key = jax.random.PRNGKey(0)
    k_param, k_src = jax.random.split(key)
    params = init_params(k_param, INPUT_DIM, EMBEDDING_DIM, HIDDEN_DIM,
                         NUM_LAYERS)

    src = jax.random.randint(k_src, (BATCH, SRC_LEN), 0, INPUT_DIM,
                             dtype=jnp.int32)
    lengths_list = [8, 5]
    src_lengths = jnp.array(lengths_list, dtype=jnp.int32)
    out_len = max(lengths_list)

    outputs, (hidden, cell) = encoder_forward(
        params, src, src_lengths,
        num_layers=NUM_LAYERS, hidden_dim=HIDDEN_DIM, out_len=out_len)

    jax.block_until_ready((outputs, hidden, cell))

    assert outputs.shape == (BATCH, out_len, 2 * HIDDEN_DIM)
    assert hidden.shape == (NUM_LAYERS, BATCH, HIDDEN_DIM)
    assert cell.shape == (NUM_LAYERS, BATCH, HIDDEN_DIM)
    # padded positions of the masked (shorter) sequence must be exactly zero
    assert bool(jnp.all(outputs[1, lengths_list[1]:, :] == 0.0))

    print("KERNEL_OK")
</pallas_src>

<mosaic_0001>
module attributes {stable_mosaic.version = 11 : i64} {
  func.func @_bilstm_kernel(%arg0: i32, %arg1: memref<8x2x1xf32, #tpu.memory_space<vmem>>, %arg2: memref<8x2x256xf32, #tpu.memory_space<vmem>>, %arg3: memref<32x128xbf16, #tpu.memory_space<vmem>>, %arg4: memref<32x128xbf16, #tpu.memory_space<vmem>>, %arg5: memref<8x2x64xf32, #tpu.memory_space<vmem>>, %arg6: memref<2x2x32xf32, #tpu.memory_space<vmem>>, %arg7: memref<2x2x32xf32, #tpu.memory_space<vmem>>) attributes {dimension_semantics = [#tpu.dimension_semantics<arbitrary>], iteration_bounds = array<i64: 1>, scalar_prefetch = 0 : i64, scratch_operands = 0 : i64, tpu.core_type = #tpu.core_type<tc>, window_params = [{pipeline_mode = #tpu.pipeline_mode<synchronous>, transform_indices = @transform_0, window_bounds = array<i64: 8, 2, 1>}, {pipeline_mode = #tpu.pipeline_mode<synchronous>, transform_indices = @transform_1, window_bounds = array<i64: 8, 2, 256>}, {pipeline_mode = #tpu.pipeline_mode<synchronous>, transform_indices = @transform_2, window_bounds = array<i64: 32, 128>}, {pipeline_mode = #tpu.pipeline_mode<synchronous>, transform_indices = @transform_3, window_bounds = array<i64: 32, 128>}, {pipeline_mode = #tpu.pipeline_mode<synchronous>, transform_indices = @transform_4, window_bounds = array<i64: 8, 2, 64>}, {pipeline_mode = #tpu.pipeline_mode<synchronous>, transform_indices = @transform_5, window_bounds = array<i64: 2, 2, 32>}, {pipeline_mode = #tpu.pipeline_mode<synchronous>, transform_indices = @transform_6, window_bounds = array<i64: 2, 2, 32>}]} {
    %c0 = arith.constant 0 : index
    %c0_0 = arith.constant 0 : index
    %0 = vector.load %arg3[%c0, %c0_0] : memref<32x128xbf16, #tpu.memory_space<vmem>>, vector<32x128xbf16>
    %c0_1 = arith.constant 0 : index
    %c0_2 = arith.constant 0 : index
    %1 = vector.load %arg4[%c0_1, %c0_2] : memref<32x128xbf16, #tpu.memory_space<vmem>>, vector<32x128xbf16>
    %cst = arith.constant 0.000000e+00 : f32
    %2 = vector.broadcast %cst : f32 to vector<2x32xf32>
    %c0_i32 = arith.constant 0 : i32
    %c7_i32 = arith.constant 7 : i32
    %3 = arith.subi %c7_i32, %c0_i32 : i32
    %4 = arith.index_cast %c0_i32 : i32 to index
    %c0_3 = arith.constant 0 : index
    %c0_4 = arith.constant 0 : index
    %5 = vector.load %arg2[%4, %c0_3, %c0_4] : memref<8x2x256xf32, #tpu.memory_space<vmem>>, vector<1x2x256xf32>
    %6 = vector.shape_cast %5 : vector<1x2x256xf32> to vector<2x256xf32>
    %7 = arith.index_cast %3 : i32 to index
    %c0_5 = arith.constant 0 : index
    %c0_6 = arith.constant 0 : index
    %8 = vector.load %arg2[%7, %c0_5, %c0_6] : memref<8x2x256xf32, #tpu.memory_space<vmem>>, vector<1x2x256xf32>
    %9 = vector.shape_cast %8 : vector<1x2x256xf32> to vector<2x256xf32>
    %10 = arith.index_cast %c0_i32 : i32 to index
    %c0_7 = arith.constant 0 : index
    %c0_8 = arith.constant 0 : index
    %11 = vector.load %arg1[%10, %c0_7, %c0_8] : memref<8x2x1xf32, #tpu.memory_space<vmem>>, vector<1x2x1xf32>
    %12 = vector.shape_cast %11 : vector<1x2x1xf32> to vector<2x1xf32>
    %13 = arith.index_cast %3 : i32 to index
    %c0_9 = arith.constant 0 : index
    %c0_10 = arith.constant 0 : index
    %14 = vector.load %arg1[%13, %c0_9, %c0_10] : memref<8x2x1xf32, #tpu.memory_space<vmem>>, vector<1x2x1xf32>
    %15 = vector.shape_cast %14 : vector<1x2x1xf32> to vector<2x1xf32>
    %16 = vector.extract_strided_slice %6 {offsets = [0, 0], sizes = [2, 128], strides = [1, 1]} : vector<2x256xf32> to vector<2x128xf32>
    %17 = arith.truncf %2 : vector<2x32xf32> to vector<2x32xbf16>
    %cst_11 = arith.constant dense<0.000000e+00> : vector<2x128xf32>
    %18 = tpu.matmul %17, %0, %cst_11 {dimension_numbers = #tpu.dot_dimension_numbers<[1], [0], [0], [1], [0, 0, 1, 1], [], []>} : vector<2x32xbf16>, vector<32x128xbf16>, vector<2x128xf32> -> vector<2x128xf32>
    %19 = arith.addf %16, %18 : vector<2x128xf32>
    %20 = vector.extract_strided_slice %9 {offsets = [0, 128], sizes = [2, 128], strides = [1, 1]} : vector<2x256xf32> to vector<2x128xf32>
    %21 = arith.truncf %2 : vector<2x32xf32> to vector<2x32xbf16>
    %cst_12 = arith.constant dense<0.000000e+00> : vector<2x128xf32>
    %22 = tpu.matmul %21, %1, %cst_12 {dimension_numbers = #tpu.dot_dimension_numbers<[1], [0], [0], [1], [0, 0, 1, 1], [], []>} : vector<2x32xbf16>, vector<32x128xbf16>, vector<2x128xf32> -> vector<2x128xf32>
    %23 = arith.addf %20, %22 : vector<2x128xf32>
    %24 = vector.extract_strided_slice %19 {offsets = [0, 0], sizes = [2, 32], strides = [1, 1]} : vector<2x128xf32> to vector<2x32xf32>
    %25 = arith.negf %24 : vector<2x32xf32>
    %26 = math.exp %25 : vector<2x32xf32>
    %cst_13 = arith.constant 1.000000e+00 : f32
    %27 = vector.broadcast %cst_13 : f32 to vector<2x32xf32>
    %28 = arith.addf %27, %26 : vector<2x32xf32>
    %29 = arith.divf %27, %28 : vector<2x32xf32>
    %30 = vector.extract_strided_slice %19 {offsets = [0, 32], sizes = [2, 32], strides = [1, 1]} : vector<2x128xf32> to vector<2x32xf32>
    %31 = arith.negf %30 : vector<2x32xf32>
    %32 = math.exp %31 : vector<2x32xf32>
    %cst_14 = arith.constant 1.000000e+00 : f32
    %33 = vector.broadcast %cst_14 : f32 to vector<2x32xf32>
    %34 = arith.addf %33, %32 : vector<2x32xf32>
    %35 = arith.divf %33, %34 : vector<2x32xf32>
    %36 = vector.extract_strided_slice %19 {offsets = [0, 64], sizes = [2, 32], strides = [1, 1]} : vector<2x128xf32> to vector<2x32xf32>
    %37 = math.tanh %36 : vector<2x32xf32>
    %38 = vector.extract_strided_slice %19 {offsets = [0, 96], sizes = [2, 32], strides = [1, 1]} : vector<2x128xf32> to vector<2x32xf32>
    %39 = arith.negf %38 : vector<2x32xf32>
    %40 = math.exp %39 : vector<2x32xf32>
    %cst_15 = arith.constant 1.000000e+00 : f32
    %41 = vector.broadcast %cst_15 : f32 to vector<2x32xf32>
    %42 = arith.addf %41, %40 : vector<2x32xf32>
    %43 = arith.divf %41, %42 : vector<2x32xf32>
    %44 = arith.mulf %35, %2 : vector<2x32xf32>
    %45 = arith.mulf %29, %37 : vector<2x32xf32>
    %46 = arith.addf %44, %45 : vector<2x32xf32>
    %47 = math.tanh %46 : vector<2x32xf32>
    %48 = arith.mulf %43, %47 : vector<2x32xf32>
    %49 = vector.extract_strided_slice %23 {offsets = [0, 0], sizes = [2, 32], strides = [1, 1]} : vector<2x128xf32> to vector<2x32xf32>
    %50 = arith.negf %49 : vector<2x32xf32>
    %51 = math.exp %50 : vector<2x32xf32>
    %cst_16 = arith.constant 1.000000e+00 : f32
    %52 = vector.broadcast %cst_16 : f32 to vector<2x32xf32>
    %53 = arith.addf %52, %51 : vector<2x32xf32>
    %54 = arith.divf %52, %53 : vector<2x32xf32>
    %55 = vector.extract_strided_slice %23 {offsets = [0, 32], sizes = [2, 32], strides = [1, 1]} : vector<2x128xf32> to vector<2x32xf32>
    %56 = arith.negf %55 : vector<2x32xf32>
    %57 = math.exp %56 : vector<2x32xf32>
    %cst_17 = arith.constant 1.000000e+00 : f32
    %58 = vector.broadcast %cst_17 : f32 to vector<2x32xf32>
    %59 = arith.addf %58, %57 : vector<2x32xf32>
    %60 = arith.divf %58, %59 : vector<2x32xf32>
    %61 = vector.extract_strided_slice %23 {offsets = [0, 64], sizes = [2, 32], strides = [1, 1]} : vector<2x128xf32> to vector<2x32xf32>
    %62 = math.tanh %61 : vector<2x32xf32>
    %63 = vector.extract_strided_slice %23 {offsets = [0, 96], sizes = [2, 32], strides = [1, 1]} : vector<2x128xf32> to vector<2x32xf32>
    %64 = arith.negf %63 : vector<2x32xf32>
    %65 = math.exp %64 : vector<2x32xf32>
    %cst_18 = arith.constant 1.000000e+00 : f32
    %66 = vector.broadcast %cst_18 : f32 to vector<2x32xf32>
    %67 = arith.addf %66, %65 : vector<2x32xf32>
    %68 = arith.divf %66, %67 : vector<2x32xf32>
    %69 = arith.mulf %60, %2 : vector<2x32xf32>
    %70 = arith.mulf %54, %62 : vector<2x32xf32>
    %71 = arith.addf %69, %70 : vector<2x32xf32>
    %72 = math.tanh %71 : vector<2x32xf32>
    %73 = arith.mulf %68, %72 : vector<2x32xf32>
    %74 = vector.broadcast %12 : vector<2x1xf32> to vector<2x32xf32>
    %75 = arith.mulf %74, %48 : vector<2x32xf32>
    %76 = arith.index_cast %c0_i32 : i32 to index
    %c0_19 = arith.constant 0 : index
    %c0_20 = arith.constant 0 : index
    %77 = vector.load %arg5[%76, %c0_19, %c0_20] : memref<8x2x64xf32, #tpu.memory_space<vmem>>, vector<1x2x32xf32>
    %78 = vector.shape_cast %77 : vector<1x2x32xf32> to vector<2x32xf32>
    %79 = vector.shape_cast %75 : vector<2x32xf32> to vector<1x2x32xf32>
    tpu.vector_store %arg5[%76, %c0_19, %c0_20], %79 {strides = array<i32>} : memref<8x2x64xf32, #tpu.memory_space<vmem>>, vector<1x2x32xf32>,
    %80 = vector.broadcast %15 : vector<2x1xf32> to vector<2x32xf32>
    %81 = arith.mulf %80, %73 : vector<2x32xf32>
    %82 = arith.index_cast %3 : i32 to index
    %c0_21 = arith.constant 0 : index
    %c32 = arith.constant 32 : index
    %83 = vector.load %arg5[%82, %c0_21, %c32] : memref<8x2x64xf32, #tpu.memory_space<vmem>>, vector<1x2x32xf32>
    %84 = vector.shape_cast %83 : vector<1x2x32xf32> to vector<2x32xf32>
    %85 = vector.shape_cast %81 : vector<2x32xf32> to vector<1x2x32xf32>
    tpu.vector_store %arg5[%82, %c0_21, %c32], %85 {strides = array<i32>} : memref<8x2x64xf32, #tpu.memory_space<vmem>>, vector<1x2x32xf32>,
    %86 = arith.subf %48, %2 : vector<2x32xf32>
    %87 = vector.broadcast %12 : vector<2x1xf32> to vector<2x32xf32>
    %88 = arith.mulf %87, %86 : vector<2x32xf32>
    %89 = arith.addf %2, %88 : vector<2x32xf32>
    %90 = arith.subf %46, %2 : vector<2x32xf32>
    %91 = vector.broadcast %12 : vector<2x1xf32> to vector<2x32xf32>
    %92 = arith.mulf %91, %90 : vector<2x32xf32>
    %93 = arith.addf %2, %92 : vector<2x32xf32>
    %94 = arith.subf %73, %2 : vector<2x32xf32>
    %95 = vector.broadcast %15 : vector<2x1xf32> to vector<2x32xf32>
    %96 = arith.mulf %95, %94 : vector<2x32xf32>
    %97 = arith.addf %2, %96 : vector<2x32xf32>
    %98 = arith.subf %71, %2 : vector<2x32xf32>
    %99 = vector.broadcast %15 : vector<2x1xf32> to vector<2x32xf32>
    %100 = arith.mulf %99, %98 : vector<2x32xf32>
    %101 = arith.addf %2, %100 : vector<2x32xf32>
    %c1_i32 = arith.constant 1 : i32
    %c7_i32_22 = arith.constant 7 : i32
    %102 = arith.subi %c7_i32_22, %c1_i32 : i32
    %103 = arith.index_cast %c1_i32 : i32 to index
    %c0_23 = arith.constant 0 : index
    %c0_24 = arith.constant 0 : index
    %104 = vector.load %arg2[%103, %c0_23, %c0_24] : memref<8x2x256xf32, #tpu.memory_space<vmem>>, vector<1x2x256xf32>
    %105 = vector.shape_cast %104 : vector<1x2x256xf32> to vector<2x256xf32>
    %106 = arith.index_cast %102 : i32 to index
    %c0_25 = arith.constant 0 : index
    %c0_26 = arith.constant 0 : index
    %107 = vector.load %arg2[%106, %c0_25, %c0_26] : memref<8x2x256xf32, #tpu.memory_space<vmem>>, vector<1x2x256xf32>
    %108 = vector.shape_cast %107 : vector<1x2x256xf32> to vector<2x256xf32>
    %109 = arith.index_cast %c1_i32 : i32 to index
    %c0_27 = arith.constant 0 : index
    %c0_28 = arith.constant 0 : index
    %110 = vector.load %arg1[%109, %c0_27, %c0_28] : memref<8x2x1xf32, #tpu.memory_space<vmem>>, vector<1x2x1xf32>
    %111 = vector.shape_cast %110 : vector<1x2x1xf32> to vector<2x1xf32>
    %112 = arith.index_cast %102 : i32 to index
    %c0_29 = arith.constant 0 : index
    %c0_30 = arith.constant 0 : index
    %113 = vector.load %arg1[%112, %c0_29, %c0_30] : memref<8x2x1xf32, #tpu.memory_space<vmem>>, vector<1x2x1xf32>
    %114 = vector.shape_cast %113 : vector<1x2x1xf32> to vector<2x1xf32>
    %115 = vector.extract_strided_slice %105 {offsets = [0, 0], sizes = [2, 128], strides = [1, 1]} : vector<2x256xf32> to vector<2x128xf32>
    %116 = arith.truncf %89 : vector<2x32xf32> to vector<2x32xbf16>
    %cst_31 = arith.constant dense<0.000000e+00> : vector<2x128xf32>
    %117 = tpu.matmul %116, %0, %cst_31 {dimension_numbers = #tpu.dot_dimension_numbers<[1], [0], [0], [1], [0, 0, 1, 1], [], []>} : vector<2x32xbf16>, vector<32x128xbf16>, vector<2x128xf32> -> vector<2x128xf32>
    %118 = arith.addf %115, %117 : vector<2x128xf32>
    %119 = vector.extract_strided_slice %108 {offsets = [0, 128], sizes = [2, 128], strides = [1, 1]} : vector<2x256xf32> to vector<2x128xf32>
    %120 = arith.truncf %97 : vector<2x32xf32> to vector<2x32xbf16>
    %cst_32 = arith.constant dense<0.000000e+00> : vector<2x128xf32>
    %121 = tpu.matmul %120, %1, %cst_32 {dimension_numbers = #tpu.dot_dimension_numbers<[1], [0], [0], [1], [0, 0, 1, 1], [], []>} : vector<2x32xbf16>, vector<32x128xbf16>, vector<2x128xf32> -> vector<2x128xf32>
    %122 = arith.addf %119, %121 : vector<2x128xf32>
    %123 = vector.extract_strided_slice %118 {offsets = [0, 0], sizes = [2, 32], strides = [1, 1]} : vector<2x128xf32> to vector<2x32xf32>
    %124 = arith.negf %123 : vector<2x32xf32>
    %125 = math.exp %124 : vector<2x32xf32>
    %cst_33 = arith.constant 1.000000e+00 : f32
    %126 = vector.broadcast %cst_33 : f32 to vector<2x32xf32>
    %127 = arith.addf %126, %125 : vector<2x32xf32>
    %128 = arith.divf %126, %127 : vector<2x32xf32>
    %129 = vector.extract_strided_slice %118 {offsets = [0, 32], sizes = [2, 32], strides = [1, 1]} : vector<2x128xf32> to vector<2x32xf32>
    %130 = arith.negf %129 : vector<2x32xf32>
    %131 = math.exp %130 : vector<2x32xf32>
    %cst_34 = arith.constant 1.000000e+00 : f32
    %132 = vector.broadcast %cst_34 : f32 to vector<2x32xf32>
    %133 = arith.addf %132, %131 : vector<2x32xf32>
    %134 = arith.divf %132, %133 : vector<2x32xf32>
    %135 = vector.extract_strided_slice %118 {offsets = [0, 64], sizes = [2, 32], strides = [1, 1]} : vector<2x128xf32> to vector<2x32xf32>
    %136 = math.tanh %135 : vector<2x32xf32>
    %137 = vector.extract_strided_slice %118 {offsets = [0, 96], sizes = [2, 32], strides = [1, 1]} : vector<2x128xf32> to vector<2x32xf32>
    %138 = arith.negf %137 : vector<2x32xf32>
    %139 = math.exp %138 : vector<2x32xf32>
    %cst_35 = arith.constant 1.000000e+00 : f32
    %140 = vector.broadcast %cst_35 : f32 to vector<2x32xf32>
    %141 = arith.addf %140, %139 : vector<2x32xf32>
    %142 = arith.divf %140, %141 : vector<2x32xf32>
    %143 = arith.mulf %134, %93 : vector<2x32xf32>
    %144 = arith.mulf %128, %136 : vector<2x32xf32>
    %145 = arith.addf %143, %144 : vector<2x32xf32>
    %146 = math.tanh %145 : vector<2x32xf32>
    %147 = arith.mulf %142, %146 : vector<2x32xf32>
    %148 = vector.extract_strided_slice %122 {offsets = [0, 0], sizes = [2, 32], strides = [1, 1]} : vector<2x128xf32> to vector<2x32xf32>
    %149 = arith.negf %148 : vector<2x32xf32>
    %150 = math.exp %149 : vector<2x32xf32>
    %cst_36 = arith.constant 1.000000e+00 : f32
    %151 = vector.broadcast %cst_36 : f32 to vector<2x32xf32>
    %152 = arith.addf %151, %150 : vector<2x32xf32>
    %153 = arith.divf %151, %152 : vector<2x32xf32>
    %154 = vector.extract_strided_slice %122 {offsets = [0, 32], sizes = [2, 32], strides = [1, 1]} : vector<2x128xf32> to vector<2x32xf32>
    %155 = arith.negf %154 : vector<2x32xf32>
    %156 = math.exp %155 : vector<2x32xf32>
    %cst_37 = arith.constant 1.000000e+00 : f32
    %157 = vector.broadcast %cst_37 : f32 to vector<2x32xf32>
    %158 = arith.addf %157, %156 : vector<2x32xf32>
    %159 = arith.divf %157, %158 : vector<2x32xf32>
    %160 = vector.extract_strided_slice %122 {offsets = [0, 64], sizes = [2, 32], strides = [1, 1]} : vector<2x128xf32> to vector<2x32xf32>
    %161 = math.tanh %160 : vector<2x32xf32>
    %162 = vector.extract_strided_slice %122 {offsets = [0, 96], sizes = [2, 32], strides = [1, 1]} : vector<2x128xf32> to vector<2x32xf32>
    %163 = arith.negf %162 : vector<2x32xf32>
    %164 = math.exp %163 : vector<2x32xf32>
    %cst_38 = arith.constant 1.000000e+00 : f32
    %165 = vector.broadcast %cst_38 : f32 to vector<2x32xf32>
    %166 = arith.addf %165, %164 : vector<2x32xf32>
    %167 = arith.divf %165, %166 : vector<2x32xf32>
    %168 = arith.mulf %159, %101 : vector<2x32xf32>
    %169 = arith.mulf %153, %161 : vector<2x32xf32>
    %170 = arith.addf %168, %169 : vector<2x32xf32>
    %171 = math.tanh %170 : vector<2x32xf32>
    %172 = arith.mulf %167, %171 : vector<2x32xf32>
    %173 = vector.broadcast %111 : vector<2x1xf32> to vector<2x32xf32>
    %174 = arith.mulf %173, %147 : vector<2x32xf32>
    %175 = arith.index_cast %c1_i32 : i32 to index
    %c0_39 = arith.constant 0 : index
    %c0_40 = arith.constant 0 : index
    %176 = vector.load %arg5[%175, %c0_39, %c0_40] : memref<8x2x64xf32, #tpu.memory_space<vmem>>, vector<1x2x32xf32>
    %177 = vector.shape_cast %176 : vector<1x2x32xf32> to vector<2x32xf32>
    %178 = vector.shape_cast %174 : vector<2x32xf32> to vector<1x2x32xf32>
    tpu.vector_store %arg5[%175, %c0_39, %c0_40], %178 {strides = array<i32>} : memref<8x2x64xf32, #tpu.memory_space<vmem>>, vector<1x2x32xf32>,
    %179 = vector.broadcast %114 : vector<2x1xf32> to vector<2x32xf32>
    %180 = arith.mulf %179, %172 : vector<2x32xf32>
    %181 = arith.index_cast %102 : i32 to index
    %c0_41 = arith.constant 0 : index
    %c32_42 = arith.constant 32 : index
    %182 = vector.load %arg5[%181, %c0_41, %c32_42] : memref<8x2x64xf32, #tpu.memory_space<vmem>>, vector<1x2x32xf32>
    %183 = vector.shape_cast %182 : vector<1x2x32xf32> to vector<2x32xf32>
    %184 = vector.shape_cast %180 : vector<2x32xf32> to vector<1x2x32xf32>
    tpu.vector_store %arg5[%181, %c0_41, %c32_42], %184 {strides = array<i32>} : memref<8x2x64xf32, #tpu.memory_space<vmem>>, vector<1x2x32xf32>,
    %185 = arith.subf %147, %89 : vector<2x32xf32>
    %186 = vector.broadcast %111 : vector<2x1xf32> to vector<2x32xf32>
    %187 = arith.mulf %186, %185 : vector<2x32xf32>
    %188 = arith.addf %89, %187 : vector<2x32xf32>
    %189 = arith.subf %145, %93 : vector<2x32xf32>
    %190 = vector.broadcast %111 : vector<2x1xf32> to vector<2x32xf32>
    %191 = arith.mulf %190, %189 : vector<2x32xf32>
    %192 = arith.addf %93, %191 : vector<2x32xf32>
    %193 = arith.subf %172, %97 : vector<2x32xf32>
    %194 = vector.broadcast %114 : vector<2x1xf32> to vector<2x32xf32>
    %195 = arith.mulf %194, %193 : vector<2x32xf32>
    %196 = arith.addf %97, %195 : vector<2x32xf32>
    %197 = arith.subf %170, %101 : vector<2x32xf32>
    %198 = vector.broadcast %114 : vector<2x1xf32> to vector<2x32xf32>
    %199 = arith.mulf %198, %197 : vector<2x32xf32>
    %200 = arith.addf %101, %199 : vector<2x32xf32>
    %c2_i32 = arith.constant 2 : i32
    %c7_i32_43 = arith.constant 7 : i32
    %201 = arith.subi %c7_i32_43, %c2_i32 : i32
    %202 = arith.index_cast %c2_i32 : i32 to index
    %c0_44 = arith.constant 0 : index
    %c0_45 = arith.constant 0 : index
    %203 = vector.load %arg2[%202, %c0_44, %c0_45] : memref<8x2x256xf32, #tpu.memory_space<vmem>>, vector<1x2x256xf32>
    %204 = vector.shape_cast %203 : vector<1x2x256xf32> to vector<2x256xf32>
    %205 = arith.index_cast %201 : i32 to index
    %c0_46 = arith.constant 0 : index
    %c0_47 = arith.constant 0 : index
    %206 = vector.load %arg2[%205, %c0_46, %c0_47] : memref<8x2x256xf32, #tpu.memory_space<vmem>>, vector<1x2x256xf32>
    %207 = vector.shape_cast %206 : vector<1x2x256xf32> to vector<2x256xf32>
    %208 = arith.index_cast %c2_i32 : i32 to index
    %c0_48 = arith.constant 0 : index
    %c0_49 = arith.constant 0 : index
    %209 = vector.load %arg1[%208, %c0_48, %c0_49] : memref<8x2x1xf32, #tpu.memory_space<vmem>>, vector<1x2x1xf32>
    %210 = vector.shape_cast %209 : vector<1x2x1xf32> to vector<2x1xf32>
    %211 = arith.index_cast %201 : i32 to index
    %c0_50 = arith.constant 0 : index
    %c0_51 = arith.constant 0 : index
    %212 = vector.load %arg1[%211, %c0_50, %c0_51] : memref<8x2x1xf32, #tpu.memory_space<vmem>>, vector<1x2x1xf32>
    %213 = vector.shape_cast %212 : vector<1x2x1xf32> to vector<2x1xf32>
    %214 = vector.extract_strided_slice %204 {offsets = [0, 0], sizes = [2, 128], strides = [1, 1]} : vector<2x256xf32> to vector<2x128xf32>
    %215 = arith.truncf %188 : vector<2x32xf32> to vector<2x32xbf16>
    %cst_52 = arith.constant dense<0.000000e+00> : vector<2x128xf32>
    %216 = tpu.matmul %215, %0, %cst_52 {dimension_numbers = #tpu.dot_dimension_numbers<[1], [0], [0], [1], [0, 0, 1, 1], [], []>} : vector<2x32xbf16>, vector<32x128xbf16>, vector<2x128xf32> -> vector<2x128xf32>
    %217 = arith.addf %214, %216 : vector<2x128xf32>
    %218 = vector.extract_strided_slice %207 {offsets = [0, 128], sizes = [2, 128], strides = [1, 1]} : vector<2x256xf32> to vector<2x128xf32>
    %219 = arith.truncf %196 : vector<2x32xf32> to vector<2x32xbf16>
    %cst_53 = arith.constant dense<0.000000e+00> : vector<2x128xf32>
    %220 = tpu.matmul %219, %1, %cst_53 {dimension_numbers = #tpu.dot_dimension_numbers<[1], [0], [0], [1], [0, 0, 1, 1], [], []>} : vector<2x32xbf16>, vector<32x128xbf16>, vector<2x128xf32> -> vector<2x128xf32>
    %221 = arith.addf %218, %220 : vector<2x128xf32>
    %222 = vector.extract_strided_slice %217 {offsets = [0, 0], sizes = [2, 32], strides = [1, 1]} : vector<2x128xf32> to vector<2x32xf32>
    %223 = arith.negf %222 : vector<2x32xf32>
    %224 = math.exp %223 : vector<2x32xf32>
    %cst_54 = arith.constant 1.000000e+00 : f32
    %225 = vector.broadcast %cst_54 : f32 to vector<2x32xf32>
    %226 = arith.addf %225, %224 : vector<2x32xf32>
    %227 = arith.divf %225, %226 : vector<2x32xf32>
    %228 = vector.extract_strided_slice %217 {offsets = [0, 32], sizes = [2, 32], strides = [1, 1]} : vector<2x128xf32> to vector<2x32xf32>
    %229 = arith.negf %228 : vector<2x32xf32>
    %230 = math.exp %229 : vector<2x32xf32>
    %cst_55 = arith.constant 1.000000e+00 : f32
    %231 = vector.broadcast %cst_55 : f32 to vector<2x32xf32>
    %232 = arith.addf %231, %230 : vector<2x32xf32>
    %233 = arith.divf %231, %232 : vector<2x32xf32>
    %234 = vector.extract_strided_slice %217 {offsets = [0, 64], sizes = [2, 32], strides = [1, 1]} : vector<2x128xf32> to vector<2x32xf32>
    %235 = math.tanh %234 : vector<2x32xf32>
    %236 = vector.extract_strided_slice %217 {offsets = [0, 96], sizes = [2, 32], strides = [1, 1]} : vector<2x128xf32> to vector<2x32xf32>
    %237 = arith.negf %236 : vector<2x32xf32>
    %238 = math.exp %237 : vector<2x32xf32>
    %cst_56 = arith.constant 1.000000e+00 : f32
    %239 = vector.broadcast %cst_56 : f32 to vector<2x32xf32>
    %240 = arith.addf %239, %238 : vector<2x32xf32>
    %241 = arith.divf %239, %240 : vector<2x32xf32>
    %242 = arith.mulf %233, %192 : vector<2x32xf32>
    %243 = arith.mulf %227, %235 : vector<2x32xf32>
    %244 = arith.addf %242, %243 : vector<2x32xf32>
    %245 = math.tanh %244 : vector<2x32xf32>
    %246 = arith.mulf %241, %245 : vector<2x32xf32>
    %247 = vector.extract_strided_slice %221 {offsets = [0, 0], sizes = [2, 32], strides = [1, 1]} : vector<2x128xf32> to vector<2x32xf32>
    %248 = arith.negf %247 : vector<2x32xf32>
    %249 = math.exp %248 : vector<2x32xf32>
    %cst_57 = arith.constant 1.000000e+00 : f32
    %250 = vector.broadcast %cst_57 : f32 to vector<2x32xf32>
    %251 = arith.addf %250, %249 : vector<2x32xf32>
    %252 = arith.divf %250, %251 : vector<2x32xf32>
    %253 = vector.extract_strided_slice %221 {offsets = [0, 32], sizes = [2, 32], strides = [1, 1]} : vector<2x128xf32> to vector<2x32xf32>
    %254 = arith.negf %253 : vector<2x32xf32>
    %255 = math.exp %254 : vector<2x32xf32>
    %cst_58 = arith.constant 1.000000e+00 : f32
    %256 = vector.broadcast %cst_58 : f32 to vector<2x32xf32>
    %257 = arith.addf %256, %255 : vector<2x32xf32>
    %258 = arith.divf %256, %257 : vector<2x32xf32>
    %259 = vector.extract_strided_slice %221 {offsets = [0, 64], sizes = [2, 32], strides = [1, 1]} : vector<2x128xf32> to vector<2x32xf32>
    %260 = math.tanh %259 : vector<2x32xf32>
    %261 = vector.extract_strided_slice %221 {offsets = [0, 96], sizes = [2, 32], strides = [1, 1]} : vector<2x128xf32> to vector<2x32xf32>
    %262 = arith.negf %261 : vector<2x32xf32>
    %263 = math.exp %262 : vector<2x32xf32>
    %cst_59 = arith.constant 1.000000e+00 : f32
    %264 = vector.broadcast %cst_59 : f32 to vector<2x32xf32>
    %265 = arith.addf %264, %263 : vector<2x32xf32>
    %266 = arith.divf %264, %265 : vector<2x32xf32>
    %267 = arith.mulf %258, %200 : vector<2x32xf32>
    %268 = arith.mulf %252, %260 : vector<2x32xf32>
    %269 = arith.addf %267, %268 : vector<2x32xf32>
    %270 = math.tanh %269 : vector<2x32xf32>
    %271 = arith.mulf %266, %270 : vector<2x32xf32>
    %272 = vector.broadcast %210 : vector<2x1xf32> to vector<2x32xf32>
    %273 = arith.mulf %272, %246 : vector<2x32xf32>
    %274 = arith.index_cast %c2_i32 : i32 to index
    %c0_60 = arith.constant 0 : index
    %c0_61 = arith.constant 0 : index
    %275 = vector.load %arg5[%274, %c0_60, %c0_61] : memref<8x2x64xf32, #tpu.memory_space<vmem>>, vector<1x2x32xf32>
    %276 = vector.shape_cast %275 : vector<1x2x32xf32> to vector<2x32xf32>
    %277 = vector.shape_cast %273 : vector<2x32xf32> to vector<1x2x32xf32>
    tpu.vector_store %arg5[%274, %c0_60, %c0_61], %277 {strides = array<i32>} : memref<8x2x64xf32, #tpu.memory_space<vmem>>, vector<1x2x32xf32>,
    %278 = vector.broadcast %213 : vector<2x1xf32> to vector<2x32xf32>
    %279 = arith.mulf %278, %271 : vector<2x32xf32>
    %280 = arith.index_cast %201 : i32 to index
    %c0_62 = arith.constant 0 : index
    %c32_63 = arith.constant 32 : index
    %281 = vector.load %arg5[%280, %c0_62, %c32_63] : memref<8x2x64xf32, #tpu.memory_space<vmem>>, vector<1x2x32xf32>
    %282 = vector.shape_cast %281 : vector<1x2x32xf32> to vector<2x32xf32>
    %283 = vector.shape_cast %279 : vector<2x32xf32> to vector<1x2x32xf32>
    tpu.vector_store %arg5[%280, %c0_62, %c32_63], %283 {strides = array<i32>} : memref<8x2x64xf32, #tpu.memory_space<vmem>>, vector<1x2x32xf32>,
    %284 = arith.subf %246, %188 : vector<2x32xf32>
    %285 = vector.broadcast %210 : vector<2x1xf32> to vector<2x32xf32>
    %286 = arith.mulf %285, %284 : vector<2x32xf32>
    %287 = arith.addf %188, %286 : vector<2x32xf32>
    %288 = arith.subf %244, %192 : vector<2x32xf32>
    %289 = vector.broadcast %210 : vector<2x1xf32> to vector<2x32xf32>
    %290 = arith.mulf %289, %288 : vector<2x32xf32>
    %291 = arith.addf %192, %290 : vector<2x32xf32>
    %292 = arith.subf %271, %196 : vector<2x32xf32>
    %293 = vector.broadcast %213 : vector<2x1xf32> to vector<2x32xf32>
    %294 = arith.mulf %293, %292 : vector<2x32xf32>
    %295 = arith.addf %196, %294 : vector<2x32xf32>
    %296 = arith.subf %269, %200 : vector<2x32xf32>
    %297 = vector.broadcast %213 : vector<2x1xf32> to vector<2x32xf32>
    %298 = arith.mulf %297, %296 : vector<2x32xf32>
    %299 = arith.addf %200, %298 : vector<2x32xf32>
    %c3_i32 = arith.constant 3 : i32
    %c7_i32_64 = arith.constant 7 : i32
    %300 = arith.subi %c7_i32_64, %c3_i32 : i32
    %301 = arith.index_cast %c3_i32 : i32 to index
    %c0_65 = arith.constant 0 : index
    %c0_66 = arith.constant 0 : index
    %302 = vector.load %arg2[%301, %c0_65, %c0_66] : memref<8x2x256xf32, #tpu.memory_space<vmem>>, vector<1x2x256xf32>
    %303 = vector.shape_cast %302 : vector<1x2x256xf32> to vector<2x256xf32>
    %304 = arith.index_cast %300 : i32 to index
    %c0_67 = arith.constant 0 : index
    %c0_68 = arith.constant 0 : index
    %305 = vector.load %arg2[%304, %c0_67, %c0_68] : memref<8x2x256xf32, #tpu.memory_space<vmem>>, vector<1x2x256xf32>
    %306 = vector.shape_cast %305 : vector<1x2x256xf32> to vector<2x256xf32>
    %307 = arith.index_cast %c3_i32 : i32 to index
    %c0_69 = arith.constant 0 : index
    %c0_70 = arith.constant 0 : index
    %308 = vector.load %arg1[%307, %c0_69, %c0_70] : memref<8x2x1xf32, #tpu.memory_space<vmem>>, vector<1x2x1xf32>
    %309 = vector.shape_cast %308 : vector<1x2x1xf32> to vector<2x1xf32>
    %310 = arith.index_cast %300 : i32 to index
    %c0_71 = arith.constant 0 : index
    %c0_72 = arith.constant 0 : index
    %311 = vector.load %arg1[%310, %c0_71, %c0_72] : memref<8x2x1xf32, #tpu.memory_space<vmem>>, vector<1x2x1xf32>
    %312 = vector.shape_cast %311 : vector<1x2x1xf32> to vector<2x1xf32>
    %313 = vector.extract_strided_slice %303 {offsets = [0, 0], sizes = [2, 128], strides = [1, 1]} : vector<2x256xf32> to vector<2x128xf32>
    %314 = arith.truncf %287 : vector<2x32xf32> to vector<2x32xbf16>
    %cst_73 = arith.constant dense<0.000000e+00> : vector<2x128xf32>
    %315 = tpu.matmul %314, %0, %cst_73 {dimension_numbers = #tpu.dot_dimension_numbers<[1], [0], [0], [1], [0, 0, 1, 1], [], []>} : vector<2x32xbf16>, vector<32x128xbf16>, vector<2x128xf32> -> vector<2x128xf32>
    %316 = arith.addf %313, %315 : vector<2x128xf32>
    %317 = vector.extract_strided_slice %306 {offsets = [0, 128], sizes = [2, 128], strides = [1, 1]} : vector<2x256xf32> to vector<2x128xf32>
    %318 = arith.truncf %295 : vector<2x32xf32> to vector<2x32xbf16>
    %cst_74 = arith.constant dense<0.000000e+00> : vector<2x128xf32>
    %319 = tpu.matmul %318, %1, %cst_74 {dimension_numbers = #tpu.dot_dimension_numbers<[1], [0], [0], [1], [0, 0, 1, 1], [], []>} : vector<2x32xbf16>, vector<32x128xbf16>, vector<2x128xf32> -> vector<2x128xf32>
    %320 = arith.addf %317, %319 : vector<2x128xf32>
    %321 = vector.extract_strided_slice %316 {offsets = [0, 0], sizes = [2, 32], strides = [1, 1]} : vector<2x128xf32> to vector<2x32xf32>
    %322 = arith.negf %321 : vector<2x32xf32>
    %323 = math.exp %322 : vector<2x32xf32>
    %cst_75 = arith.constant 1.000000e+00 : f32
    %324 = vector.broadcast %cst_75 : f32 to vector<2x32xf32>
    %325 = arith.addf %324, %323 : vector<2x32xf32>
    %326 = arith.divf %324, %325 : vector<2x32xf32>
    %327 = vector.extract_strided_slice %316 {offsets = [0, 32], sizes = [2, 32], strides = [1, 1]} : vector<2x128xf32> to vector<2x32xf32>
    %328 = arith.negf %327 : vector<2x32xf32>
    %329 = math.exp %328 : vector<2x32xf32>
    %cst_76 = arith.constant 1.000000e+00 : f32
    %330 = vector.broadcast %cst_76 : f32 to vector<2x32xf32>
    %331 = arith.addf %330, %329 : vector<2x32xf32>
    %332 = arith.divf %330, %331 : vector<2x32xf32>
    %333 = vector.extract_strided_slice %316 {offsets = [0, 64], sizes = [2, 32], strides = [1, 1]} : vector<2x128xf32> to vector<2x32xf32>
    %334 = math.tanh %333 : vector<2x32xf32>
    %335 = vector.extract_strided_slice %316 {offsets = [0, 96], sizes = [2, 32], strides = [1, 1]} : vector<2x128xf32> to vector<2x32xf32>
    %336 = arith.negf %335 : vector<2x32xf32>
    %337 = math.exp %336 : vector<2x32xf32>
    %cst_77 = arith.constant 1.000000e+00 : f32
    %338 = vector.broadcast %cst_77 : f32 to vector<2x32xf32>
    %339 = arith.addf %338, %337 : vector<2x32xf32>
    %340 = arith.divf %338, %339 : vector<2x32xf32>
    %341 = arith.mulf %332, %291 : vector<2x32xf32>
    %342 = arith.mulf %326, %334 : vector<2x32xf32>
    %343 = arith.addf %341, %342 : vector<2x32xf32>
    %344 = math.tanh %343 : vector<2x32xf32>
    %345 = arith.mulf %340, %344 : vector<2x32xf32>
    %346 = vector.extract_strided_slice %320 {offsets = [0, 0], sizes = [2, 32], strides = [1, 1]} : vector<2x128xf32> to vector<2x32xf32>
    %347 = arith.negf %346 : vector<2x32xf32>
    %348 = math.exp %347 : vector<2x32xf32>
    %cst_78 = arith.constant 1.000000e+00 : f32
    %349 = vector.broadcast %cst_78 : f32 to vector<2x32xf32>
    %350 = arith.addf %349, %348 : vector<2x32xf32>
    %351 = arith.divf %349, %350 : vector<2x32xf32>
    %352 = vector.extract_strided_slice %320 {offsets = [0, 32], sizes = [2, 32], strides = [1, 1]} : vector<2x128xf32> to vector<2x32xf32>
    %353 = arith.negf %352 : vector<2x32xf32>
    %354 = math.exp %353 : vector<2x32xf32>
    %cst_79 = arith.constant 1.000000e+00 : f32
    %355 = vector.broadcast %cst_79 : f32 to vector<2x32xf32>
    %356 = arith.addf %355, %354 : vector<2x32xf32>
    %357 = arith.divf %355, %356 : vector<2x32xf32>
    %358 = vector.extract_strided_slice %320 {offsets = [0, 64], sizes = [2, 32], strides = [1, 1]} : vector<2x128xf32> to vector<2x32xf32>
    %359 = math.tanh %358 : vector<2x32xf32>
    %360 = vector.extract_strided_slice %320 {offsets = [0, 96], sizes = [2, 32], strides = [1, 1]} : vector<2x128xf32> to vector<2x32xf32>
    %361 = arith.negf %360 : vector<2x32xf32>
    %362 = math.exp %361 : vector<2x32xf32>
    %cst_80 = arith.constant 1.000000e+00 : f32
    %363 = vector.broadcast %cst_80 : f32 to vector<2x32xf32>
    %364 = arith.addf %363, %362 : vector<2x32xf32>
    %365 = arith.divf %363, %364 : vector<2x32xf32>
    %366 = arith.mulf %357, %299 : vector<2x32xf32>
    %367 = arith.mulf %351, %359 : vector<2x32xf32>
    %368 = arith.addf %366, %367 : vector<2x32xf32>
    %369 = math.tanh %368 : vector<2x32xf32>
    %370 = arith.mulf %365, %369 : vector<2x32xf32>
    %371 = vector.broadcast %309 : vector<2x1xf32> to vector<2x32xf32>
    %372 = arith.mulf %371, %345 : vector<2x32xf32>
    %373 = arith.index_cast %c3_i32 : i32 to index
    %c0_81 = arith.constant 0 : index
    %c0_82 = arith.constant 0 : index
    %374 = vector.load %arg5[%373, %c0_81, %c0_82] : memref<8x2x64xf32, #tpu.memory_space<vmem>>, vector<1x2x32xf32>
    %375 = vector.shape_cast %374 : vector<1x2x32xf32> to vector<2x32xf32>
    %376 = vector.shape_cast %372 : vector<2x32xf32> to vector<1x2x32xf32>
    tpu.vector_store %arg5[%373, %c0_81, %c0_82], %376 {strides = array<i32>} : memref<8x2x64xf32, #tpu.memory_space<vmem>>, vector<1x2x32xf32>,
    %377 = vector.broadcast %312 : vector<2x1xf32> to vector<2x32xf32>
    %378 = arith.mulf %377, %370 : vector<2x32xf32>
    %379 = arith.index_cast %300 : i32 to index
    %c0_83 = arith.constant 0 : index
    %c32_84 = arith.constant 32 : index
    %380 = vector.load %arg5[%379, %c0_83, %c32_84] : memref<8x2x64xf32, #tpu.memory_space<vmem>>, vector<1x2x32xf32>
    %381 = vector.shape_cast %380 : vector<1x2x32xf32> to vector<2x32xf32>
    %382 = vector.shape_cast %378 : vector<2x32xf32> to vector<1x2x32xf32>
    tpu.vector_store %arg5[%379, %c0_83, %c32_84], %382 {strides = array<i32>} : memref<8x2x64xf32, #tpu.memory_space<vmem>>, vector<1x2x32xf32>,
    %383 = arith.subf %345, %287 : vector<2x32xf32>
    %384 = vector.broadcast %309 : vector<2x1xf32> to vector<2x32xf32>
    %385 = arith.mulf %384, %383 : vector<2x32xf32>
    %386 = arith.addf %287, %385 : vector<2x32xf32>
    %387 = arith.subf %343, %291 : vector<2x32xf32>
    %388 = vector.broadcast %309 : vector<2x1xf32> to vector<2x32xf32>
    %389 = arith.mulf %388, %387 : vector<2x32xf32>
    %390 = arith.addf %291, %389 : vector<2x32xf32>
    %391 = arith.subf %370, %295 : vector<2x32xf32>
    %392 = vector.broadcast %312 : vector<2x1xf32> to vector<2x32xf32>
    %393 = arith.mulf %392, %391 : vector<2x32xf32>
    %394 = arith.addf %295, %393 : vector<2x32xf32>
    %395 = arith.subf %368, %299 : vector<2x32xf32>
    %396 = vector.broadcast %312 : vector<2x1xf32> to vector<2x32xf32>
    %397 = arith.mulf %396, %395 : vector<2x32xf32>
    %398 = arith.addf %299, %397 : vector<2x32xf32>
    %c4_i32 = arith.constant 4 : i32
    %c7_i32_85 = arith.constant 7 : i32
    %399 = arith.subi %c7_i32_85, %c4_i32 : i32
    %400 = arith.index_cast %c4_i32 : i32 to index
    %c0_86 = arith.constant 0 : index
    %c0_87 = arith.constant 0 : index
    %401 = vector.load %arg2[%400, %c0_86, %c0_87] : memref<8x2x256xf32, #tpu.memory_space<vmem>>, vector<1x2x256xf32>
    %402 = vector.shape_cast %401 : vector<1x2x256xf32> to vector<2x256xf32>
    %403 = arith.index_cast %399 : i32 to index
    %c0_88 = arith.constant 0 : index
    %c0_89 = arith.constant 0 : index
    %404 = vector.load %arg2[%403, %c0_88, %c0_89] : memref<8x2x256xf32, #tpu.memory_space<vmem>>, vector<1x2x256xf32>
    %405 = vector.shape_cast %404 : vector<1x2x256xf32> to vector<2x256xf32>
    %406 = arith.index_cast %c4_i32 : i32 to index
    %c0_90 = arith.constant 0 : index
    %c0_91 = arith.constant 0 : index
    %407 = vector.load %arg1[%406, %c0_90, %c0_91] : memref<8x2x1xf32, #tpu.memory_space<vmem>>, vector<1x2x1xf32>
    %408 = vector.shape_cast %407 : vector<1x2x1xf32> to vector<2x1xf32>
    %409 = arith.index_cast %399 : i32 to index
    %c0_92 = arith.constant 0 : index
    %c0_93 = arith.constant 0 : index
    %410 = vector.load %arg1[%409, %c0_92, %c0_93] : memref<8x2x1xf32, #tpu.memory_space<vmem>>, vector<1x2x1xf32>
    %411 = vector.shape_cast %410 : vector<1x2x1xf32> to vector<2x1xf32>
    %412 = vector.extract_strided_slice %402 {offsets = [0, 0], sizes = [2, 128], strides = [1, 1]} : vector<2x256xf32> to vector<2x128xf32>
    %413 = arith.truncf %386 : vector<2x32xf32> to vector<2x32xbf16>
    %cst_94 = arith.constant dense<0.000000e+00> : vector<2x128xf32>
    %414 = tpu.matmul %413, %0, %cst_94 {dimension_numbers = #tpu.dot_dimension_numbers<[1], [0], [0], [1], [0, 0, 1, 1], [], []>} : vector<2x32xbf16>, vector<32x128xbf16>, vector<2x128xf32> -> vector<2x128xf32>
    %415 = arith.addf %412, %414 : vector<2x128xf32>
    %416 = vector.extract_strided_slice %405 {offsets = [0, 128], sizes = [2, 128], strides = [1, 1]} : vector<2x256xf32> to vector<2x128xf32>
    %417 = arith.truncf %394 : vector<2x32xf32> to vector<2x32xbf16>
    %cst_95 = arith.constant dense<0.000000e+00> : vector<2x128xf32>
    %418 = tpu.matmul %417, %1, %cst_95 {dimension_numbers = #tpu.dot_dimension_numbers<[1], [0], [0], [1], [0, 0, 1, 1], [], []>} : vector<2x32xbf16>, vector<32x128xbf16>, vector<2x128xf32> -> vector<2x128xf32>
    %419 = arith.addf %416, %418 : vector<2x128xf32>
    %420 = vector.extract_strided_slice %415 {offsets = [0, 0], sizes = [2, 32], strides = [1, 1]} : vector<2x128xf32> to vector<2x32xf32>
    %421 = arith.negf %420 : vector<2x32xf32>
    %422 = math.exp %421 : vector<2x32xf32>
    %cst_96 = arith.constant 1.000000e+00 : f32
    %423 = vector.broadcast %cst_96 : f32 to vector<2x32xf32>
    %424 = arith.addf %423, %422 : vector<2x32xf32>
    %425 = arith.divf %423, %424 : vector<2x32xf32>
    %426 = vector.extract_strided_slice %415 {offsets = [0, 32], sizes = [2, 32], strides = [1, 1]} : vector<2x128xf32> to vector<2x32xf32>
    %427 = arith.negf %426 : vector<2x32xf32>
    %428 = math.exp %427 : vector<2x32xf32>
    %cst_97 = arith.constant 1.000000e+00 : f32
    %429 = vector.broadcast %cst_97 : f32 to vector<2x32xf32>
    %430 = arith.addf %429, %428 : vector<2x32xf32>
    %431 = arith.divf %429, %430 : vector<2x32xf32>
    %432 = vector.extract_strided_slice %415 {offsets = [0, 64], sizes = [2, 32], strides = [1, 1]} : vector<2x128xf32> to vector<2x32xf32>
    %433 = math.tanh %432 : vector<2x32xf32>
    %434 = vector.extract_strided_slice %415 {offsets = [0, 96], sizes = [2, 32], strides = [1, 1]} : vector<2x128xf32> to vector<2x32xf32>
    %435 = arith.negf %434 : vector<2x32xf32>
    %436 = math.exp %435 : vector<2x32xf32>
    %cst_98 = arith.constant 1.000000e+00 : f32
    %437 = vector.broadcast %cst_98 : f32 to vector<2x32xf32>
    %438 = arith.addf %437, %436 : vector<2x32xf32>
    %439 = arith.divf %437, %438 : vector<2x32xf32>
    %440 = arith.mulf %431, %390 : vector<2x32xf32>
    %441 = arith.mulf %425, %433 : vector<2x32xf32>
    %442 = arith.addf %440, %441 : vector<2x32xf32>
    %443 = math.tanh %442 : vector<2x32xf32>
    %444 = arith.mulf %439, %443 : vector<2x32xf32>
    %445 = vector.extract_strided_slice %419 {offsets = [0, 0], sizes = [2, 32], strides = [1, 1]} : vector<2x128xf32> to vector<2x32xf32>
    %446 = arith.negf %445 : vector<2x32xf32>
    %447 = math.exp %446 : vector<2x32xf32>
    %cst_99 = arith.constant 1.000000e+00 : f32
    %448 = vector.broadcast %cst_99 : f32 to vector<2x32xf32>
    %449 = arith.addf %448, %447 : vector<2x32xf32>
    %450 = arith.divf %448, %449 : vector<2x32xf32>
    %451 = vector.extract_strided_slice %419 {offsets = [0, 32], sizes = [2, 32], strides = [1, 1]} : vector<2x128xf32> to vector<2x32xf32>
    %452 = arith.negf %451 : vector<2x32xf32>
    %453 = math.exp %452 : vector<2x32xf32>
    %cst_100 = arith.constant 1.000000e+00 : f32
    %454 = vector.broadcast %cst_100 : f32 to vector<2x32xf32>
    %455 = arith.addf %454, %453 : vector<2x32xf32>
    %456 = arith.divf %454, %455 : vector<2x32xf32>
    %457 = vector.extract_strided_slice %419 {offsets = [0, 64], sizes = [2, 32], strides = [1, 1]} : vector<2x128xf32> to vector<2x32xf32>
    %458 = math.tanh %457 : vector<2x32xf32>
    %459 = vector.extract_strided_slice %419 {offsets = [0, 96], sizes = [2, 32], strides = [1, 1]} : vector<2x128xf32> to vector<2x32xf32>
    %460 = arith.negf %459 : vector<2x32xf32>
    %461 = math.exp %460 : vector<2x32xf32>
    %cst_101 = arith.constant 1.000000e+00 : f32
    %462 = vector.broadcast %cst_101 : f32 to vector<2x32xf32>
    %463 = arith.addf %462, %461 : vector<2x32xf32>
    %464 = arith.divf %462, %463 : vector<2x32xf32>
    %465 = arith.mulf %456, %398 : vector<2x32xf32>
    %466 = arith.mulf %450, %458 : vector<2x32xf32>
    %467 = arith.addf %465, %466 : vector<2x32xf32>
    %468 = math.tanh %467 : vector<2x32xf32>
    %469 = arith.mulf %464, %468 : vector<2x32xf32>
    %470 = vector.broadcast %408 : vector<2x1xf32> to vector<2x32xf32>
    %471 = arith.mulf %470, %444 : vector<2x32xf32>
    %472 = arith.index_cast %c4_i32 : i32 to index
    %c0_102 = arith.constant 0 : index
    %c0_103 = arith.constant 0 : index
    %473 = vector.load %arg5[%472, %c0_102, %c0_103] : memref<8x2x64xf32, #tpu.memory_space<vmem>>, vector<1x2x32xf32>
    %474 = vector.shape_cast %473 : vector<1x2x32xf32> to vector<2x32xf32>
    %475 = vector.shape_cast %471 : vector<2x32xf32> to vector<1x2x32xf32>
    tpu.vector_store %arg5[%472, %c0_102, %c0_103], %475 {strides = array<i32>} : memref<8x2x64xf32, #tpu.memory_space<vmem>>, vector<1x2x32xf32>,
    %476 = vector.broadcast %411 : vector<2x1xf32> to vector<2x32xf32>
    %477 = arith.mulf %476, %469 : vector<2x32xf32>
    %478 = arith.index_cast %399 : i32 to index
    %c0_104 = arith.constant 0 : index
    %c32_105 = arith.constant 32 : index
    %479 = vector.load %arg5[%478, %c0_104, %c32_105] : memref<8x2x64xf32, #tpu.memory_space<vmem>>, vector<1x2x32xf32>
    %480 = vector.shape_cast %479 : vector<1x2x32xf32> to vector<2x32xf32>
    %481 = vector.shape_cast %477 : vector<2x32xf32> to vector<1x2x32xf32>
    tpu.vector_store %arg5[%478, %c0_104, %c32_105], %481 {strides = array<i32>} : memref<8x2x64xf32, #tpu.memory_space<vmem>>, vector<1x2x32xf32>,
    %482 = arith.subf %444, %386 : vector<2x32xf32>
    %483 = vector.broadcast %408 : vector<2x1xf32> to vector<2x32xf32>
    %484 = arith.mulf %483, %482 : vector<2x32xf32>
    %485 = arith.addf %386, %484 : vector<2x32xf32>
    %486 = arith.subf %442, %390 : vector<2x32xf32>
    %487 = vector.broadcast %408 : vector<2x1xf32> to vector<2x32xf32>
    %488 = arith.mulf %487, %486 : vector<2x32xf32>
    %489 = arith.addf %390, %488 : vector<2x32xf32>
    %490 = arith.subf %469, %394 : vector<2x32xf32>
    %491 = vector.broadcast %411 : vector<2x1xf32> to vector<2x32xf32>
    %492 = arith.mulf %491, %490 : vector<2x32xf32>
    %493 = arith.addf %394, %492 : vector<2x32xf32>
    %494 = arith.subf %467, %398 : vector<2x32xf32>
    %495 = vector.broadcast %411 : vector<2x1xf32> to vector<2x32xf32>
    %496 = arith.mulf %495, %494 : vector<2x32xf32>
    %497 = arith.addf %398, %496 : vector<2x32xf32>
    %c5_i32 = arith.constant 5 : i32
    %c7_i32_106 = arith.constant 7 : i32
    %498 = arith.subi %c7_i32_106, %c5_i32 : i32
    %499 = arith.index_cast %c5_i32 : i32 to index
    %c0_107 = arith.constant 0 : index
    %c0_108 = arith.constant 0 : index
    %500 = vector.load %arg2[%499, %c0_107, %c0_108] : memref<8x2x256xf32, #tpu.memory_space<vmem>>, vector<1x2x256xf32>
    %501 = vector.shape_cast %500 : vector<1x2x256xf32> to vector<2x256xf32>
    %502 = arith.index_cast %498 : i32 to index
    %c0_109 = arith.constant 0 : index
    %c0_110 = arith.constant 0 : index
    %503 = vector.load %arg2[%502, %c0_109, %c0_110] : memref<8x2x256xf32, #tpu.memory_space<vmem>>, vector<1x2x256xf32>
    %504 = vector.shape_cast %503 : vector<1x2x256xf32> to vector<2x256xf32>
    %505 = arith.index_cast %c5_i32 : i32 to index
    %c0_111 = arith.constant 0 : index
    %c0_112 = arith.constant 0 : index
    %506 = vector.load %arg1[%505, %c0_111, %c0_112] : memref<8x2x1xf32, #tpu.memory_space<vmem>>, vector<1x2x1xf32>
    %507 = vector.shape_cast %506 : vector<1x2x1xf32> to vector<2x1xf32>
    %508 = arith.index_cast %498 : i32 to index
    %c0_113 = arith.constant 0 : index
    %c0_114 = arith.constant 0 : index
    %509 = vector.load %arg1[%508, %c0_113, %c0_114] : memref<8x2x1xf32, #tpu.memory_space<vmem>>, vector<1x2x1xf32>
    %510 = vector.shape_cast %509 : vector<1x2x1xf32> to vector<2x1xf32>
    %511 = vector.extract_strided_slice %501 {offsets = [0, 0], sizes = [2, 128], strides = [1, 1]} : vector<2x256xf32> to vector<2x128xf32>
    %512 = arith.truncf %485 : vector<2x32xf32> to vector<2x32xbf16>
    %cst_115 = arith.constant dense<0.000000e+00> : vector<2x128xf32>
    %513 = tpu.matmul %512, %0, %cst_115 {dimension_numbers = #tpu.dot_dimension_numbers<[1], [0], [0], [1], [0, 0, 1, 1], [], []>} : vector<2x32xbf16>, vector<32x128xbf16>, vector<2x128xf32> -> vector<2x128xf32>
    %514 = arith.addf %511, %513 : vector<2x128xf32>
    %515 = vector.extract_strided_slice %504 {offsets = [0, 128], sizes = [2, 128], strides = [1, 1]} : vector<2x256xf32> to vector<2x128xf32>
    %516 = arith.truncf %493 : vector<2x32xf32> to vector<2x32xbf16>
    %cst_116 = arith.constant dense<0.000000e+00> : vector<2x128xf32>
    %517 = tpu.matmul %516, %1, %cst_116 {dimension_numbers = #tpu.dot_dimension_numbers<[1], [0], [0], [1], [0, 0, 1, 1], [], []>} : vector<2x32xbf16>, vector<32x128xbf16>, vector<2x128xf32> -> vector<2x128xf32>
    %518 = arith.addf %515, %517 : vector<2x128xf32>
    %519 = vector.extract_strided_slice %514 {offsets = [0, 0], sizes = [2, 32], strides = [1, 1]} : vector<2x128xf32> to vector<2x32xf32>
    %520 = arith.negf %519 : vector<2x32xf32>
    %521 = math.exp %520 : vector<2x32xf32>
    %cst_117 = arith.constant 1.000000e+00 : f32
    %522 = vector.broadcast %cst_117 : f32 to vector<2x32xf32>
    %523 = arith.addf %522, %521 : vector<2x32xf32>
    %524 = arith.divf %522, %523 : vector<2x32xf32>
    %525 = vector.extract_strided_slice %514 {offsets = [0, 32], sizes = [2, 32], strides = [1, 1]} : vector<2x128xf32> to vector<2x32xf32>
    %526 = arith.negf %525 : vector<2x32xf32>
    %527 = math.exp %526 : vector<2x32xf32>
    %cst_118 = arith.constant 1.000000e+00 : f32
    %528 = vector.broadcast %cst_118 : f32 to vector<2x32xf32>
    %529 = arith.addf %528, %527 : vector<2x32xf32>
    %530 = arith.divf %528, %529 : vector<2x32xf32>
    %531 = vector.extract_strided_slice %514 {offsets = [0, 64], sizes = [2, 32], strides = [1, 1]} : vector<2x128xf32> to vector<2x32xf32>
    %532 = math.tanh %531 : vector<2x32xf32>
    %533 = vector.extract_strided_slice %514 {offsets = [0, 96], sizes = [2, 32], strides = [1, 1]} : vector<2x128xf32> to vector<2x32xf32>
    %534 = arith.negf %533 : vector<2x32xf32>
    %535 = math.exp %534 : vector<2x32xf32>
    %cst_119 = arith.constant 1.000000e+00 : f32
    %536 = vector.broadcast %cst_119 : f32 to vector<2x32xf32>
    %537 = arith.addf %536, %535 : vector<2x32xf32>
    %538 = arith.divf %536, %537 : vector<2x32xf32>
    %539 = arith.mulf %530, %489 : vector<2x32xf32>
    %540 = arith.mulf %524, %532 : vector<2x32xf32>
    %541 = arith.addf %539, %540 : vector<2x32xf32>
    %542 = math.tanh %541 : vector<2x32xf32>
    %543 = arith.mulf %538, %542 : vector<2x32xf32>
    %544 = vector.extract_strided_slice %518 {offsets = [0, 0], sizes = [2, 32], strides = [1, 1]} : vector<2x128xf32> to vector<2x32xf32>
    %545 = arith.negf %544 : vector<2x32xf32>
    %546 = math.exp %545 : vector<2x32xf32>
    %cst_120 = arith.constant 1.000000e+00 : f32
    %547 = vector.broadcast %cst_120 : f32 to vector<2x32xf32>
    %548 = arith.addf %547, %546 : vector<2x32xf32>
    %549 = arith.divf %547, %548 : vector<2x32xf32>
    %550 = vector.extract_strided_slice %518 {offsets = [0, 32], sizes = [2, 32], strides = [1, 1]} : vector<2x128xf32> to vector<2x32xf32>
    %551 = arith.negf %550 : vector<2x32xf32>
    %552 = math.exp %551 : vector<2x32xf32>
    %cst_121 = arith.constant 1.000000e+00 : f32
    %553 = vector.broadcast %cst_121 : f32 to vector<2x32xf32>
    %554 = arith.addf %553, %552 : vector<2x32xf32>
    %555 = arith.divf %553, %554 : vector<2x32xf32>
    %556 = vector.extract_strided_slice %518 {offsets = [0, 64], sizes = [2, 32], strides = [1, 1]} : vector<2x128xf32> to vector<2x32xf32>
    %557 = math.tanh %556 : vector<2x32xf32>
    %558 = vector.extract_strided_slice %518 {offsets = [0, 96], sizes = [2, 32], strides = [1, 1]} : vector<2x128xf32> to vector<2x32xf32>
    %559 = arith.negf %558 : vector<2x32xf32>
    %560 = math.exp %559 : vector<2x32xf32>
    %cst_122 = arith.constant 1.000000e+00 : f32
    %561 = vector.broadcast %cst_122 : f32 to vector<2x32xf32>
    %562 = arith.addf %561, %560 : vector<2x32xf32>
    %563 = arith.divf %561, %562 : vector<2x32xf32>
    %564 = arith.mulf %555, %497 : vector<2x32xf32>
    %565 = arith.mulf %549, %557 : vector<2x32xf32>
    %566 = arith.addf %564, %565 : vector<2x32xf32>
    %567 = math.tanh %566 : vector<2x32xf32>
    %568 = arith.mulf %563, %567 : vector<2x32xf32>
    %569 = vector.broadcast %507 : vector<2x1xf32> to vector<2x32xf32>
    %570 = arith.mulf %569, %543 : vector<2x32xf32>
    %571 = arith.index_cast %c5_i32 : i32 to index
    %c0_123 = arith.constant 0 : index
    %c0_124 = arith.constant 0 : index
    %572 = vector.load %arg5[%571, %c0_123, %c0_124] : memref<8x2x64xf32, #tpu.memory_space<vmem>>, vector<1x2x32xf32>
    %573 = vector.shape_cast %572 : vector<1x2x32xf32> to vector<2x32xf32>
    %574 = vector.shape_cast %570 : vector<2x32xf32> to vector<1x2x32xf32>
    tpu.vector_store %arg5[%571, %c0_123, %c0_124], %574 {strides = array<i32>} : memref<8x2x64xf32, #tpu.memory_space<vmem>>, vector<1x2x32xf32>,
    %575 = vector.broadcast %510 : vector<2x1xf32> to vector<2x32xf32>
    %576 = arith.mulf %575, %568 : vector<2x32xf32>
    %577 = arith.index_cast %498 : i32 to index
    %c0_125 = arith.constant 0 : index
    %c32_126 = arith.constant 32 : index
    %578 = vector.load %arg5[%577, %c0_125, %c32_126] : memref<8x2x64xf32, #tpu.memory_space<vmem>>, vector<1x2x32xf32>
    %579 = vector.shape_cast %578 : vector<1x2x32xf32> to vector<2x32xf32>
    %580 = vector.shape_cast %576 : vector<2x32xf32> to vector<1x2x32xf32>
    tpu.vector_store %arg5[%577, %c0_125, %c32_126], %580 {strides = array<i32>} : memref<8x2x64xf32, #tpu.memory_space<vmem>>, vector<1x2x32xf32>,
    %581 = arith.subf %543, %485 : vector<2x32xf32>
    %582 = vector.broadcast %507 : vector<2x1xf32> to vector<2x32xf32>
    %583 = arith.mulf %582, %581 : vector<2x32xf32>
    %584 = arith.addf %485, %583 : vector<2x32xf32>
    %585 = arith.subf %541, %489 : vector<2x32xf32>
    %586 = vector.broadcast %507 : vector<2x1xf32> to vector<2x32xf32>
    %587 = arith.mulf %586, %585 : vector<2x32xf32>
    %588 = arith.addf %489, %587 : vector<2x32xf32>
    %589 = arith.subf %568, %493 : vector<2x32xf32>
    %590 = vector.broadcast %510 : vector<2x1xf32> to vector<2x32xf32>
    %591 = arith.mulf %590, %589 : vector<2x32xf32>
    %592 = arith.addf %493, %591 : vector<2x32xf32>
    %593 = arith.subf %566, %497 : vector<2x32xf32>
    %594 = vector.broadcast %510 : vector<2x1xf32> to vector<2x32xf32>
    %595 = arith.mulf %594, %593 : vector<2x32xf32>
    %596 = arith.addf %497, %595 : vector<2x32xf32>
    %c6_i32 = arith.constant 6 : i32
    %c7_i32_127 = arith.constant 7 : i32
    %597 = arith.subi %c7_i32_127, %c6_i32 : i32
    %598 = arith.index_cast %c6_i32 : i32 to index
    %c0_128 = arith.constant 0 : index
    %c0_129 = arith.constant 0 : index
    %599 = vector.load %arg2[%598, %c0_128, %c0_129] : memref<8x2x256xf32, #tpu.memory_space<vmem>>, vector<1x2x256xf32>
    %600 = vector.shape_cast %599 : vector<1x2x256xf32> to vector<2x256xf32>
    %601 = arith.index_cast %597 : i32 to index
    %c0_130 = arith.constant 0 : index
    %c0_131 = arith.constant 0 : index
    %602 = vector.load %arg2[%601, %c0_130, %c0_131] : memref<8x2x256xf32, #tpu.memory_space<vmem>>, vector<1x2x256xf32>
    %603 = vector.shape_cast %602 : vector<1x2x256xf32> to vector<2x256xf32>
    %604 = arith.index_cast %c6_i32 : i32 to index
    %c0_132 = arith.constant 0 : index
    %c0_133 = arith.constant 0 : index
    %605 = vector.load %arg1[%604, %c0_132, %c0_133] : memref<8x2x1xf32, #tpu.memory_space<vmem>>, vector<1x2x1xf32>
    %606 = vector.shape_cast %605 : vector<1x2x1xf32> to vector<2x1xf32>
    %607 = arith.index_cast %597 : i32 to index
    %c0_134 = arith.constant 0 : index
    %c0_135 = arith.constant 0 : index
    %608 = vector.load %arg1[%607, %c0_134, %c0_135] : memref<8x2x1xf32, #tpu.memory_space<vmem>>, vector<1x2x1xf32>
    %609 = vector.shape_cast %608 : vector<1x2x1xf32> to vector<2x1xf32>
    %610 = vector.extract_strided_slice %600 {offsets = [0, 0], sizes = [2, 128], strides = [1, 1]} : vector<2x256xf32> to vector<2x128xf32>
    %611 = arith.truncf %584 : vector<2x32xf32> to vector<2x32xbf16>
    %cst_136 = arith.constant dense<0.000000e+00> : vector<2x128xf32>
    %612 = tpu.matmul %611, %0, %cst_136 {dimension_numbers = #tpu.dot_dimension_numbers<[1], [0], [0], [1], [0, 0, 1, 1], [], []>} : vector<2x32xbf16>, vector<32x128xbf16>, vector<2x128xf32> -> vector<2x128xf32>
    %613 = arith.addf %610, %612 : vector<2x128xf32>
    %614 = vector.extract_strided_slice %603 {offsets = [0, 128], sizes = [2, 128], strides = [1, 1]} : vector<2x256xf32> to vector<2x128xf32>
    %615 = arith.truncf %592 : vector<2x32xf32> to vector<2x32xbf16>
    %cst_137 = arith.constant dense<0.000000e+00> : vector<2x128xf32>
    %616 = tpu.matmul %615, %1, %cst_137 {dimension_numbers = #tpu.dot_dimension_numbers<[1], [0], [0], [1], [0, 0, 1, 1], [], []>} : vector<2x32xbf16>, vector<32x128xbf16>, vector<2x128xf32> -> vector<2x128xf32>
    %617 = arith.addf %614, %616 : vector<2x128xf32>
    %618 = vector.extract_strided_slice %613 {offsets = [0, 0], sizes = [2, 32], strides = [1, 1]} : vector<2x128xf32> to vector<2x32xf32>
    %619 = arith.negf %618 : vector<2x32xf32>
    %620 = math.exp %619 : vector<2x32xf32>
    %cst_138 = arith.constant 1.000000e+00 : f32
    %621 = vector.broadcast %cst_138 : f32 to vector<2x32xf32>
    %622 = arith.addf %621, %620 : vector<2x32xf32>
    %623 = arith.divf %621, %622 : vector<2x32xf32>
    %624 = vector.extract_strided_slice %613 {offsets = [0, 32], sizes = [2, 32], strides = [1, 1]} : vector<2x128xf32> to vector<2x32xf32>
    %625 = arith.negf %624 : vector<2x32xf32>
    %626 = math.exp %625 : vector<2x32xf32>
    %cst_139 = arith.constant 1.000000e+00 : f32
    %627 = vector.broadcast %cst_139 : f32 to vector<2x32xf32>
    %628 = arith.addf %627, %626 : vector<2x32xf32>
    %629 = arith.divf %627, %628 : vector<2x32xf32>
    %630 = vector.extract_strided_slice %613 {offsets = [0, 64], sizes = [2, 32], strides = [1, 1]} : vector<2x128xf32> to vector<2x32xf32>
    %631 = math.tanh %630 : vector<2x32xf32>
    %632 = vector.extract_strided_slice %613 {offsets = [0, 96], sizes = [2, 32], strides = [1, 1]} : vector<2x128xf32> to vector<2x32xf32>
    %633 = arith.negf %632 : vector<2x32xf32>
    %634 = math.exp %633 : vector<2x32xf32>
    %cst_140 = arith.constant 1.000000e+00 : f32
    %635 = vector.broadcast %cst_140 : f32 to vector<2x32xf32>
    %636 = arith.addf %635, %634 : vector<2x32xf32>
    %637 = arith.divf %635, %636 : vector<2x32xf32>
    %638 = arith.mulf %629, %588 : vector<2x32xf32>
    %639 = arith.mulf %623, %631 : vector<2x32xf32>
    %640 = arith.addf %638, %639 : vector<2x32xf32>
    %641 = math.tanh %640 : vector<2x32xf32>
    %642 = arith.mulf %637, %641 : vector<2x32xf32>
    %643 = vector.extract_strided_slice %617 {offsets = [0, 0], sizes = [2, 32], strides = [1, 1]} : vector<2x128xf32> to vector<2x32xf32>
    %644 = arith.negf %643 : vector<2x32xf32>
    %645 = math.exp %644 : vector<2x32xf32>
    %cst_141 = arith.constant 1.000000e+00 : f32
    %646 = vector.broadcast %cst_141 : f32 to vector<2x32xf32>
    %647 = arith.addf %646, %645 : vector<2x32xf32>
    %648 = arith.divf %646, %647 : vector<2x32xf32>
    %649 = vector.extract_strided_slice %617 {offsets = [0, 32], sizes = [2, 32], strides = [1, 1]} : vector<2x128xf32> to vector<2x32xf32>
    %650 = arith.negf %649 : vector<2x32xf32>
    %651 = math.exp %650 : vector<2x32xf32>
    %cst_142 = arith.constant 1.000000e+00 : f32
    %652 = vector.broadcast %cst_142 : f32 to vector<2x32xf32>
    %653 = arith.addf %652, %651 : vector<2x32xf32>
    %654 = arith.divf %652, %653 : vector<2x32xf32>
    %655 = vector.extract_strided_slice %617 {offsets = [0, 64], sizes = [2, 32], strides = [1, 1]} : vector<2x128xf32> to vector<2x32xf32>
    %656 = math.tanh %655 : vector<2x32xf32>
    %657 = vector.extract_strided_slice %617 {offsets = [0, 96], sizes = [2, 32], strides = [1, 1]} : vector<2x128xf32> to vector<2x32xf32>
    %658 = arith.negf %657 : vector<2x32xf32>
    %659 = math.exp %658 : vector<2x32xf32>
    %cst_143 = arith.constant 1.000000e+00 : f32
    %660 = vector.broadcast %cst_143 : f32 to vector<2x32xf32>
    %661 = arith.addf %660, %659 : vector<2x32xf32>
    %662 = arith.divf %660, %661 : vector<2x32xf32>
    %663 = arith.mulf %654, %596 : vector<2x32xf32>
    %664 = arith.mulf %648, %656 : vector<2x32xf32>
    %665 = arith.addf %663, %664 : vector<2x32xf32>
    %666 = math.tanh %665 : vector<2x32xf32>
    %667 = arith.mulf %662, %666 : vector<2x32xf32>
    %668 = vector.broadcast %606 : vector<2x1xf32> to vector<2x32xf32>
    %669 = arith.mulf %668, %642 : vector<2x32xf32>
    %670 = arith.index_cast %c6_i32 : i32 to index
    %c0_144 = arith.constant 0 : index
    %c0_145 = arith.constant 0 : index
    %671 = vector.load %arg5[%670, %c0_144, %c0_145] : memref<8x2x64xf32, #tpu.memory_space<vmem>>, vector<1x2x32xf32>
    %672 = vector.shape_cast %671 : vector<1x2x32xf32> to vector<2x32xf32>
    %673 = vector.shape_cast %669 : vector<2x32xf32> to vector<1x2x32xf32>
    tpu.vector_store %arg5[%670, %c0_144, %c0_145], %673 {strides = array<i32>} : memref<8x2x64xf32, #tpu.memory_space<vmem>>, vector<1x2x32xf32>,
    %674 = vector.broadcast %609 : vector<2x1xf32> to vector<2x32xf32>
    %675 = arith.mulf %674, %667 : vector<2x32xf32>
    %676 = arith.index_cast %597 : i32 to index
    %c0_146 = arith.constant 0 : index
    %c32_147 = arith.constant 32 : index
    %677 = vector.load %arg5[%676, %c0_146, %c32_147] : memref<8x2x64xf32, #tpu.memory_space<vmem>>, vector<1x2x32xf32>
    %678 = vector.shape_cast %677 : vector<1x2x32xf32> to vector<2x32xf32>
    %679 = vector.shape_cast %675 : vector<2x32xf32> to vector<1x2x32xf32>
    tpu.vector_store %arg5[%676, %c0_146, %c32_147], %679 {strides = array<i32>} : memref<8x2x64xf32, #tpu.memory_space<vmem>>, vector<1x2x32xf32>,
    %680 = arith.subf %642, %584 : vector<2x32xf32>
    %681 = vector.broadcast %606 : vector<2x1xf32> to vector<2x32xf32>
    %682 = arith.mulf %681, %680 : vector<2x32xf32>
    %683 = arith.addf %584, %682 : vector<2x32xf32>
    %684 = arith.subf %640, %588 : vector<2x32xf32>
    %685 = vector.broadcast %606 : vector<2x1xf32> to vector<2x32xf32>
    %686 = arith.mulf %685, %684 : vector<2x32xf32>
    %687 = arith.addf %588, %686 : vector<2x32xf32>
    %688 = arith.subf %667, %592 : vector<2x32xf32>
    %689 = vector.broadcast %609 : vector<2x1xf32> to vector<2x32xf32>
    %690 = arith.mulf %689, %688 : vector<2x32xf32>
    %691 = arith.addf %592, %690 : vector<2x32xf32>
    %692 = arith.subf %665, %596 : vector<2x32xf32>
    %693 = vector.broadcast %609 : vector<2x1xf32> to vector<2x32xf32>
    %694 = arith.mulf %693, %692 : vector<2x32xf32>
    %695 = arith.addf %596, %694 : vector<2x32xf32>
    %c7_i32_148 = arith.constant 7 : i32
    %c7_i32_149 = arith.constant 7 : i32
    %696 = arith.subi %c7_i32_149, %c7_i32_148 : i32
    %697 = arith.index_cast %c7_i32_148 : i32 to index
    %c0_150 = arith.constant 0 : index
    %c0_151 = arith.constant 0 : index
    %698 = vector.load %arg2[%697, %c0_150, %c0_151] : memref<8x2x256xf32, #tpu.memory_space<vmem>>, vector<1x2x256xf32>
    %699 = vector.shape_cast %698 : vector<1x2x256xf32> to vector<2x256xf32>
    %700 = arith.index_cast %696 : i32 to index
    %c0_152 = arith.constant 0 : index
    %c0_153 = arith.constant 0 : index
    %701 = vector.load %arg2[%700, %c0_152, %c0_153] : memref<8x2x256xf32, #tpu.memory_space<vmem>>, vector<1x2x256xf32>
    %702 = vector.shape_cast %701 : vector<1x2x256xf32> to vector<2x256xf32>
    %703 = arith.index_cast %c7_i32_148 : i32 to index
    %c0_154 = arith.constant 0 : index
    %c0_155 = arith.constant 0 : index
    %704 = vector.load %arg1[%703, %c0_154, %c0_155] : memref<8x2x1xf32, #tpu.memory_space<vmem>>, vector<1x2x1xf32>
    %705 = vector.shape_cast %704 : vector<1x2x1xf32> to vector<2x1xf32>
    %706 = arith.index_cast %696 : i32 to index
    %c0_156 = arith.constant 0 : index
    %c0_157 = arith.constant 0 : index
    %707 = vector.load %arg1[%706, %c0_156, %c0_157] : memref<8x2x1xf32, #tpu.memory_space<vmem>>, vector<1x2x1xf32>
    %708 = vector.shape_cast %707 : vector<1x2x1xf32> to vector<2x1xf32>
    %709 = vector.extract_strided_slice %699 {offsets = [0, 0], sizes = [2, 128], strides = [1, 1]} : vector<2x256xf32> to vector<2x128xf32>
    %710 = arith.truncf %683 : vector<2x32xf32> to vector<2x32xbf16>
    %cst_158 = arith.constant dense<0.000000e+00> : vector<2x128xf32>
    %711 = tpu.matmul %710, %0, %cst_158 {dimension_numbers = #tpu.dot_dimension_numbers<[1], [0], [0], [1], [0, 0, 1, 1], [], []>} : vector<2x32xbf16>, vector<32x128xbf16>, vector<2x128xf32> -> vector<2x128xf32>
    %712 = arith.addf %709, %711 : vector<2x128xf32>
    %713 = vector.extract_strided_slice %702 {offsets = [0, 128], sizes = [2, 128], strides = [1, 1]} : vector<2x256xf32> to vector<2x128xf32>
    %714 = arith.truncf %691 : vector<2x32xf32> to vector<2x32xbf16>
    %cst_159 = arith.constant dense<0.000000e+00> : vector<2x128xf32>
    %715 = tpu.matmul %714, %1, %cst_159 {dimension_numbers = #tpu.dot_dimension_numbers<[1], [0], [0], [1], [0, 0, 1, 1], [], []>} : vector<2x32xbf16>, vector<32x128xbf16>, vector<2x128xf32> -> vector<2x128xf32>
    %716 = arith.addf %713, %715 : vector<2x128xf32>
    %717 = vector.extract_strided_slice %712 {offsets = [0, 0], sizes = [2, 32], strides = [1, 1]} : vector<2x128xf32> to vector<2x32xf32>
    %718 = arith.negf %717 : vector<2x32xf32>
    %719 = math.exp %718 : vector<2x32xf32>
    %cst_160 = arith.constant 1.000000e+00 : f32
    %720 = vector.broadcast %cst_160 : f32 to vector<2x32xf32>
    %721 = arith.addf %720, %719 : vector<2x32xf32>
    %722 = arith.divf %720, %721 : vector<2x32xf32>
    %723 = vector.extract_strided_slice %712 {offsets = [0, 32], sizes = [2, 32], strides = [1, 1]} : vector<2x128xf32> to vector<2x32xf32>
    %724 = arith.negf %723 : vector<2x32xf32>
    %725 = math.exp %724 : vector<2x32xf32>
    %cst_161 = arith.constant 1.000000e+00 : f32
    %726 = vector.broadcast %cst_161 : f32 to vector<2x32xf32>
    %727 = arith.addf %726, %725 : vector<2x32xf32>
    %728 = arith.divf %726, %727 : vector<2x32xf32>
    %729 = vector.extract_strided_slice %712 {offsets = [0, 64], sizes = [2, 32], strides = [1, 1]} : vector<2x128xf32> to vector<2x32xf32>
    %730 = math.tanh %729 : vector<2x32xf32>
    %731 = vector.extract_strided_slice %712 {offsets = [0, 96], sizes = [2, 32], strides = [1, 1]} : vector<2x128xf32> to vector<2x32xf32>
    %732 = arith.negf %731 : vector<2x32xf32>
    %733 = math.exp %732 : vector<2x32xf32>
    %cst_162 = arith.constant 1.000000e+00 : f32
    %734 = vector.broadcast %cst_162 : f32 to vector<2x32xf32>
    %735 = arith.addf %734, %733 : vector<2x32xf32>
    %736 = arith.divf %734, %735 : vector<2x32xf32>
    %737 = arith.mulf %728, %687 : vector<2x32xf32>
    %738 = arith.mulf %722, %730 : vector<2x32xf32>
    %739 = arith.addf %737, %738 : vector<2x32xf32>
    %740 = math.tanh %739 : vector<2x32xf32>
    %741 = arith.mulf %736, %740 : vector<2x32xf32>
    %742 = vector.extract_strided_slice %716 {offsets = [0, 0], sizes = [2, 32], strides = [1, 1]} : vector<2x128xf32> to vector<2x32xf32>
    %743 = arith.negf %742 : vector<2x32xf32>
    %744 = math.exp %743 : vector<2x32xf32>
    %cst_163 = arith.constant 1.000000e+00 : f32
    %745 = vector.broadcast %cst_163 : f32 to vector<2x32xf32>
    %746 = arith.addf %745, %744 : vector<2x32xf32>
    %747 = arith.divf %745, %746 : vector<2x32xf32>
    %748 = vector.extract_strided_slice %716 {offsets = [0, 32], sizes = [2, 32], strides = [1, 1]} : vector<2x128xf32> to vector<2x32xf32>
    %749 = arith.negf %748 : vector<2x32xf32>
    %750 = math.exp %749 : vector<2x32xf32>
    %cst_164 = arith.constant 1.000000e+00 : f32
    %751 = vector.broadcast %cst_164 : f32 to vector<2x32xf32>
    %752 = arith.addf %751, %750 : vector<2x32xf32>
    %753 = arith.divf %751, %752 : vector<2x32xf32>
    %754 = vector.extract_strided_slice %716 {offsets = [0, 64], sizes = [2, 32], strides = [1, 1]} : vector<2x128xf32> to vector<2x32xf32>
    %755 = math.tanh %754 : vector<2x32xf32>
    %756 = vector.extract_strided_slice %716 {offsets = [0, 96], sizes = [2, 32], strides = [1, 1]} : vector<2x128xf32> to vector<2x32xf32>
    %757 = arith.negf %756 : vector<2x32xf32>
    %758 = math.exp %757 : vector<2x32xf32>
    %cst_165 = arith.constant 1.000000e+00 : f32
    %759 = vector.broadcast %cst_165 : f32 to vector<2x32xf32>
    %760 = arith.addf %759, %758 : vector<2x32xf32>
    %761 = arith.divf %759, %760 : vector<2x32xf32>
    %762 = arith.mulf %753, %695 : vector<2x32xf32>
    %763 = arith.mulf %747, %755 : vector<2x32xf32>
    %764 = arith.addf %762, %763 : vector<2x32xf32>
    %765 = math.tanh %764 : vector<2x32xf32>
    %766 = arith.mulf %761, %765 : vector<2x32xf32>
    %767 = vector.broadcast %705 : vector<2x1xf32> to vector<2x32xf32>
    %768 = arith.mulf %767, %741 : vector<2x32xf32>
    %769 = arith.index_cast %c7_i32_148 : i32 to index
    %c0_166 = arith.constant 0 : index
    %c0_167 = arith.constant 0 : index
    %770 = vector.load %arg5[%769, %c0_166, %c0_167] : memref<8x2x64xf32, #tpu.memory_space<vmem>>, vector<1x2x32xf32>
    %771 = vector.shape_cast %770 : vector<1x2x32xf32> to vector<2x32xf32>
    %772 = vector.shape_cast %768 : vector<2x32xf32> to vector<1x2x32xf32>
    tpu.vector_store %arg5[%769, %c0_166, %c0_167], %772 {strides = array<i32>} : memref<8x2x64xf32, #tpu.memory_space<vmem>>, vector<1x2x32xf32>,
    %773 = vector.broadcast %708 : vector<2x1xf32> to vector<2x32xf32>
    %774 = arith.mulf %773, %766 : vector<2x32xf32>
    %775 = arith.index_cast %696 : i32 to index
    %c0_168 = arith.constant 0 : index
    %c32_169 = arith.constant 32 : index
    %776 = vector.load %arg5[%775, %c0_168, %c32_169] : memref<8x2x64xf32, #tpu.memory_space<vmem>>, vector<1x2x32xf32>
    %777 = vector.shape_cast %776 : vector<1x2x32xf32> to vector<2x32xf32>
    %778 = vector.shape_cast %774 : vector<2x32xf32> to vector<1x2x32xf32>
    tpu.vector_store %arg5[%775, %c0_168, %c32_169], %778 {strides = array<i32>} : memref<8x2x64xf32, #tpu.memory_space<vmem>>, vector<1x2x32xf32>,
    %779 = arith.subf %741, %683 : vector<2x32xf32>
    %780 = vector.broadcast %705 : vector<2x1xf32> to vector<2x32xf32>
    %781 = arith.mulf %780, %779 : vector<2x32xf32>
    %782 = arith.addf %683, %781 : vector<2x32xf32>
    %783 = arith.subf %739, %687 : vector<2x32xf32>
    %784 = vector.broadcast %705 : vector<2x1xf32> to vector<2x32xf32>
    %785 = arith.mulf %784, %783 : vector<2x32xf32>
    %786 = arith.addf %687, %785 : vector<2x32xf32>
    %787 = arith.subf %766, %691 : vector<2x32xf32>
    %788 = vector.broadcast %708 : vector<2x1xf32> to vector<2x32xf32>
    %789 = arith.mulf %788, %787 : vector<2x32xf32>
    %790 = arith.addf %691, %789 : vector<2x32xf32>
    %791 = arith.subf %764, %695 : vector<2x32xf32>
    %792 = vector.broadcast %708 : vector<2x1xf32> to vector<2x32xf32>
    %793 = arith.mulf %792, %791 : vector<2x32xf32>
    %794 = arith.addf %695, %793 : vector<2x32xf32>
    %c8_i32 = arith.constant 8 : i32
    %c0_170 = arith.constant 0 : index
    %c0_171 = arith.constant 0 : index
    %c0_172 = arith.constant 0 : index
    %795 = vector.load %arg6[%c0_170, %c0_171, %c0_172] : memref<2x2x32xf32, #tpu.memory_space<vmem>>, vector<1x2x32xf32>
    %796 = vector.shape_cast %795 : vector<1x2x32xf32> to vector<2x32xf32>
    %797 = vector.shape_cast %782 : vector<2x32xf32> to vector<1x2x32xf32>
    tpu.vector_store %arg6[%c0_170, %c0_171, %c0_172], %797 {strides = array<i32>} : memref<2x2x32xf32, #tpu.memory_space<vmem>>, vector<1x2x32xf32>,
    %c1 = arith.constant 1 : index
    %c0_173 = arith.constant 0 : index
    %c0_174 = arith.constant 0 : index
    %798 = vector.load %arg6[%c1, %c0_173, %c0_174] : memref<2x2x32xf32, #tpu.memory_space<vmem>>, vector<1x2x32xf32>
    %799 = vector.shape_cast %798 : vector<1x2x32xf32> to vector<2x32xf32>
    %800 = vector.shape_cast %790 : vector<2x32xf32> to vector<1x2x32xf32>
    tpu.vector_store %arg6[%c1, %c0_173, %c0_174], %800 {strides = array<i32>} : memref<2x2x32xf32, #tpu.memory_space<vmem>>, vector<1x2x32xf32>,
    %c0_175 = arith.constant 0 : index
    %c0_176 = arith.constant 0 : index
    %c0_177 = arith.constant 0 : index
    %801 = vector.load %arg7[%c0_175, %c0_176, %c0_177] : memref<2x2x32xf32, #tpu.memory_space<vmem>>, vector<1x2x32xf32>
    %802 = vector.shape_cast %801 : vector<1x2x32xf32> to vector<2x32xf32>
    %803 = vector.shape_cast %786 : vector<2x32xf32> to vector<1x2x32xf32>
    tpu.vector_store %arg7[%c0_175, %c0_176, %c0_177], %803 {strides = array<i32>} : memref<2x2x32xf32, #tpu.memory_space<vmem>>, vector<1x2x32xf32>,
    %c1_178 = arith.constant 1 : index
    %c0_179 = arith.constant 0 : index
    %c0_180 = arith.constant 0 : index
    %804 = vector.load %arg7[%c1_178, %c0_179, %c0_180] : memref<2x2x32xf32, #tpu.memory_space<vmem>>, vector<1x2x32xf32>
    %805 = vector.shape_cast %804 : vector<1x2x32xf32> to vector<2x32xf32>
    %806 = vector.shape_cast %794 : vector<2x32xf32> to vector<1x2x32xf32>
    tpu.vector_store %arg7[%c1_178, %c0_179, %c0_180], %806 {strides = array<i32>} : memref<2x2x32xf32, #tpu.memory_space<vmem>>, vector<1x2x32xf32>,
    return
  }
  func.func @transform_0(%arg0: i32) -> (i32, i32, i32) {
    %c0_i32 = arith.constant 0 : i32
    %c0_i32_0 = arith.constant 0 : i32
    %c0_i32_1 = arith.constant 0 : i32
    %c0_i32_2 = arith.constant 0 : i32
    return %c0_i32, %c0_i32_0, %c0_i32_1 : i32, i32, i32
  }
  func.func @transform_1(%arg0: i32) -> (i32, i32, i32) {
    %c0_i32 = arith.constant 0 : i32
    %c0_i32_0 = arith.constant 0 : i32
    %c0_i32_1 = arith.constant 0 : i32
    %c0_i32_2 = arith.constant 0 : i32
    return %c0_i32, %c0_i32_0, %c0_i32_1 : i32, i32, i32
  }
  func.func @transform_2(%arg0: i32) -> (i32, i32) {
    %c0_i32 = arith.constant 0 : i32
    %c0_i32_0 = arith.constant 0 : i32
    %c0_i32_1 = arith.constant 0 : i32
    return %c0_i32, %c0_i32_0 : i32, i32
  }
  func.func @transform_3(%arg0: i32) -> (i32, i32) {
    %c0_i32 = arith.constant 0 : i32
    %c0_i32_0 = arith.constant 0 : i32
    %c0_i32_1 = arith.constant 0 : i32
    return %c0_i32, %c0_i32_0 : i32, i32
  }
  func.func @transform_4(%arg0: i32) -> (i32, i32, i32) {
    %c0_i32 = arith.constant 0 : i32
    %c0_i32_0 = arith.constant 0 : i32
    %c0_i32_1 = arith.constant 0 : i32
    %c0_i32_2 = arith.constant 0 : i32
    return %c0_i32, %c0_i32_0, %c0_i32_1 : i32, i32, i32
  }
  func.func @transform_5(%arg0: i32) -> (i32, i32, i32) {
    %c0_i32 = arith.constant 0 : i32
    %c0_i32_0 = arith.constant 0 : i32
    %c0_i32_1 = arith.constant 0 : i32
    %c0_i32_2 = arith.constant 0 : i32
    return %c0_i32, %c0_i32_0, %c0_i32_1 : i32, i32, i32
  }
  func.func @transform_6(%arg0: i32) -> (i32, i32, i32) {
    %c0_i32 = arith.constant 0 : i32
    %c0_i32_0 = arith.constant 0 : i32
    %c0_i32_1 = arith.constant 0 : i32
    %c0_i32_2 = arith.constant 0 : i32
    return %c0_i32, %c0_i32_0, %c0_i32_1 : i32, i32, i32
  }
}

</mosaic_0001>

<bundles_post_ra>
// kernel: tpu_custom_call.1
= control target key start
LH: loop header
LB: loop body
LE: loop exit
PB: predicated region body
PF: predicated region fallthrough
CT: control target
= control target key end

     0   :  { %12 = vsyncpa [#allocation3], 0  ;;  %s3660_s0 = inlined_call_operand.vmem [shape: f32[8,2,1], index: 0, kind: input, shape index: {}]   ;;  %s3661_s1 = inlined_call_operand.hbm [shape: f32[8,2,256], index: 1, kind: input, shape index: {}]   ;;  %s3662_s2 = inlined_call_operand.vmem [shape: bf16[32,128], index: 2, kind: input, shape index: {}]   ;;  %s3663_s3 = inlined_call_operand.hbm [shape: bf16[32,128], index: 3, kind: input, shape index: {}]   ;;  %s3664_s4 = inlined_call_operand.hbm [shape: f32[8,2,64], index: 4, kind: output, shape index: {0}]   ;;  %s3665_s5 = inlined_call_operand.hbm [shape: f32[2,2,32], index: 5, kind: output, shape index: {1}]   ;;  %s3666_s6 = inlined_call_operand.hbm [shape: f32[2,2,32], index: 6, kind: output, shape index: {2}]  }
   0x1   :  { %13 = vsyncpa [#allocation6], 0 }
   0x2   :  { %14 = vsyncpa [#allocation4], 0 }
   0x3   :  { %15 = vsyncpa [#allocation9], 0  ;;  %s2859_s21 = smov [#allocation2]   ;;  %s2741_s25 = scalar_lea.hbm %s3661_s1, 512 }
   0x4   :  { %s23_s22 = sshll.u32 %s2859_s21, 4  ;;  %p2742_p0 = scmp.ne.s32.totalorder %s3661_s1, %s2741_s25  ;;  %s24_s22 = int_to_ptr.vmem [resolvable:$true] %s23_s22 }
   0x5   :  { %p2745_p1 = scmp.lt.u32.totalorder %s2741_s25, %s3661_s1 }
   0x7   :  { %p2747_p2 = pnand %p2745_p1, %p2742_p0 }
   0x9   :  { %2750 = shalt.err (!%p2747_p2)
}
   0xa   :  { %s2751_s30 = scalar_lea.vmem %s24_s22, 512  ;;  %p2756_p4 = scmp.lt.s32.totalorder %s24_s22, %s24_s22 }
   0xb   :  { %p2752_p3 = scmp.ne.s32.totalorder %s24_s22, %s2751_s30  ;;  %p2757_p5 = scmp.lt.s32.totalorder %s2751_s30, %s2751_s30 }
   0xd   :  { %p2758_p6 = por %p2757_p5, %p2756_p4 }
   0xf   :  { %p2759_p7 = pnand %p2758_p6, %p2752_p3 }
  0x11   :  { %2762 = shalt.err (!%p2759_p7)
}
  0x12   :  { %s2860_s7 = smov 64   ;;  %s2861_s8 = smov 4  }
  0x13   :  { %29 = dma.hbm_to_vmem [thread:$0]  %s3661_s1, 512, %s24_s22, [#allocation3], %s2860_s7, %s2860_s7, %s2861_s8  }
  0x14   :  { %s2862_s11 = smov [#allocation5]   ;;  %s2763_s15 = scalar_lea.hbm %s3663_s3, 256 }
  0x15   :  { %s37_s12 = sshll.u32 %s2862_s11, 4  ;;  %p2764_p8 = scmp.ne.s32.totalorder %s3663_s3, %s2763_s15  ;;  %s38_s12 = int_to_ptr.vmem [resolvable:$true] %s37_s12 }
  0x16   :  { %p2767_p9 = scmp.lt.u32.totalorder %s2763_s15, %s3663_s3 }
  0x18   :  { %p2769_p10 = pnand %p2767_p9, %p2764_p8 }
  0x1a   :  { %2772 = shalt.err (!%p2769_p10)
}
  0x1b   :  { %s2773_s20 = scalar_lea.vmem %s38_s12, 256  ;;  %p2778_p12 = scmp.lt.s32.totalorder %s38_s12, %s38_s12 }
  0x1c   :  { %p2774_p11 = scmp.ne.s32.totalorder %s38_s12, %s2773_s20  ;;  %p2779_p13 = scmp.lt.s32.totalorder %s2773_s20, %s2773_s20 }
  0x1e   :  { %p2780_p0 = por %p2779_p13, %p2778_p12 }
  0x20   :  { %p2781_p1 = pnand %p2780_p0, %p2774_p11 }
  0x22   :  { %2784 = shalt.err (!%p2781_p1)
}
  0x23   :  { %43 = dma.hbm_to_vmem [thread:$0]  %s3663_s3, 256, %s38_s12, [#allocation6], %s2860_s7, %s2860_s7, %s2861_s8  }
  0x24   :  { %2851 = dma.done.wait [#allocation3], 512  }
  0x25   :  { %2852 = vsyncadd [#allocation3], 4294966784 }
  0x26   :  { %2853 = dma.done.wait [#allocation6], 256  }
  0x27   :  { %2854 = vsyncadd [#allocation6], 4294967040  ;;  %v2863_v0 = vmov 0.0   ;;  %vm2864_vm0 = vmmov 0   ;;  %v2865_v1 = vmov 0   ;;  %v2942_v2 = vld [vmem:[#allocation5] sm:$0xff]   ;;  %v235_v44 = vlaneseq }
  0x28   :  { %2469 = vmatprep.subr.bf16.mxu1 %v2863_v0  ;;  %2461 = vmatprep.subr.bf16.mxu0 %v2863_v0  ;;  %v2947_v3 = vld [vmem:[%s3662_s2] sm:$0xff]   ;;  %v2950_v4 = vld [vmem:[#allocation5 + $0x8] sm:$0xff]   ;;  %v61_v6 = vld [vmem:[#allocation2 + $0x1c] sm:$0xf]  ;;  %s2866_s25 = smov 32   ;;  %s2868_s30 = smov 96  }
  0x29   :  { %2473 = vmatprep.mubr.msk.bf16.mxu1 %vm2864_vm0, %v2863_v0  ;;  %2465 = vmatprep.mubr.msk.bf16.mxu0 %vm2864_vm0, %v2863_v0  ;;  %v2957_v5 = vld [vmem:[%s3662_s2 + $0x8] sm:$0xff]   ;;  %v175_v7 = vrot.slane %v61_v6, 2  ;;  %v59_v8 = vld [vmem:[#allocation2] sm:$0xf]  ;;  %v2867_v42 = vmov 1983009808  }
  0x2a   :  { %2603 = vset.pattern.permute.xlu0 %v2865_v1  ;;  %2604 = vset.pattern.permute.xlu1 %v2865_v1  ;;  %v2365_v40 = vld [vmem:[%s3660_s0 + $0xe] sm:$0x3]  ;;  %v233_v43 = vunpack.c.l.s4 %v2867_v42  ;;  %v236_v46 = vshrl.u32 %v235_v44, 7  ;;  %v62_v53 = vld [vmem:[%s3660_s0] sm:$0x3]  ;;  %vm77_vm1 = vcmask 261120  }
  0x2b   :  { %2470 = vmatpush3.bf16.msra.mxu1 %v2942_v2  ;;  %2462 = vmatpush3.bf16.msra.mxu0 %v2947_v3  ;;  %vm243_vm2 = vcmask 254976   ;;  %vm267_vm3 = vcmask 517376  }
  0x2c   :  { %2471 = vmatprep.subr.bf16.mxu1 %v2863_v0  ;;  %2463 = vmatprep.subr.bf16.mxu0 %v2863_v0  ;;  %v234_v45 = vunpack.c.0.s8 %v233_v43 }
  0x2e   :  { %v2985_v48 = vsub.s32 %v234_v45, %v236_v46 }
  0x2f   :  { %2472 = vmatpush3.bf16.msra.mxu1 %v2950_v4  ;;  %2464 = vmatpush3.bf16.msra.mxu0 %v2957_v5 }
  0x30   :  { %2485 = vmatprep.subr.bf16.mxu1 %v2863_v0  ;;  %2477 = vmatprep.subr.bf16.mxu0 %v2863_v0 }
  0x32   :  { %2474 = vmatmul.mubr.bf16.vlgmr.msra.gmra.mrb[0].mxu1 %v2865_v1  ;;  %2466 = vmatmul.mubr.bf16.vlgmr.msra.gmra.mrb[0].mxu0 %v2865_v1 }
  0x33   :  { %2486 = vmatpush3.bf16.msra.mxu1 %v2942_v2  ;;  %2489 = vmatprep.mubr.msk.bf16.mxu1 %vm2864_vm0, %v2863_v0 }
  0x34   :  { %2487 = vmatprep.subr.bf16.mxu1 %v2863_v0  ;;  %2478 = vmatpush3.bf16.msra.mxu0 %v2947_v3 }
  0x35   :  { %2481 = vmatprep.mubr.msk.bf16.mxu0 %vm2864_vm0, %v2863_v0  ;;  %2479 = vmatprep.subr.bf16.mxu0 %v2863_v0 }
  0x37   :  { %2488 = vmatpush3.bf16.msra.mxu1 %v2950_v4 }
  0x38   :  { %2501 = vmatprep.subr.bf16.mxu1 %v2863_v0  ;;  %2480 = vmatpush3.bf16.msra.mxu0 %v2957_v5 }
  0x39   :  { %2493 = vmatprep.subr.bf16.mxu0 %v2863_v0 }
 0x105   :  { %v168_v9 = vpop.f32.mrb[0].mxu1  ;;  %v115_v12 = vpop.f32.mrb[0].mxu0 }
 0x106   :  { %v177_v10 = vadd.f32 %v175_v7, %v168_v9  ;;  %v2475_v11 = vpop.f32.mrb[1].mxu1  ;;  %v121_v14 = vadd.f32 %v115_v12, %v59_v8  ;;  %v2467_v15 = vpop.f32.mrb[1].mxu0  ;;  %v300_v12 = vld [vmem:[#allocation2 + $0x18] sm:$0xf] }
 0x107   :  { %v171_v13 = vpop.f32.mrb[2].mxu1  ;;  %v118_v17 = vpop.f32.mrb[2].mxu0 }
 0x108   :  { %v2476_v16 = vpop.f32.mrb[3].mxu1  ;;  %2609 = vtanh.f32 %v177_v10  ;;  %v2468_v18 = vpop.f32.mrb[3].mxu0  ;;  %v2371_v21 = vmul.f32 -1.442695, %v177_v10  ;;  %v2370_v22 = vmul.f32 -1.442695, %v121_v14 }
 0x109   :  { %2611 = vtanh.f32 %v121_v14  ;;  %v395_v13 = vrot.slane %v300_v12, 2 }
 0x10a   :  { %2613 = vpow2.f32 %v2371_v21 }
 0x10b   :  { %2615 = vpow2.f32 %v2370_v22 }
 0x112   :  { %v2610_v19 = vpop.eup %2609 }
 0x113   :  { %211 = vrot.lane.b32.xlu0 %v2610_v19, %s2860_s7  ;;  %v2612_v20 = vpop.eup %2611 }
 0x114   :  { %v2614_v23 = vpop.eup %2613 }
 0x115   :  { %v205_v24 = vadd.f32 1.0, %v2614_v23  ;;  %v2616_v25 = vpop.eup %2615 }
 0x116   :  { %v181_v26 = vadd.f32 1.0, %v2616_v25 }
 0x117   :  { %187 = vrot.lane.b32.xlu0 %v2612_v20, %s2860_s7  ;;  %2617 = vrcp.f32 %v205_v24  ;;  %v298_v20 = vld [vmem:[#allocation2 + $0x4] sm:$0xf] }
 0x118   :  { %2619 = vrcp.f32 %v181_v26 }
 0x121   :  { %v2618_v27 = vpop.eup %2617 }
 0x122   :  { %v2620_v30 = vpop.eup %2619  ;;  %v209_v33 = vmul.f32 0.0, %v2618_v27 }
 0x123   :  { %v185_v36 = vmul.f32 0.0, %v2620_v30 }
 0x185   :  { %v212_v28 = vpop.permute.xlu0 %211 }
 0x186   :  { %v214_v29 = vmul.f32 %v2618_v27, %v212_v28 }
 0x188   :  { %216 = vrot.lane.b32.xlu1 %v214_v29, %s2866_s25 }
 0x189   :  { %v188_v31 = vpop.permute.xlu0 %187 }
 0x18a   :  { %v190_v32 = vmul.f32 %v2620_v30, %v188_v31 }
 0x18c   :  { %192 = vrot.lane.b32.xlu1 %v190_v32, %s2866_s25 }
 0x1fa   :  { %v217_v34 = vpop.permute.xlu1 %216 }
 0x1fb   :  { %v219_v35 = vadd.f32 %v217_v34, %v209_v33 }
 0x1fd   :  { %2621 = vtanh.f32 %v219_v35  ;;  %v291_v55 = vrot.slane %v219_v35, %v2985_v48 }
 0x1fe   :  { %v193_v37 = vpop.permute.xlu1 %192 }
 0x1ff   :  { %v195_v38 = vadd.f32 %v193_v37, %v185_v36 }
 0x201   :  { %2623 = vtanh.f32 %v195_v38  ;;  %v277_v56 = vrot.slane %v195_v38, %v2985_v48 }
 0x207   :  { %v2622_v39 = vpop.eup %2621 }
 0x208   :  { %222 = vrot.lane.b32.xlu0 %v2622_v39, %s2860_s7 }
 0x20b   :  { %v2624_v41 = vpop.eup %2623 }
 0x20c   :  { %198 = vrot.lane.b32.xlu1 %v2624_v41, %s2860_s7  ;;  %247 = vperm.xlu0 %2603, %v2365_v40  }
 0x27a   :  { %v223_v47 = vpop.permute.xlu0 %222 }
 0x27b   :  { %v225_v49 = vmul.f32 %v2618_v27, %v223_v47 }
 0x27d   :  { %v257_v50 = vrot.slane %v225_v49, %v2985_v48 }
 0x27e   :  { %v199_v51 = vpop.permute.xlu1 %198 }
 0x27f   :  { %v201_v52 = vmul.f32 %v2620_v30, %v199_v51  ;;  %258 = vrot.lane.b32.xlu1 %v257_v50, %s2866_s25 }
 0x281   :  { %v238_v54 = vrot.slane %v201_v52, %v2985_v48  ;;  %v2373_v52 = vld [vmem:[%s3660_s0 + $0xc] sm:$0x3] }
 0x283   :  { %228 = vperm.xlu1 %2604, %v62_v53   ;;  %239 = vrot.lane.b32.xlu0 %v238_v54, %s2866_s25  ;;  %v2372_v53 = vld [vmem:[%s3660_s0 + $0x2] sm:$0x3] }
 0x287   :  { %292 = vrot.lane.b32.xlu1 %v291_v55, %s2868_s30 }
 0x28b   :  { %278 = vrot.lane.b32.xlu1 %v277_v56, %s2868_s30  ;;  %v248_v57 = vpop.permute.xlu0 %247 }
 0x2f1   :  { %v259_v58 = vpop.permute.xlu1 %258 }
 0x2f2   :  { %v2998_v59 = vmul.f32 %v259_v58, %v248_v57 }
 0x2f4   :  { %v350_v60 = vpack.c.bf16 %v2998_v59, %v2998_v59  ;;  %v556_v39 = vrot.slane %v2998_v59, %v2985_v48 }
 0x2f5   :  { %v240_v61 = vpop.permute.xlu0 %239 }
 0x2f6   :  { %2490 = vmatmul.mubr.msk.bf16.vlgmr.msra.gmra.mrb[4].mxu1 %vm77_vm1, %v350_v60 }
 0x2f7   :  { %2502 = vmatpush3.bf16.msra.mxu1 %v2942_v2  ;;  %2505 = vmatprep.mubr.msk.bf16.mxu1 %vm2864_vm0, %v2863_v0 }
 0x2f8   :  { %2503 = vmatprep.subr.bf16.mxu1 %v2863_v0 }
 0x2fb   :  { %2504 = vmatpush3.bf16.msra.mxu1 %v2950_v4 }
 0x2fc   :  { %2517 = vmatprep.subr.bf16.mxu1 %v2863_v0 }
 0x302   :  { %v229_v62 = vpop.permute.xlu1 %228 }
 0x303   :  { %v3009_v63 = vmul.f32 %v240_v61, %v229_v62 }
 0x305   :  { %v305_v1 = vpack.c.bf16 %v3009_v63, %v3009_v63  ;;  %244 = vst.msk [vmem:[#allocation7] sm:$0x3] %vm243_vm2, %v3009_v63  ;;  %v517_v40 = vrot.slane %v3009_v63, %v2985_v48 }
 0x306   :  { %v293_v6 = vpop.permute.xlu1 %292 }
 0x307   :  { %v3015_v7 = vmul.f32 %v293_v6, %v248_v57  ;;  %2482 = vmatmul.mubr.msk.bf16.vlgmr.msra.gmra.mrb[4].mxu0 %vm77_vm1, %v305_v1 }
 0x308   :  { %2494 = vmatpush3.bf16.msra.mxu0 %v2947_v3  ;;  %2497 = vmatprep.mubr.msk.bf16.mxu0 %vm2864_vm0, %v2863_v0 }
 0x309   :  { %v447_v8 = vrot.slane %v3015_v7, %v2985_v48  ;;  %2495 = vmatprep.subr.bf16.mxu0 %v2863_v0 }
 0x30a   :  { %v279_v9 = vpop.permute.xlu1 %278 }
 0x30b   :  { %v3024_v10 = vmul.f32 %v279_v9, %v229_v62  ;;  %448 = vrot.lane.b32.xlu1 %v447_v8, %s2866_s25 }
 0x30c   :  { %2496 = vmatpush3.bf16.msra.mxu0 %v2957_v5 }
 0x30d   :  { %v412_v11 = vrot.slane %v3024_v10, %v2985_v48  ;;  %2509 = vmatprep.subr.bf16.mxu0 %v2863_v0 }
 0x30f   :  { %413 = vrot.lane.b32.xlu1 %v412_v11, %s2866_s25 }
 0x37d   :  { %v449_v41 = vpop.permute.xlu1 %448 }
 0x381   :  { %v414_v46 = vpop.permute.xlu1 %413 }
 0x3c9   :  { %v388_v14 = vpop.f32.mrb[4].mxu1 }
 0x3ca   :  { %v397_v15 = vadd.f32 %v395_v13, %v388_v14  ;;  %v2491_v16 = vpop.f32.mrb[5].mxu1 }
 0x3cb   :  { %v391_v17 = vpop.f32.mrb[6].mxu1 }
 0x3cc   :  { %2625 = vtanh.f32 %v397_v15  ;;  %v2492_v18 = vpop.f32.mrb[7].mxu1  ;;  %v2377_v27 = vmul.f32 -1.442695, %v397_v15 }
 0x3d6   :  { %v2626_v19 = vpop.eup %2625 }
 0x3d7   :  { %453 = vrot.lane.b32.xlu0 %v2626_v19, %s2860_s7 }
 0x3da   :  { %v343_v21 = vpop.f32.mrb[4].mxu0 }
 0x3db   :  { %v349_v22 = vadd.f32 %v343_v21, %v298_v20  ;;  %v2483_v23 = vpop.f32.mrb[5].mxu0 }
 0x3dc   :  { %v346_v24 = vpop.f32.mrb[6].mxu0 }
 0x3dd   :  { %2627 = vtanh.f32 %v349_v22  ;;  %v2484_v25 = vpop.f32.mrb[7].mxu0  ;;  %v2376_v30 = vmul.f32 -1.442695, %v349_v22 }
 0x3de   :  { %2629 = vpow2.f32 %v2377_v27 }
 0x3e7   :  { %v2628_v26 = vpop.eup %2627 }
 0x3e8   :  { %418 = vrot.lane.b32.xlu0 %v2628_v26, %s2860_s7  ;;  %v2630_v28 = vpop.eup %2629 }
 0x3e9   :  { %v436_v29 = vadd.f32 1.0, %v2630_v28 }
 0x3eb   :  { %2631 = vrcp.f32 %v436_v29  ;;  %v591_v29 = vld [vmem:[#allocation2 + $0x14] sm:$0xf] }
 0x3ec   :  { %2633 = vpow2.f32 %v2376_v30  ;;  %v686_v30 = vrot.slane %v591_v29, 2 }
 0x3f5   :  { %v2632_v31 = vpop.eup %2631 }
 0x3f6   :  { %v2634_v32 = vpop.eup %2633  ;;  %v451_v42 = vmul.f32 %v2632_v31, %v449_v41 }
 0x3f7   :  { %v401_v35 = vadd.f32 1.0, %v2634_v32 }
 0x3f9   :  { %2635 = vrcp.f32 %v401_v35 }
 0x403   :  { %v2636_v36 = vpop.eup %2635 }
 0x404   :  { %v416_v47 = vmul.f32 %v2636_v36, %v414_v46 }
 0x449   :  { %v454_v33 = vpop.permute.xlu0 %453 }
 0x44a   :  { %v456_v34 = vmul.f32 %v2632_v31, %v454_v33 }
 0x44c   :  { %458 = vrot.lane.b32.xlu0 %v456_v34, %s2866_s25 }
 0x45a   :  { %v419_v37 = vpop.permute.xlu0 %418 }
 0x45b   :  { %v421_v38 = vmul.f32 %v2636_v36, %v419_v37 }
 0x45d   :  { %423 = vrot.lane.b32.xlu0 %v421_v38, %s2866_s25 }
 0x461   :  { %557 = vrot.lane.b32.xlu0 %v556_v39, %s2868_s30 }
 0x465   :  { %518 = vrot.lane.b32.xlu0 %v517_v40, %s2868_s30 }
 0x4be   :  { %v459_v43 = vpop.permute.xlu0 %458 }
 0x4bf   :  { %v461_v44 = vadd.f32 %v459_v43, %v451_v42 }
 0x4c1   :  { %2637 = vtanh.f32 %v461_v44  ;;  %v574_v54 = vsub.f32 %v461_v44, %v449_v41 }
 0x4c3   :  { %v582_v56 = vrot.slane %v574_v54, %v2985_v48 }
 0x4cb   :  { %v2638_v45 = vpop.eup %2637 }
 0x4cc   :  { %464 = vrot.lane.b32.xlu1 %v2638_v45, %s2860_s7 }
 0x4cf   :  { %v424_v49 = vpop.permute.xlu0 %423 }
 0x4d0   :  { %v426_v50 = vadd.f32 %v424_v49, %v416_v47 }
 0x4d2   :  { %2639 = vtanh.f32 %v426_v50  ;;  %v535_v55 = vsub.f32 %v426_v50, %v414_v46 }
 0x4d3   :  { %v558_v61 = vpop.permute.xlu0 %557 }
 0x4d4   :  { %v543_v57 = vrot.slane %v535_v55, %v2985_v48 }
 0x4d7   :  { %v519_v9 = vpop.permute.xlu0 %518 }
 0x4dc   :  { %v2640_v51 = vpop.eup %2639 }
 0x4dd   :  { %429 = vrot.lane.b32.xlu1 %v2640_v51, %s2860_s7 }
 0x4e1   :  { %489 = vperm.xlu1 %2604, %v2373_v52  }
 0x4e5   :  { %470 = vperm.xlu1 %2604, %v2372_v53  }
 0x4e9   :  { %583 = vrot.lane.b32.xlu1 %v582_v56, %s2868_s30 }
 0x4ed   :  { %544 = vrot.lane.b32.xlu1 %v543_v57, %s2868_s30 }
 0x53e   :  { %v465_v58 = vpop.permute.xlu1 %464 }
 0x53f   :  { %v3054_v60 = vmul.f32 %v2632_v31, %v465_v58 }
 0x541   :  { %v560_v62 = vsub.f32 %v3054_v60, %v558_v61 }
 0x543   :  { %v568_v1 = vrot.slane %v560_v62, %v2985_v48 }
 0x545   :  { %569 = vrot.lane.b32.xlu0 %v568_v1, %s2866_s25 }
 0x54f   :  { %v430_v6 = vpop.permute.xlu1 %429 }
 0x550   :  { %v3059_v8 = vmul.f32 %v2636_v36, %v430_v6  ;;  %v589_v36 = vld [vmem:[#allocation2 + $0x8] sm:$0xf] }
 0x552   :  { %v521_v11 = vsub.f32 %v3059_v8, %v519_v9 }
 0x554   :  { %v529_v12 = vrot.slane %v521_v11, %v2985_v48 }
 0x556   :  { %530 = vrot.lane.b32.xlu0 %v529_v12, %s2866_s25 }
 0x560   :  { %v3064_v13 = vpop.permute.xlu1 %489 }
 0x564   :  { %v3066_v14 = vpop.permute.xlu1 %470 }
 0x568   :  { %v584_v15 = vpop.permute.xlu1 %583 }
 0x569   :  { %v586_v16 = vmul.f32 %v584_v15, %v3064_v13 }
 0x56b   :  { %v3070_v17 = vadd.f32 %v586_v16, %v3015_v7 }
 0x56c   :  { %v545_v18 = vpop.permute.xlu1 %544 }
 0x56d   :  { %v547_v19 = vmul.f32 %v545_v18, %v3066_v14  ;;  %v738_v20 = vrot.slane %v3070_v17, %v2985_v48  ;;  %v2379_v18 = vld [vmem:[%s3660_s0 + $0xa] sm:$0x3] }
 0x56f   :  { %v3076_v21 = vadd.f32 %v547_v19, %v3024_v10  ;;  %739 = vrot.lane.b32.xlu1 %v738_v20, %s2866_s25  ;;  %v2378_v19 = vld [vmem:[%s3660_s0 + $0x4] sm:$0x3] }
 0x571   :  { %v703_v22 = vrot.slane %v3076_v21, %v2985_v48 }
 0x573   :  { %704 = vrot.lane.b32.xlu1 %v703_v22, %s2866_s25 }
 0x5b7   :  { %v570_v23 = vpop.permute.xlu0 %569 }
 0x5b8   :  { %v572_v7 = vmul.f32 %v570_v23, %v3064_v13 }
 0x5ba   :  { %v3084_v24 = vadd.f32 %v572_v7, %v2998_v59 }
 0x5bc   :  { %v641_v25 = vpack.c.bf16 %v3084_v24, %v3084_v24  ;;  %v847_v56 = vrot.slane %v3084_v24, %v2985_v48 }
 0x5be   :  { %2506 = vmatmul.mubr.msk.bf16.vlgmr.msra.gmra.mrb[8].mxu1 %vm77_vm1, %v641_v25 }
 0x5bf   :  { %2518 = vmatpush3.bf16.msra.mxu1 %v2942_v2  ;;  %2521 = vmatprep.mubr.msk.bf16.mxu1 %vm2864_vm0, %v2863_v0 }
 0x5c0   :  { %2519 = vmatprep.subr.bf16.mxu1 %v2863_v0 }
 0x5c3   :  { %2520 = vmatpush3.bf16.msra.mxu1 %v2950_v4 }
 0x5c4   :  { %2533 = vmatprep.subr.bf16.mxu1 %v2863_v0 }
 0x5c8   :  { %v531_v10 = vpop.permute.xlu0 %530 }
 0x5c9   :  { %v533_v26 = vmul.f32 %v531_v10, %v3066_v14 }
 0x5cb   :  { %v3097_v27 = vadd.f32 %v533_v26, %v3009_v63 }
 0x5cd   :  { %v596_v28 = vpack.c.bf16 %v3097_v27, %v3097_v27  ;;  %v808_v57 = vrot.slane %v3097_v27, %v2985_v48 }
 0x5cf   :  { %2498 = vmatmul.mubr.msk.bf16.vlgmr.msra.gmra.mrb[8].mxu0 %vm77_vm1, %v596_v28 }
 0x5d0   :  { %2510 = vmatpush3.bf16.msra.mxu0 %v2947_v3  ;;  %2513 = vmatprep.mubr.msk.bf16.mxu0 %vm2864_vm0, %v2863_v0 }
 0x5d1   :  { %2511 = vmatprep.subr.bf16.mxu0 %v2863_v0 }
 0x5d4   :  { %2512 = vmatpush3.bf16.msra.mxu0 %v2957_v5 }
 0x5d5   :  { %2525 = vmatprep.subr.bf16.mxu0 %v2863_v0 }
 0x5e1   :  { %v740_v58 = vpop.permute.xlu1 %739 }
 0x5e5   :  { %v705_v9 = vpop.permute.xlu1 %704 }
 0x691   :  { %v679_v63 = vpop.f32.mrb[8].mxu1 }
 0x692   :  { %v688_v31 = vadd.f32 %v686_v30, %v679_v63  ;;  %v2507_v32 = vpop.f32.mrb[9].mxu1 }
 0x693   :  { %v682_v33 = vpop.f32.mrb[10].mxu1 }
 0x694   :  { %2641 = vtanh.f32 %v688_v31  ;;  %v2508_v34 = vpop.f32.mrb[11].mxu1  ;;  %v2383_v43 = vmul.f32 -1.442695, %v688_v31 }
 0x69e   :  { %v2642_v35 = vpop.eup %2641 }
 0x69f   :  { %744 = vrot.lane.b32.xlu0 %v2642_v35, %s2860_s7 }
 0x6a2   :  { %v634_v37 = vpop.f32.mrb[8].mxu0 }
 0x6a3   :  { %v640_v38 = vadd.f32 %v634_v37, %v589_v36  ;;  %v2499_v39 = vpop.f32.mrb[9].mxu0 }
 0x6a4   :  { %v637_v40 = vpop.f32.mrb[10].mxu0 }
 0x6a5   :  { %2643 = vtanh.f32 %v640_v38  ;;  %v2500_v41 = vpop.f32.mrb[11].mxu0  ;;  %v2382_v46 = vmul.f32 -1.442695, %v640_v38 }
 0x6a6   :  { %2645 = vpow2.f32 %v2383_v43 }
 0x6af   :  { %v2644_v42 = vpop.eup %2643 }
 0x6b0   :  { %709 = vrot.lane.b32.xlu0 %v2644_v42, %s2860_s7  ;;  %v2646_v44 = vpop.eup %2645 }
 0x6b1   :  { %v727_v45 = vadd.f32 1.0, %v2646_v44 }
 0x6b3   :  { %2647 = vrcp.f32 %v727_v45 }
 0x6b4   :  { %2649 = vpow2.f32 %v2382_v46 }
 0x6bd   :  { %v2648_v47 = vpop.eup %2647 }
 0x6be   :  { %v2650_v49 = vpop.eup %2649  ;;  %v742_v61 = vmul.f32 %v2648_v47, %v740_v58 }
 0x6bf   :  { %v692_v52 = vadd.f32 1.0, %v2650_v49 }
 0x6c1   :  { %2651 = vrcp.f32 %v692_v52 }
 0x6cb   :  { %v2652_v53 = vpop.eup %2651 }
 0x6cc   :  { %v707_v11 = vmul.f32 %v2652_v53, %v705_v9 }
 0x711   :  { %v745_v50 = vpop.permute.xlu0 %744 }
 0x712   :  { %v747_v51 = vmul.f32 %v2648_v47, %v745_v50  ;;  %v882_v50 = vld [vmem:[#allocation2 + $0x10] sm:$0xf] }
 0x714   :  { %749 = vrot.lane.b32.xlu0 %v747_v51, %s2866_s25  ;;  %v977_v51 = vrot.slane %v882_v50, 2 }
 0x722   :  { %v710_v54 = vpop.permute.xlu0 %709 }
 0x723   :  { %v712_v55 = vmul.f32 %v2652_v53, %v710_v54 }
 0x725   :  { %714 = vrot.lane.b32.xlu0 %v712_v55, %s2866_s25 }
 0x729   :  { %848 = vrot.lane.b32.xlu0 %v847_v56, %s2868_s30 }
 0x72d   :  { %809 = vrot.lane.b32.xlu0 %v808_v57, %s2868_s30  ;;  %v880_v57 = vld [vmem:[#allocation2 + $0xc] sm:$0xf] }
 0x786   :  { %v750_v62 = vpop.permute.xlu0 %749 }
 0x787   :  { %v752_v1 = vadd.f32 %v750_v62, %v742_v61 }
 0x789   :  { %2653 = vtanh.f32 %v752_v1  ;;  %v865_v20 = vsub.f32 %v752_v1, %v740_v58 }
 0x78b   :  { %v873_v23 = vrot.slane %v865_v20, %v2985_v48 }
 0x793   :  { %v2654_v6 = vpop.eup %2653 }
 0x794   :  { %755 = vrot.lane.b32.xlu1 %v2654_v6, %s2860_s7 }
 0x797   :  { %v715_v12 = vpop.permute.xlu0 %714 }
 0x798   :  { %v717_v15 = vadd.f32 %v715_v12, %v707_v11 }
 0x79a   :  { %2655 = vtanh.f32 %v717_v15  ;;  %v826_v22 = vsub.f32 %v717_v15, %v705_v9 }
 0x79b   :  { %v849_v26 = vpop.permute.xlu0 %848 }
 0x79c   :  { %v834_v7 = vrot.slane %v826_v22, %v2985_v48 }
 0x79f   :  { %v810_v31 = vpop.permute.xlu0 %809 }
 0x7a4   :  { %v2656_v16 = vpop.eup %2655 }
 0x7a5   :  { %720 = vrot.lane.b32.xlu1 %v2656_v16, %s2860_s7 }
 0x7a9   :  { %780 = vperm.xlu1 %2604, %v2379_v18  }
 0x7ad   :  { %761 = vperm.xlu1 %2604, %v2378_v19  }
 0x7b1   :  { %874 = vrot.lane.b32.xlu1 %v873_v23, %s2868_s30 }
 0x7b5   :  { %835 = vrot.lane.b32.xlu1 %v834_v7, %s2868_s30 }
 0x806   :  { %v756_v25 = vpop.permute.xlu1 %755 }
 0x807   :  { %v3130_v10 = vmul.f32 %v2648_v47, %v756_v25 }
 0x809   :  { %v851_v28 = vsub.f32 %v3130_v10, %v849_v26 }
 0x80b   :  { %v859_v29 = vrot.slane %v851_v28, %v2985_v48 }
 0x80d   :  { %860 = vrot.lane.b32.xlu0 %v859_v29, %s2866_s25 }
 0x817   :  { %v721_v30 = vpop.permute.xlu1 %720 }
 0x818   :  { %v3135_v63 = vmul.f32 %v2652_v53, %v721_v30 }
 0x81a   :  { %v812_v32 = vsub.f32 %v3135_v63, %v810_v31 }
 0x81c   :  { %v820_v33 = vrot.slane %v812_v32, %v2985_v48 }
 0x81e   :  { %821 = vrot.lane.b32.xlu0 %v820_v33, %s2866_s25 }
 0x828   :  { %v3140_v34 = vpop.permute.xlu1 %780 }
 0x82c   :  { %v3142_v35 = vpop.permute.xlu1 %761 }
 0x830   :  { %v875_v36 = vpop.permute.xlu1 %874 }
 0x831   :  { %v877_v37 = vmul.f32 %v875_v36, %v3140_v34 }
 0x833   :  { %v3146_v38 = vadd.f32 %v877_v37, %v3070_v17 }
 0x834   :  { %v836_v39 = vpop.permute.xlu1 %835 }
 0x835   :  { %v838_v40 = vmul.f32 %v836_v39, %v3142_v35  ;;  %v1029_v41 = vrot.slane %v3146_v38, %v2985_v48 }
 0x837   :  { %v3152_v42 = vadd.f32 %v838_v40, %v3076_v21  ;;  %1030 = vrot.lane.b32.xlu1 %v1029_v41, %s2866_s25 }
 0x839   :  { %v994_v43 = vrot.slane %v3152_v42, %v2985_v48 }
 0x83b   :  { %995 = vrot.lane.b32.xlu1 %v994_v43, %s2866_s25 }
 0x87f   :  { %v861_v44 = vpop.permute.xlu0 %860 }
 0x880   :  { %v863_v17 = vmul.f32 %v861_v44, %v3140_v34  ;;  %v2385_v44 = vld [vmem:[%s3660_s0 + $0x8] sm:$0x3] }
 0x882   :  { %v3160_v45 = vadd.f32 %v863_v17, %v3084_v24  ;;  %v2384_v17 = vld [vmem:[%s3660_s0 + $0x6] sm:$0x3] }
 0x884   :  { %v932_v46 = vpack.c.bf16 %v3160_v45, %v3160_v45  ;;  %v1138_v28 = vrot.slane %v3160_v45, %v2985_v48 }
 0x886   :  { %2522 = vmatmul.mubr.msk.bf16.vlgmr.msra.gmra.mrb[12].mxu1 %vm77_vm1, %v932_v46 }
 0x887   :  { %2534 = vmatpush3.bf16.msra.mxu1 %v2942_v2  ;;  %2537 = vmatprep.mubr.msk.bf16.mxu1 %vm2864_vm0, %v2863_v0 }
 0x888   :  { %2535 = vmatprep.subr.bf16.mxu1 %v2863_v0 }
 0x88b   :  { %2536 = vmatpush3.bf16.msra.mxu1 %v2950_v4 }
 0x88c   :  { %2549 = vmatprep.subr.bf16.mxu1 %v2863_v0 }
 0x890   :  { %v822_v21 = vpop.permute.xlu0 %821 }
 0x891   :  { %v824_v24 = vmul.f32 %v822_v21, %v3142_v35 }
 0x893   :  { %v3173_v47 = vadd.f32 %v824_v24, %v3097_v27 }
 0x895   :  { %v887_v49 = vpack.c.bf16 %v3173_v47, %v3173_v47  ;;  %v1099_v29 = vrot.slane %v3173_v47, %v2985_v48 }
 0x897   :  { %2514 = vmatmul.mubr.msk.bf16.vlgmr.msra.gmra.mrb[12].mxu0 %vm77_vm1, %v887_v49 }
 0x898   :  { %2526 = vmatpush3.bf16.msra.mxu0 %v2947_v3  ;;  %2529 = vmatprep.mubr.msk.bf16.mxu0 %vm2864_vm0, %v2863_v0 }
 0x899   :  { %2527 = vmatprep.subr.bf16.mxu0 %v2863_v0 }
 0x89c   :  { %2528 = vmatpush3.bf16.msra.mxu0 %v2957_v5 }
 0x89d   :  { %2541 = vmatprep.subr.bf16.mxu0 %v2863_v0 }
 0x8a9   :  { %v1031_v30 = vpop.permute.xlu1 %1030 }
 0x8ad   :  { %v996_v37 = vpop.permute.xlu1 %995 }
 0x959   :  { %v970_v27 = vpop.f32.mrb[12].mxu1 }
 0x95a   :  { %v979_v52 = vadd.f32 %v977_v51, %v970_v27  ;;  %v2523_v53 = vpop.f32.mrb[13].mxu1 }
 0x95b   :  { %v973_v54 = vpop.f32.mrb[14].mxu1 }
 0x95c   :  { %2657 = vtanh.f32 %v979_v52  ;;  %v2524_v55 = vpop.f32.mrb[15].mxu1  ;;  %v2389_v11 = vmul.f32 -1.442695, %v979_v52 }
 0x966   :  { %v2658_v56 = vpop.eup %2657 }
 0x967   :  { %1035 = vrot.lane.b32.xlu0 %v2658_v56, %s2860_s7 }
 0x96a   :  { %v925_v58 = vpop.f32.mrb[12].mxu0 }
 0x96b   :  { %v931_v61 = vadd.f32 %v925_v58, %v880_v57  ;;  %v2515_v62 = vpop.f32.mrb[13].mxu0 }
 0x96c   :  { %v928_v1 = vpop.f32.mrb[14].mxu0 }
 0x96d   :  { %2659 = vtanh.f32 %v931_v61  ;;  %v2516_v6 = vpop.f32.mrb[15].mxu0  ;;  %v2388_v16 = vmul.f32 -1.442695, %v931_v61 }
 0x96e   :  { %2661 = vpow2.f32 %v2389_v11 }
 0x977   :  { %v2660_v9 = vpop.eup %2659 }
 0x978   :  { %1000 = vrot.lane.b32.xlu0 %v2660_v9, %s2860_s7  ;;  %v2662_v12 = vpop.eup %2661 }
 0x979   :  { %v1018_v15 = vadd.f32 1.0, %v2662_v12 }
 0x97b   :  { %2663 = vrcp.f32 %v1018_v15 }
 0x97c   :  { %2665 = vpow2.f32 %v2388_v16 }
 0x985   :  { %v2664_v18 = vpop.eup %2663 }
 0x986   :  { %v2666_v19 = vpop.eup %2665  ;;  %v1033_v31 = vmul.f32 %v2664_v18, %v1031_v30 }
 0x987   :  { %v983_v23 = vadd.f32 1.0, %v2666_v19 }
 0x989   :  { %2667 = vrcp.f32 %v983_v23 }
 0x993   :  { %v2668_v7 = vpop.eup %2667 }
 0x994   :  { %v998_v39 = vmul.f32 %v2668_v7, %v996_v37 }
 0x9d9   :  { %v1036_v20 = vpop.permute.xlu0 %1035 }
 0x9da   :  { %v1038_v22 = vmul.f32 %v2664_v18, %v1036_v20 }
 0x9dc   :  { %1040 = vrot.lane.b32.xlu0 %v1038_v22, %s2866_s25 }
 0x9ea   :  { %v1001_v25 = vpop.permute.xlu0 %1000 }
 0x9eb   :  { %v1003_v26 = vmul.f32 %v2668_v7, %v1001_v25 }
 0x9ed   :  { %1005 = vrot.lane.b32.xlu0 %v1003_v26, %s2866_s25 }
 0x9f1   :  { %1139 = vrot.lane.b32.xlu0 %v1138_v28, %s2868_s30 }
 0x9f5   :  { %1100 = vrot.lane.b32.xlu0 %v1099_v29, %s2868_s30 }
 0xa4e   :  { %v1041_v32 = vpop.permute.xlu0 %1040 }
 0xa4f   :  { %v1043_v33 = vadd.f32 %v1041_v32, %v1033_v31 }
 0xa51   :  { %2669 = vtanh.f32 %v1043_v33  ;;  %v1156_v46 = vsub.f32 %v1043_v33, %v1031_v30 }
 0xa53   :  { %v1164_v24 = vrot.slane %v1156_v46, %v2985_v48 }
 0xa5b   :  { %v2670_v36 = vpop.eup %2669 }
 0xa5c   :  { %1046 = vrot.lane.b32.xlu1 %v2670_v36, %s2860_s7 }
 0xa5f   :  { %v1006_v40 = vpop.permute.xlu0 %1005 }
 0xa60   :  { %v1008_v41 = vadd.f32 %v1006_v40, %v998_v39 }
 0xa62   :  { %2671 = vtanh.f32 %v1008_v41  ;;  %v1117_v21 = vsub.f32 %v1008_v41, %v996_v37 }
 0xa63   :  { %v1140_v27 = vpop.permute.xlu0 %1139 }
 0xa64   :  { %v1125_v49 = vrot.slane %v1117_v21, %v2985_v48 }
 0xa67   :  { %v1101_v56 = vpop.permute.xlu0 %1100 }
 0xa6c   :  { %v2672_v43 = vpop.eup %2671 }
 0xa6d   :  { %1011 = vrot.lane.b32.xlu1 %v2672_v43, %s2860_s7 }
 0xa71   :  { %1071 = vperm.xlu1 %2604, %v2385_v44  }
 0xa75   :  { %1052 = vperm.xlu1 %2604, %v2384_v17  }
 0xa79   :  { %1165 = vrot.lane.b32.xlu1 %v1164_v24, %s2868_s30 }
 0xa7d   :  { %1126 = vrot.lane.b32.xlu1 %v1125_v49, %s2868_s30 }
 0xace   :  { %v1047_v50 = vpop.permute.xlu1 %1046 }
 0xacf   :  { %v3206_v51 = vmul.f32 %v2664_v18, %v1047_v50 }
 0xad1   :  { %v1142_v52 = vsub.f32 %v3206_v51, %v1140_v27 }
 0xad3   :  { %v1150_v53 = vrot.slane %v1142_v52, %v2985_v48 }
 0xad5   :  { %1151 = vrot.lane.b32.xlu0 %v1150_v53, %s2866_s25 }
 0xadf   :  { %v1012_v54 = vpop.permute.xlu1 %1011 }
 0xae0   :  { %v3211_v55 = vmul.f32 %v2668_v7, %v1012_v54 }
 0xae2   :  { %v1103_v57 = vsub.f32 %v3211_v55, %v1101_v56 }
 0xae4   :  { %v1111_v58 = vrot.slane %v1103_v57, %v2985_v48 }
 0xae6   :  { %1112 = vrot.lane.b32.xlu0 %v1111_v58, %s2866_s25 }
 0xaf0   :  { %v3216_v61 = vpop.permute.xlu1 %1071 }
 0xaf4   :  { %v3218_v62 = vpop.permute.xlu1 %1052 }
 0xaf8   :  { %v1166_v1 = vpop.permute.xlu1 %1165 }
 0xaf9   :  { %v1168_v6 = vmul.f32 %v1166_v1, %v3216_v61 }
 0xafb   :  { %v3222_v9 = vadd.f32 %v1168_v6, %v3146_v38 }
 0xafc   :  { %v1127_v11 = vpop.permute.xlu1 %1126 }
 0xafd   :  { %v1129_v12 = vmul.f32 %v1127_v11, %v3218_v62  ;;  %v1316_v15 = vrot.slane %v3222_v9, %v2985_v48 }
 0xaff   :  { %v3228_v16 = vadd.f32 %v1129_v12, %v3152_v42  ;;  %1317 = vrot.lane.b32.xlu1 %v1316_v15, %s2866_s25 }
 0xb01   :  { %v1281_v18 = vrot.slane %v3228_v16, %v2985_v48 }
 0xb03   :  { %1282 = vrot.lane.b32.xlu1 %v1281_v18, %s2866_s25 }
 0xb47   :  { %v1152_v19 = vpop.permute.xlu0 %1151 }
 0xb48   :  { %v1154_v38 = vmul.f32 %v1152_v19, %v3216_v61  ;;  %v2391_v19 = vld [vmem:[%s3660_s0 + $0x6] sm:$0x3] }
 0xb4a   :  { %v3236_v20 = vadd.f32 %v1154_v38, %v3160_v45  ;;  %v2390_v38 = vld [vmem:[%s3660_s0 + $0x8] sm:$0x3] }
 0xb4c   :  { %v1219_v22 = vpack.c.bf16 %v3236_v20, %v3236_v20  ;;  %v1423_v52 = vrot.slane %v3236_v20, %v2985_v48 }
 0xb4e   :  { %2538 = vmatmul.mubr.msk.bf16.vlgmr.msra.gmra.mrb[16].mxu1 %vm77_vm1, %v1219_v22 }
 0xb4f   :  { %2550 = vmatpush3.bf16.msra.mxu1 %v2942_v2  ;;  %2553 = vmatprep.mubr.msk.bf16.mxu1 %vm2864_vm0, %v2863_v0  ;;  %v1171_v2 = vld [vmem:[#allocation2 + $0xc] sm:$0xf] }
 0xb50   :  { %2551 = vmatprep.subr.bf16.mxu1 %v2863_v0 }
 0xb53   :  { %2552 = vmatpush3.bf16.msra.mxu1 %v2950_v4  ;;  %v1264_v4 = vrot.slane %v1171_v2, 2 }
 0xb54   :  { %2565 = vmatprep.subr.bf16.mxu1 %v2863_v0 }
 0xb58   :  { %v1113_v42 = vpop.permute.xlu0 %1112 }
 0xb59   :  { %v1115_v45 = vmul.f32 %v1113_v42, %v3218_v62 }
 0xb5b   :  { %v3249_v23 = vadd.f32 %v1115_v45, %v3173_v47 }
 0xb5d   :  { %v1174_v7 = vpack.c.bf16 %v3249_v23, %v3249_v23  ;;  %v1384_v53 = vrot.slane %v3249_v23, %v2985_v48 }
 0xb5f   :  { %2530 = vmatmul.mubr.msk.bf16.vlgmr.msra.gmra.mrb[16].mxu0 %vm77_vm1, %v1174_v7 }
 0xb60   :  { %2542 = vmatpush3.bf16.msra.mxu0 %v2947_v3  ;;  %2545 = vmatprep.mubr.msk.bf16.mxu0 %vm2864_vm0, %v2863_v0  ;;  %v1170_v3 = vld [vmem:[#allocation2 + $0x10] sm:$0xf] }
 0xb61   :  { %2543 = vmatprep.subr.bf16.mxu0 %v2863_v0 }
 0xb64   :  { %2544 = vmatpush3.bf16.msra.mxu0 %v2957_v5 }
 0xb65   :  { %2557 = vmatprep.subr.bf16.mxu0 %v2863_v0 }
 0xb71   :  { %v1318_v54 = vpop.permute.xlu1 %1317 }
 0xb75   :  { %v1283_v6 = vpop.permute.xlu1 %1282 }
 0xc21   :  { %v1257_v47 = vpop.f32.mrb[16].mxu1 }
 0xc22   :  { %v1266_v25 = vadd.f32 %v1264_v4, %v1257_v47  ;;  %v2539_v26 = vpop.f32.mrb[17].mxu1 }
 0xc23   :  { %v1260_v28 = vpop.f32.mrb[18].mxu1 }
 0xc24   :  { %2673 = vtanh.f32 %v1266_v25  ;;  %v2540_v29 = vpop.f32.mrb[19].mxu1  ;;  %v2395_v39 = vmul.f32 -1.442695, %v1266_v25 }
 0xc2e   :  { %v2674_v30 = vpop.eup %2673 }
 0xc2f   :  { %1322 = vrot.lane.b32.xlu0 %v2674_v30, %s2860_s7 }
 0xc32   :  { %v1212_v31 = vpop.f32.mrb[16].mxu0 }
 0xc33   :  { %v1218_v32 = vadd.f32 %v1212_v31, %v1170_v3  ;;  %v2531_v33 = vpop.f32.mrb[17].mxu0 }
 0xc34   :  { %v1215_v36 = vpop.f32.mrb[18].mxu0 }
 0xc35   :  { %2675 = vtanh.f32 %v1218_v32  ;;  %v2532_v5 = vpop.f32.mrb[19].mxu0  ;;  %v2394_v43 = vmul.f32 -1.442695, %v1218_v32 }
 0xc36   :  { %2677 = vpow2.f32 %v2395_v39 }
 0xc3f   :  { %v2676_v37 = vpop.eup %2675 }
 0xc40   :  { %1287 = vrot.lane.b32.xlu0 %v2676_v37, %s2860_s7  ;;  %v2678_v40 = vpop.eup %2677 }
 0xc41   :  { %v1305_v41 = vadd.f32 1.0, %v2678_v40 }
 0xc43   :  { %2679 = vrcp.f32 %v1305_v41 }
 0xc44   :  { %2681 = vpow2.f32 %v2394_v43 }
 0xc4d   :  { %v2680_v44 = vpop.eup %2679 }
 0xc4e   :  { %v2682_v17 = vpop.eup %2681  ;;  %v1320_v56 = vmul.f32 %v2680_v44, %v1318_v54 }
 0xc4f   :  { %v1270_v24 = vadd.f32 1.0, %v2682_v17 }
 0xc51   :  { %2683 = vrcp.f32 %v1270_v24  ;;  %v3323_v24 = vld [vmem:[#allocation5 + $0x8] sm:$0xff]  }
 0xc5b   :  { %v2684_v49 = vpop.eup %2683 }
 0xc5c   :  { %v1285_v11 = vmul.f32 %v2684_v49, %v1283_v6 }
 0xca1   :  { %v1323_v46 = vpop.permute.xlu0 %1322 }
 0xca2   :  { %v1325_v21 = vmul.f32 %v2680_v44, %v1323_v46 }
 0xca4   :  { %1327 = vrot.lane.b32.xlu0 %v1325_v21, %s2866_s25 }
 0xcb2   :  { %v1288_v50 = vpop.permute.xlu0 %1287 }
 0xcb3   :  { %v1290_v27 = vmul.f32 %v2684_v49, %v1288_v50 }
 0xcb5   :  { %1292 = vrot.lane.b32.xlu0 %v1290_v27, %s2866_s25 }
 0xcb9   :  { %1424 = vrot.lane.b32.xlu0 %v1423_v52, %s2868_s30  ;;  %v3337_v52 = vld [vmem:[%s3662_s2] sm:$0xff]  }
 0xcbd   :  { %1385 = vrot.lane.b32.xlu0 %v1384_v53, %s2868_s30  ;;  %v1456_v53 = vld [vmem:[#allocation2 + $0x8] sm:$0xf] }
 0xd16   :  { %v1328_v57 = vpop.permute.xlu0 %1327 }
 0xd17   :  { %v1330_v58 = vadd.f32 %v1328_v57, %v1320_v56 }
 0xd19   :  { %2685 = vtanh.f32 %v1330_v58  ;;  %v1441_v22 = vsub.f32 %v1330_v58, %v1318_v54  ;;  %v1549_v54 = vrot.slane %v1456_v53, 2 }
 0xd1b   :  { %v1449_v45 = vrot.slane %v1441_v22, %v2985_v48 }
 0xd23   :  { %v2686_v1 = vpop.eup %2685 }
 0xd24   :  { %1333 = vrot.lane.b32.xlu1 %v2686_v1, %s2860_s7 }
 0xd27   :  { %v1293_v12 = vpop.permute.xlu0 %1292 }
 0xd28   :  { %v1295_v15 = vadd.f32 %v1293_v12, %v1285_v11  ;;  %v1455_v12 = vld [vmem:[#allocation2 + $0x14] sm:$0xf] }
 0xd2a   :  { %2687 = vtanh.f32 %v1295_v15  ;;  %v1402_v42 = vsub.f32 %v1295_v15, %v1283_v6 }
 0xd2b   :  { %v1425_v47 = vpop.permute.xlu0 %1424 }
 0xd2c   :  { %v1410_v7 = vrot.slane %v1402_v42, %v2985_v48 }
 0xd2f   :  { %v1386_v30 = vpop.permute.xlu0 %1385 }
 0xd34   :  { %v2688_v18 = vpop.eup %2687 }
 0xd35   :  { %1298 = vrot.lane.b32.xlu1 %v2688_v18, %s2860_s7 }
 0xd39   :  { %1357 = vperm.xlu1 %2604, %v2391_v19  }
 0xd3d   :  { %1339 = vperm.xlu1 %2604, %v2390_v38  }
 0xd41   :  { %1450 = vrot.lane.b32.xlu1 %v1449_v45, %s2868_s30 }
 0xd45   :  { %1411 = vrot.lane.b32.xlu1 %v1410_v7, %s2868_s30 }
 0xd96   :  { %v1334_v2 = vpop.permute.xlu1 %1333 }
 0xd97   :  { %v3282_v4 = vmul.f32 %v2680_v44, %v1334_v2 }
 0xd99   :  { %v1427_v25 = vsub.f32 %v3282_v4, %v1425_v47 }
 0xd9b   :  { %v1435_v26 = vrot.slane %v1427_v25, %v2985_v48 }
 0xd9d   :  { %1436 = vrot.lane.b32.xlu0 %v1435_v26, %s2866_s25 }
 0xda7   :  { %v1299_v28 = vpop.permute.xlu1 %1298 }
 0xda8   :  { %v3287_v29 = vmul.f32 %v2684_v49, %v1299_v28 }
 0xdaa   :  { %v1388_v3 = vsub.f32 %v3287_v29, %v1386_v30 }
 0xdac   :  { %v1396_v31 = vrot.slane %v1388_v3, %v2985_v48 }
 0xdae   :  { %1397 = vrot.lane.b32.xlu0 %v1396_v31, %s2866_s25 }
 0xdb8   :  { %v3292_v32 = vpop.permute.xlu1 %1357 }
 0xdbc   :  { %v3294_v33 = vpop.permute.xlu1 %1339 }
 0xdc0   :  { %v1451_v36 = vpop.permute.xlu1 %1450 }
 0xdc1   :  { %v1453_v5 = vmul.f32 %v1451_v36, %v3292_v32 }
 0xdc3   :  { %v3298_v37 = vadd.f32 %v1453_v5, %v3222_v9 }
 0xdc4   :  { %v1412_v39 = vpop.permute.xlu1 %1411 }
 0xdc5   :  { %v1414_v40 = vmul.f32 %v1412_v39, %v3294_v33  ;;  %v1601_v41 = vrot.slane %v3298_v37, %v2985_v48 }
 0xdc7   :  { %v3304_v43 = vadd.f32 %v1414_v40, %v3228_v16  ;;  %1602 = vrot.lane.b32.xlu1 %v1601_v41, %s2866_s25  ;;  %v3317_v16 = vld [vmem:[#allocation5] sm:$0xff]  }
 0xdc9   :  { %v1566_v44 = vrot.slane %v3304_v43, %v2985_v48 }
 0xdcb   :  { %1567 = vrot.lane.b32.xlu1 %v1566_v44, %s2866_s25 }
 0xe0f   :  { %v1437_v17 = vpop.permute.xlu0 %1436 }
 0xe10   :  { %v1439_v9 = vmul.f32 %v1437_v17, %v3292_v32 }
 0xe12   :  { %v3312_v46 = vadd.f32 %v1439_v9, %v3236_v20 }
 0xe14   :  { %v1504_v21 = vpack.c.bf16 %v3312_v46, %v3312_v46  ;;  %v1708_v39 = vrot.slane %v3312_v46, %v2985_v48 }
 0xe16   :  { %2554 = vmatmul.mubr.msk.bf16.vlgmr.msra.gmra.mrb[20].mxu1 %vm77_vm1, %v1504_v21 }
 0xe17   :  { %2566 = vmatpush3.bf16.msra.mxu1 %v3317_v16  ;;  %2569 = vmatprep.mubr.msk.bf16.mxu1 %vm2864_vm0, %v2863_v0 }
 0xe18   :  { %2567 = vmatprep.subr.bf16.mxu1 %v2863_v0 }
 0xe1b   :  { %2568 = vmatpush3.bf16.msra.mxu1 %v3323_v24 }
 0xe1c   :  { %2581 = vmatprep.subr.bf16.mxu1 %v2863_v0 }
 0xe20   :  { %v1398_v20 = vpop.permute.xlu0 %1397 }
 0xe21   :  { %v1400_v49 = vmul.f32 %v1398_v20, %v3294_v33 }
 0xe23   :  { %v3329_v50 = vadd.f32 %v1400_v49, %v3249_v23  ;;  %v3346_v23 = vld [vmem:[%s3662_s2 + $0x8] sm:$0xff]  }
 0xe25   :  { %v1459_v27 = vpack.c.bf16 %v3329_v50, %v3329_v50  ;;  %v1669_v40 = vrot.slane %v3329_v50, %v2985_v48 }
 0xe27   :  { %2546 = vmatmul.mubr.msk.bf16.vlgmr.msra.gmra.mrb[20].mxu0 %vm77_vm1, %v1459_v27 }
 0xe28   :  { %2558 = vmatpush3.bf16.msra.mxu0 %v3337_v52  ;;  %2561 = vmatprep.mubr.msk.bf16.mxu0 %vm2864_vm0, %v2863_v0 }
 0xe29   :  { %2559 = vmatprep.subr.bf16.mxu0 %v2863_v0 }
 0xe2c   :  { %2560 = vmatpush3.bf16.msra.mxu0 %v3346_v23 }
 0xe2d   :  { %2573 = vmatprep.subr.bf16.mxu0 %v2863_v0 }
 0xe39   :  { %v1603_v41 = vpop.permute.xlu1 %1602 }
 0xe3d   :  { %v1568_v20 = vpop.permute.xlu1 %1567 }
 0xee9   :  { %v1542_v56 = vpop.f32.mrb[20].mxu1 }
 0xeea   :  { %v1551_v57 = vadd.f32 %v1549_v54, %v1542_v56  ;;  %v2555_v58 = vpop.f32.mrb[21].mxu1  ;;  %v2397_v56 = vld [vmem:[%s3660_s0 + $0x4] sm:$0x3] }
 0xeeb   :  { %v1545_v1 = vpop.f32.mrb[22].mxu1 }
 0xeec   :  { %2689 = vtanh.f32 %v1551_v57  ;;  %v2556_v6 = vpop.f32.mrb[23].mxu1  ;;  %v2401_v45 = vmul.f32 -1.442695, %v1551_v57  ;;  %v2396_v57 = vld [vmem:[%s3660_s0 + $0xa] sm:$0x3] }
 0xef6   :  { %v2690_v11 = vpop.eup %2689 }
 0xef7   :  { %1607 = vrot.lane.b32.xlu0 %v2690_v11, %s2860_s7 }
 0xefa   :  { %v1497_v15 = vpop.f32.mrb[20].mxu0 }
 0xefb   :  { %v1503_v18 = vadd.f32 %v1497_v15, %v1455_v12  ;;  %v2547_v19 = vpop.f32.mrb[21].mxu0 }
 0xefc   :  { %v1500_v38 = vpop.f32.mrb[22].mxu0 }
 0xefd   :  { %2691 = vtanh.f32 %v1503_v18  ;;  %v2548_v22 = vpop.f32.mrb[23].mxu0  ;;  %v2400_v47 = vmul.f32 -1.442695, %v1503_v18 }
 0xefe   :  { %2693 = vpow2.f32 %v2401_v45 }
 0xf07   :  { %v2692_v42 = vpop.eup %2691 }
 0xf08   :  { %1572 = vrot.lane.b32.xlu0 %v2692_v42, %s2860_s7  ;;  %v2694_v7 = vpop.eup %2693 }
 0xf09   :  { %v1590_v2 = vadd.f32 1.0, %v2694_v7 }
 0xf0b   :  { %2695 = vrcp.f32 %v1590_v2 }
 0xf0c   :  { %2697 = vpow2.f32 %v2400_v47 }
 0xf15   :  { %v2696_v25 = vpop.eup %2695 }
 0xf16   :  { %v2698_v26 = vpop.eup %2697  ;;  %v1605_v44 = vmul.f32 %v2696_v25, %v1603_v41 }
 0xf17   :  { %v1555_v3 = vadd.f32 1.0, %v2698_v26 }
 0xf19   :  { %2699 = vrcp.f32 %v1555_v3 }
 0xf23   :  { %v2700_v31 = vpop.eup %2699 }
 0xf24   :  { %v1570_v49 = vmul.f32 %v2700_v31, %v1568_v20 }
 0xf69   :  { %v1608_v28 = vpop.permute.xlu0 %1607 }
 0xf6a   :  { %v1610_v30 = vmul.f32 %v2696_v25, %v1608_v28 }
 0xf6c   :  { %1612 = vrot.lane.b32.xlu0 %v1610_v30, %s2866_s25 }
 0xf7a   :  { %v1573_v36 = vpop.permute.xlu0 %1572 }
 0xf7b   :  { %v1575_v5 = vmul.f32 %v2700_v31, %v1573_v36 }
 0xf7d   :  { %1577 = vrot.lane.b32.xlu0 %v1575_v5, %s2866_s25 }
 0xf81   :  { %1709 = vrot.lane.b32.xlu0 %v1708_v39, %s2868_s30 }
 0xf85   :  { %1670 = vrot.lane.b32.xlu0 %v1669_v40, %s2868_s30 }
 0xfde   :  { %v1613_v17 = vpop.permute.xlu0 %1612 }
 0xfdf   :  { %v1615_v9 = vadd.f32 %v1613_v17, %v1605_v44 }
 0xfe1   :  { %2701 = vtanh.f32 %v1615_v9  ;;  %v1726_v58 = vsub.f32 %v1615_v9, %v1603_v41 }
 0xfe3   :  { %v1734_v6 = vrot.slane %v1726_v58, %v2985_v48 }
 0xfeb   :  { %v2702_v21 = vpop.eup %2701 }
 0xfec   :  { %1618 = vrot.lane.b32.xlu1 %v2702_v21, %s2860_s7 }
 0xfef   :  { %v1578_v27 = vpop.permute.xlu0 %1577 }
 0xff0   :  { %v1580_v53 = vadd.f32 %v1578_v27, %v1570_v49 }
 0xff2   :  { %2703 = vtanh.f32 %v1580_v53  ;;  %v1687_v1 = vsub.f32 %v1580_v53, %v1568_v20 }
 0xff3   :  { %v1710_v18 = vpop.permute.xlu0 %1709 }
 0xff4   :  { %v1695_v11 = vrot.slane %v1687_v1, %v2985_v48 }
 0xff7   :  { %v1671_v45 = vpop.permute.xlu0 %1670 }
 0xffc   :  { %v2704_v54 = vpop.eup %2703 }
 0xffd   :  { %1583 = vrot.lane.b32.xlu1 %v2704_v54, %s2860_s7  ;;  %v1740_v54 = vld [vmem:[#allocation2 + $0x18] sm:$0xf] }
0x1001   :  { %1642 = vperm.xlu1 %2604, %v2397_v56  }
0x1005   :  { %1624 = vperm.xlu1 %2604, %v2396_v57  }
0x1009   :  { %1735 = vrot.lane.b32.xlu1 %v1734_v6, %s2868_s30 }
0x100d   :  { %1696 = vrot.lane.b32.xlu1 %v1695_v11, %s2868_s30 }
0x105e   :  { %v1619_v12 = vpop.permute.xlu1 %1618 }
0x105f   :  { %v3372_v15 = vmul.f32 %v2696_v25, %v1619_v12 }
0x1061   :  { %v1712_v19 = vsub.f32 %v3372_v15, %v1710_v18 }
0x1063   :  { %v1720_v38 = vrot.slane %v1712_v19, %v2985_v48 }
0x1065   :  { %1721 = vrot.lane.b32.xlu0 %v1720_v38, %s2866_s25 }
0x106f   :  { %v1584_v22 = vpop.permute.xlu1 %1583 }
0x1070   :  { %v3377_v42 = vmul.f32 %v2700_v31, %v1584_v22 }
0x1072   :  { %v1673_v7 = vsub.f32 %v3377_v42, %v1671_v45 }
0x1074   :  { %v1681_v2 = vrot.slane %v1673_v7, %v2985_v48 }
0x1076   :  { %1682 = vrot.lane.b32.xlu0 %v1681_v2, %s2866_s25 }
0x1080   :  { %v3382_v47 = vpop.permute.xlu1 %1642 }
0x1084   :  { %v3384_v25 = vpop.permute.xlu1 %1624 }
0x1088   :  { %v1736_v26 = vpop.permute.xlu1 %1735 }
0x1089   :  { %v1738_v28 = vmul.f32 %v1736_v26, %v3382_v47 }
0x108b   :  { %v3388_v30 = vadd.f32 %v1738_v28, %v3298_v37 }
0x108c   :  { %v1697_v3 = vpop.permute.xlu1 %1696 }
0x108d   :  { %v1699_v31 = vmul.f32 %v1697_v3, %v3384_v25  ;;  %v1886_v36 = vrot.slane %v3388_v30, %v2985_v48 }
0x108f   :  { %v3394_v5 = vadd.f32 %v1699_v31, %v3304_v43  ;;  %1887 = vrot.lane.b32.xlu1 %v1886_v36, %s2866_s25 }
0x1091   :  { %v1851_v39 = vrot.slane %v3394_v5, %v2985_v48 }
0x1093   :  { %1852 = vrot.lane.b32.xlu1 %v1851_v39, %s2866_s25 }
0x10d7   :  { %v1722_v40 = vpop.permute.xlu0 %1721 }
0x10d8   :  { %v1724_v37 = vmul.f32 %v1722_v40, %v3382_v47 }
0x10da   :  { %v3402_v41 = vadd.f32 %v1724_v37, %v3312_v46 }
0x10dc   :  { %v1789_v44 = vpack.c.bf16 %v3402_v41, %v3402_v41  ;;  %v1993_v28 = vrot.slane %v3402_v41, %v2985_v48 }
0x10de   :  { %2570 = vmatmul.mubr.msk.bf16.vlgmr.msra.gmra.mrb[24].mxu1 %vm77_vm1, %v1789_v44 }
0x10df   :  { %2582 = vmatpush3.bf16.msra.mxu1 %v3317_v16  ;;  %2585 = vmatprep.mubr.msk.bf16.mxu1 %vm2864_vm0, %v2863_v0  ;;  %v1741_v16 = vld [vmem:[#allocation2 + $0x4] sm:$0xf] }
0x10e0   :  { %2583 = vmatprep.subr.bf16.mxu1 %v2863_v0 }
0x10e3   :  { %2584 = vmatpush3.bf16.msra.mxu1 %v3323_v24  ;;  %v1834_v24 = vrot.slane %v1741_v16, 2 }
0x10e8   :  { %v1683_v43 = vpop.permute.xlu0 %1682 }
0x10e9   :  { %v1685_v17 = vmul.f32 %v1683_v43, %v3384_v25 }
0x10eb   :  { %v3414_v46 = vadd.f32 %v1685_v17, %v3329_v50 }
0x10ed   :  { %v1744_v9 = vpack.c.bf16 %v3414_v46, %v3414_v46  ;;  %v1954_v3 = vrot.slane %v3414_v46, %v2985_v48 }
0x10ef   :  { %2562 = vmatmul.mubr.msk.bf16.vlgmr.msra.gmra.mrb[24].mxu0 %vm77_vm1, %v1744_v9 }
0x10f0   :  { %2574 = vmatpush3.bf16.msra.mxu0 %v3337_v52  ;;  %2577 = vmatprep.mubr.msk.bf16.mxu0 %vm2864_vm0, %v2863_v0 }
0x10f1   :  { %2575 = vmatprep.subr.bf16.mxu0 %v2863_v0 }
0x10f4   :  { %2576 = vmatpush3.bf16.msra.mxu0 %v3346_v23 }
0x1101   :  { %v1888_v31 = vpop.permute.xlu1 %1887 }
0x1105   :  { %v1853_v44 = vpop.permute.xlu1 %1852 }
0x11b1   :  { %v1827_v21 = vpop.f32.mrb[24].mxu1 }
0x11b2   :  { %v1836_v20 = vadd.f32 %v1834_v24, %v1827_v21  ;;  %v2571_v50 = vpop.f32.mrb[25].mxu1  ;;  %v2403_v24 = vld [vmem:[%s3660_s0 + $0x2] sm:$0x3]  ;;  %v2402_v21 = vld [vmem:[%s3660_s0 + $0xc] sm:$0x3] }
0x11b3   :  { %v1830_v49 = vpop.f32.mrb[26].mxu1 }
0x11b4   :  { %2705 = vtanh.f32 %v1836_v20  ;;  %v2572_v27 = vpop.f32.mrb[27].mxu1  ;;  %v2407_v23 = vmul.f32 -1.442695, %v1836_v20 }
0x11be   :  { %v2706_v53 = vpop.eup %2705 }
0x11bf   :  { %1892 = vrot.lane.b32.xlu0 %v2706_v53, %s2860_s7 }
0x11c2   :  { %v1782_v52 = vpop.f32.mrb[24].mxu0 }
0x11c3   :  { %v1788_v56 = vadd.f32 %v1782_v52, %v1740_v54  ;;  %v2563_v57 = vpop.f32.mrb[25].mxu0 }
0x11c4   :  { %v1785_v58 = vpop.f32.mrb[26].mxu0 }
0x11c5   :  { %2707 = vtanh.f32 %v1788_v56  ;;  %v2564_v0 = vpop.f32.mrb[27].mxu0  ;;  %v2406_v12 = vmul.f32 -1.442695, %v1788_v56 }
0x11c6   :  { %2709 = vpow2.f32 %v2407_v23 }
0x11cf   :  { %v2708_v1 = vpop.eup %2707 }
0x11d0   :  { %1857 = vrot.lane.b32.xlu0 %v2708_v1, %s2860_s7  ;;  %v2710_v6 = vpop.eup %2709 }
0x11d1   :  { %v1875_v11 = vadd.f32 1.0, %v2710_v6 }
0x11d3   :  { %2711 = vrcp.f32 %v1875_v11 }
0x11d4   :  { %2713 = vpow2.f32 %v2406_v12 }
0x11dd   :  { %v2712_v18 = vpop.eup %2711 }
0x11de   :  { %v2714_v19 = vpop.eup %2713  ;;  %v1890_v36 = vmul.f32 %v2712_v18, %v1888_v31 }
0x11df   :  { %v1840_v45 = vadd.f32 1.0, %v2714_v19 }
0x11e1   :  { %2715 = vrcp.f32 %v1840_v45 }
0x11eb   :  { %v2716_v7 = vpop.eup %2715 }
0x11ec   :  { %v1855_v43 = vmul.f32 %v2716_v7, %v1853_v44 }
0x1231   :  { %v1893_v38 = vpop.permute.xlu0 %1892 }
0x1232   :  { %v1895_v22 = vmul.f32 %v2712_v18, %v1893_v38 }
0x1234   :  { %1897 = vrot.lane.b32.xlu0 %v1895_v22, %s2866_s25 }
0x1242   :  { %v1858_v2 = vpop.permute.xlu0 %1857 }
0x1243   :  { %v1860_v26 = vmul.f32 %v2716_v7, %v1858_v2 }
0x1245   :  { %1862 = vrot.lane.b32.xlu0 %v1860_v26, %s2866_s25 }
0x1249   :  { %1994 = vrot.lane.b32.xlu0 %v1993_v28, %s2868_s30 }
0x124d   :  { %1955 = vrot.lane.b32.xlu0 %v1954_v3, %s2868_s30 }
0x12a6   :  { %v1898_v39 = vpop.permute.xlu0 %1897 }
0x12a7   :  { %v1900_v40 = vadd.f32 %v1898_v39, %v1890_v36 }
0x12a9   :  { %2717 = vtanh.f32 %v1900_v40  ;;  %v2011_v20 = vsub.f32 %v1900_v40, %v1888_v31 }
0x12ab   :  { %v2019_v50 = vrot.slane %v2011_v20, %v2985_v48 }
0x12b3   :  { %v2718_v37 = vpop.eup %2717 }
0x12b4   :  { %1903 = vrot.lane.b32.xlu1 %v2718_v37, %s2860_s7  ;;  %v2026_v37 = vld [vmem:[#allocation2] sm:$0xf] }
0x12b7   :  { %v1863_v17 = vpop.permute.xlu0 %1862 }
0x12b8   :  { %v1865_v9 = vadd.f32 %v1863_v17, %v1855_v43 }
0x12ba   :  { %2719 = vtanh.f32 %v1865_v9  ;;  %v1972_v49 = vsub.f32 %v1865_v9, %v1853_v44  ;;  %v2119_v44 = vrot.slane %v2026_v37, 2 }
0x12bb   :  { %v1995_v52 = vpop.permute.xlu0 %1994 }
0x12bc   :  { %v1980_v27 = vrot.slane %v1972_v49, %v2985_v48 }
0x12bf   :  { %v1956_v1 = vpop.permute.xlu0 %1955 }
0x12c4   :  { %v2720_v16 = vpop.eup %2719 }
0x12c5   :  { %1868 = vrot.lane.b32.xlu1 %v2720_v16, %s2860_s7 }
0x12c9   :  { %1927 = vperm.xlu1 %2604, %v2403_v24  }
0x12cd   :  { %1909 = vperm.xlu1 %2604, %v2402_v21   ;;  %v2025_v21 = vld [vmem:[#allocation2 + $0x1c] sm:$0xf] }
0x12d1   :  { %2020 = vrot.lane.b32.xlu1 %v2019_v50, %s2868_s30 }
0x12d5   :  { %1981 = vrot.lane.b32.xlu1 %v1980_v27, %s2868_s30 }
0x1326   :  { %v1904_v53 = vpop.permute.xlu1 %1903 }
0x1327   :  { %v3446_v54 = vmul.f32 %v2712_v18, %v1904_v53 }
0x1329   :  { %v1997_v56 = vsub.f32 %v3446_v54, %v1995_v52 }
0x132b   :  { %v2005_v57 = vrot.slane %v1997_v56, %v2985_v48 }
0x132d   :  { %2006 = vrot.lane.b32.xlu0 %v2005_v57, %s2866_s25 }
0x1337   :  { %v1869_v58 = vpop.permute.xlu1 %1868 }
0x1338   :  { %v3451_v0 = vmul.f32 %v2716_v7, %v1869_v58 }
0x133a   :  { %v1958_v23 = vsub.f32 %v3451_v0, %v1956_v1 }
0x133c   :  { %v1966_v6 = vrot.slane %v1958_v23, %v2985_v48 }
0x133e   :  { %1967 = vrot.lane.b32.xlu0 %v1966_v6, %s2866_s25 }
0x1348   :  { %v3456_v11 = vpop.permute.xlu1 %1927 }
0x134c   :  { %v3458_v12 = vpop.permute.xlu1 %1909 }
0x1350   :  { %v2021_v18 = vpop.permute.xlu1 %2020 }
0x1351   :  { %v2023_v19 = vmul.f32 %v2021_v18, %v3456_v11 }
0x1353   :  { %v3462_v38 = vadd.f32 %v2023_v19, %v3388_v30 }
0x1354   :  { %v1982_v22 = vpop.permute.xlu1 %1981 }
0x1355   :  { %v2171_v45 = vrot.slane %v3462_v38, %v2985_v48  ;;  %v1984_v7 = vmul.f32 %v1982_v22, %v3458_v12 }
0x1357   :  { %v3468_v2 = vadd.f32 %v1984_v7, %v3394_v5  ;;  %2172 = vrot.lane.b32.xlu1 %v2171_v45, %s2866_s25 }
0x1359   :  { %v2136_v26 = vrot.slane %v3468_v2, %v2985_v48 }
0x135b   :  { %2137 = vrot.lane.b32.xlu1 %v2136_v26, %s2866_s25 }
0x139f   :  { %v2007_v28 = vpop.permute.xlu0 %2006 }
0x13a0   :  { %v2009_v30 = vmul.f32 %v2007_v28, %v3456_v11  ;;  %v499_v28 = vrot.slane %v3054_v60, %v2985_v48 }
0x13a2   :  { %v3476_v3 = vadd.f32 %v2009_v30, %v3402_v41 }
0x13a4   :  { %v2074_v31 = vpack.c.bf16 %v3476_v3, %v3476_v3  ;;  %v2278_v60 = vrot.slane %v3476_v3, %v2985_v48 }
0x13a6   :  { %2586 = vmatmul.mubr.msk.bf16.vlgmr.msra.gmra.mrb[28].mxu1 %vm77_vm1, %v2074_v31 }
0x13b0   :  { %v1968_v5 = vpop.permute.xlu0 %1967 }
0x13b1   :  { %v1970_v36 = vmul.f32 %v1968_v5, %v3458_v12 }
0x13b3   :  { %v3483_v39 = vadd.f32 %v1970_v36, %v3414_v46 }
0x13b5   :  { %v2029_v40 = vpack.c.bf16 %v3483_v39, %v3483_v39  ;;  %v2239_v26 = vrot.slane %v3483_v39, %v2985_v48 }
0x13b7   :  { %2578 = vmatmul.mubr.msk.bf16.vlgmr.msra.gmra.mrb[28].mxu0 %vm77_vm1, %v2029_v40 }
0x13c9   :  { %v2173_v30 = vpop.permute.xlu1 %2172 }
0x13cd   :  { %v2138_v37 = vpop.permute.xlu1 %2137 }
0x1479   :  { %v2112_v41 = vpop.f32.mrb[28].mxu1 }
0x147a   :  { %v2121_v43 = vadd.f32 %v2119_v44, %v2112_v41  ;;  %v2587_v17 = vpop.f32.mrb[29].mxu1  ;;  %v2028_v44 = vld [vmem:[%s3660_s0] sm:$0x3] }
0x147b   :  { %v2115_v9 = vpop.f32.mrb[30].mxu1 }
0x147c   :  { %2721 = vtanh.f32 %v2121_v43  ;;  %v2588_v16 = vpop.f32.mrb[31].mxu1  ;;  %v2412_v52 = vmul.f32 -1.442695, %v2121_v43  ;;  %v790_v9 = vrot.slane %v3130_v10, %v2985_v48  ;;  %v2408_v10 = vld [vmem:[%s3660_s0 + $0xe] sm:$0x3]  ;;  %s2869_s0 = smov [#allocation8]  }
0x147d   :  { %v1367_v16 = vrot.slane %v3282_v4, %v2985_v48 }
0x1486   :  { %v2722_v24 = vpop.eup %2721 }
0x1487   :  { %2177 = vrot.lane.b32.xlu0 %v2722_v24, %s2860_s7 }
0x148a   :  { %v2067_v20 = vpop.f32.mrb[28].mxu0 }
0x148b   :  { %v2073_v46 = vadd.f32 %v2067_v20, %v2025_v21  ;;  %v2579_v50 = vpop.f32.mrb[29].mxu0  ;;  %v1937_v21 = vrot.slane %v3446_v54, %v2985_v48  ;;  %v1081_v20 = vrot.slane %v3206_v51, %v2985_v48  ;;  %v771_v51 = vrot.slane %v3135_v63, %v2985_v48 }
0x148c   :  { %v2070_v49 = vpop.f32.mrb[30].mxu0  ;;  %v1349_v50 = vrot.slane %v3287_v29, %v2985_v48 }
0x148d   :  { %2723 = vtanh.f32 %v2073_v46  ;;  %v2580_v27 = vpop.f32.mrb[31].mxu0  ;;  %v2411_v58 = vmul.f32 -1.442695, %v2073_v46  ;;  %v1652_v46 = vrot.slane %v3372_v15, %v2985_v48  ;;  %v1919_v15 = vrot.slane %v3451_v0, %v2985_v48 }
0x148e   :  { %2725 = vpow2.f32 %v2412_v52  ;;  %v480_v0 = vrot.slane %v3059_v8, %v2985_v48 }
0x1497   :  { %v2724_v53 = vpop.eup %2723 }
0x1498   :  { %2142 = vrot.lane.b32.xlu0 %v2724_v53, %s2860_s7  ;;  %v2726_v56 = vpop.eup %2725 }
0x1499   :  { %v2160_v57 = vadd.f32 1.0, %v2726_v56 }
0x149b   :  { %2727 = vrcp.f32 %v2160_v57 }
0x149c   :  { %2729 = vpow2.f32 %v2411_v58 }
0x14a5   :  { %v2728_v1 = vpop.eup %2727 }
0x14a6   :  { %v2730_v23 = vpop.eup %2729  ;;  %v2175_v31 = vmul.f32 %v2728_v1, %v2173_v30 }
0x14a7   :  { %v2125_v19 = vadd.f32 1.0, %v2730_v23 }
0x14a9   :  { %2731 = vrcp.f32 %v2125_v19 }
0x14b3   :  { %v3491_v22 = vpop.eup %2731 }
0x14b4   :  { %v2140_v41 = vmul.f32 %v3491_v22, %v2138_v37 }
0x14f9   :  { %v2178_v6 = vpop.permute.xlu0 %2177 }
0x14fa   :  { %v2180_v18 = vmul.f32 %v2728_v1, %v2178_v6 }
0x14fc   :  { %2182 = vrot.lane.b32.xlu0 %v2180_v18, %s2866_s25 }
0x150a   :  { %v2143_v45 = vpop.permute.xlu0 %2142 }
0x150b   :  { %v2145_v7 = vmul.f32 %v3491_v22, %v2143_v45 }
0x150d   :  { %2147 = vrot.lane.b32.xlu0 %v2145_v7, %s2866_s25 }
0x1511   :  { %2240 = vrot.lane.b32.xlu0 %v2239_v26, %s2868_s30 }
0x1515   :  { %500 = vrot.lane.b32.xlu0 %v499_v28, %s2866_s25 }
0x156e   :  { %v2183_v5 = vpop.permute.xlu0 %2182 }
0x156f   :  { %v2185_v36 = vadd.f32 %v2183_v5, %v2175_v31 }
0x1571   :  { %2733 = vtanh.f32 %v2185_v36  ;;  %v2296_v4 = vsub.f32 %v2185_v36, %v2173_v30 }
0x1573   :  { %v2304_v54 = vrot.slane %v2296_v4, %v2985_v48 }
0x157b   :  { %v2734_v40 = vpop.eup %2733 }
0x157c   :  { %2188 = vrot.lane.b32.xlu1 %v2734_v40, %s2860_s7 }
0x157f   :  { %v2148_v43 = vpop.permute.xlu0 %2147 }
0x1580   :  { %v2150_v17 = vadd.f32 %v2148_v43, %v2140_v41  ;;  %2212 = vperm.xlu1 %2604, %v2028_v44  }
0x1582   :  { %2735 = vtanh.f32 %v2150_v17  ;;  %v2257_v53 = vsub.f32 %v2150_v17, %v2138_v37 }
0x1583   :  { %v2241_v29 = vpop.permute.xlu0 %2240 }
0x1584   :  { %2279 = vrot.lane.b32.xlu1 %v2278_v60, %s2868_s30  ;;  %v2265_v52 = vrot.slane %v2257_v53, %v2985_v48 }
0x1587   :  { %v501_v56 = vpop.permute.xlu0 %500 }
0x1588   :  { %791 = vrot.lane.b32.xlu1 %v790_v9, %s2866_s25  ;;  %v503_v6 = vmul.f32 %v501_v56, %v3064_v13 }
0x158c   :  { %v2736_v24 = vpop.eup %2735  ;;  %1368 = vrot.lane.b32.xlu1 %v1367_v16, %s2866_s25 }
0x158d   :  { %2153 = vrot.lane.b32.xlu0 %v2736_v24, %s2860_s7  ;;  %s2333_s7 = sshll.u32 %s2869_s0, 4  ;;  %s2334_s7 = int_to_ptr.vmem [resolvable:$true] %s2333_s7 }
0x158e   :  { %s2785_s17 = scalar_lea.vmem %s2334_s7, 64  ;;  %p2790_p3 = scmp.lt.s32.totalorder %s2334_s7, %s2334_s7 }
0x158f   :  { %p2786_p2 = scmp.ne.s32.totalorder %s2334_s7, %s2785_s17  ;;  %p2791_p4 = scmp.lt.s32.totalorder %s2785_s17, %s2785_s17 }
0x1590   :  { %1938 = vrot.lane.b32.xlu1 %v1937_v21, %s2866_s25 }
0x1591   :  { %1082 = vrot.lane.b32.xlu0 %v1081_v20, %s2866_s25  ;;  %p2792_p5 = por %p2791_p4, %p2790_p3 }
0x1593   :  { %p2793_p6 = pnand %p2792_p5, %p2786_p2 }
0x1594   :  { %2194 = vperm.xlu1 %2604, %v2408_v10  }
0x1595   :  { %1653 = vrot.lane.b32.xlu0 %v1652_v46, %s2866_s25 }
0x1598   :  { %2305 = vrot.lane.b32.xlu1 %v2304_v54, %s2868_s30 }
0x159c   :  { %772 = vrot.lane.b32.xlu1 %v771_v51, %s2866_s25 }
0x15a0   :  { %1350 = vrot.lane.b32.xlu1 %v1349_v50, %s2866_s25 }
0x15a4   :  { %1920 = vrot.lane.b32.xlu1 %v1919_v15, %s2866_s25 }
0x15a8   :  { %263 = vrot.lane.b32.xlu1 %v2998_v59, %s2866_s25  ;;  %v1062_v59 = vrot.slane %v3211_v55, %v2985_v48 }
0x15ee   :  { %v2189_v49 = vpop.permute.xlu1 %2188 }
0x15ef   :  { %v2191_v27 = vmul.f32 %v2728_v1, %v2189_v49  ;;  %v1634_v1 = vrot.slane %v3377_v42, %v2985_v48 }
0x15f1   :  { %v2222_v63 = vrot.slane %v2191_v27, %v2985_v48 }
0x15f3   :  { %2223 = vrot.lane.b32.xlu0 %v2222_v63, %s2866_s25 }
0x15f7   :  { %2266 = vrot.lane.b32.xlu0 %v2265_v52, %s2868_s30  ;;  %s2870_s30 = smov [#allocation10]  }
0x15f8   :  { %s2345_s16 = sshll.u32 %s2870_s30, 4  ;;  %s3605_s16 = int_to_ptr.vmem [resolvable:$true] %s2345_s16 }
0x15fb   :  { %481 = vrot.lane.b32.xlu0 %v480_v0, %s2866_s25 }
0x15ff   :  { %v3550_v57 = vpop.permute.xlu1 %2212  ;;  %1063 = vrot.lane.b32.xlu0 %v1062_v59, %s2866_s25  ;;  %v2154_v58 = vpop.permute.xlu0 %2153 }
0x1600   :  { %v2156_v45 = vmul.f32 %v3491_v22, %v2154_v58 }
0x1602   :  { %v2204_v13 = vrot.slane %v2156_v45, %v2985_v48  ;;  %v2243_v28 = vsub.f32 %v2156_v45, %v2241_v29 }
0x1603   :  { %v2280_v23 = vpop.permute.xlu1 %2279  ;;  %1635 = vrot.lane.b32.xlu0 %v1634_v1, %s2866_s25  ;;  %v1083_v8 = vpop.permute.xlu0 %1082 }
0x1604   :  { %v2282_v19 = vsub.f32 %v2191_v27, %v2280_v23  ;;  %v1085_v7 = vmul.f32 %v1083_v8, %v3216_v61  ;;  %v2251_v22 = vrot.slane %v2243_v28, %v2985_v48 }
0x1606   :  { %v2290_v42 = vrot.slane %v2282_v19, %v2985_v48 }
0x1607   :  { %v792_v18 = vpop.permute.xlu1 %791  ;;  %505 = vrot.lane.b32.xlu0 %v503_v6, %s2866_s25  ;;  %v1654_v61 = vpop.permute.xlu0 %1653 }
0x1608   :  { %v794_v55 = vmul.f32 %v792_v18, %v3140_v34  ;;  %v1656_v36 = vmul.f32 %v1654_v61, %v3382_v47 }
0x160a   :  { %796 = vrot.lane.b32.xlu1 %v794_v55, %s2866_s25 }
0x160b   :  { %v1369_v26 = vpop.permute.xlu1 %1368  ;;  %1087 = vrot.lane.b32.xlu0 %v1085_v7, %s2866_s25 }
0x160c   :  { %v1371_v34 = vmul.f32 %v1369_v26, %v3292_v32 }
0x160e   :  { %2291 = vrot.lane.b32.xlu1 %v2290_v42, %s2866_s25 }
0x160f   :  { %v1939_v30 = vpop.permute.xlu1 %1938  ;;  %2205 = vrot.lane.b32.xlu0 %v2204_v13, %s2866_s25 }
0x1610   :  { %v1941_v5 = vmul.f32 %v1939_v30, %v3456_v11 }
0x1612   :  { %1373 = vrot.lane.b32.xlu1 %v1371_v34, %s2866_s25 }
0x1613   :  { %v2195_v31 = vpop.permute.xlu1 %2194  ;;  %2252 = vrot.lane.b32.xlu0 %v2251_v22, %s2866_s25 }
0x1616   :  { %1943 = vrot.lane.b32.xlu1 %v1941_v5, %s2866_s25 }
0x1617   :  { %v2306_v40 = vpop.permute.xlu1 %2305  ;;  %1658 = vrot.lane.b32.xlu0 %v1656_v36, %s2866_s25 }
0x1618   :  { %v2308_v37 = vmul.f32 %v2306_v40, %v3550_v57 }
0x161a   :  { %v2309_v32 = vadd.f32 %v2308_v37, %v3462_v38 }
0x161b   :  { %v773_v48 = vpop.permute.xlu1 %772 }
0x161c   :  { %2315 = vst.msk [vmem:[#allocation10 + $0x2] sm:$0x3] %vm243_vm2, %v2309_v32  ;;  %v775_v44 = vmul.f32 %v773_v48, %v3142_v35 }
0x161e   :  { %777 = vst.msk [vmem:[#allocation7 + $0x4] sm:$0x3] %vm243_vm2, %v775_v44 }
0x161f   :  { %v1351_v41 = vpop.permute.xlu1 %1350 }
0x1623   :  { %v1921_v11 = vpop.permute.xlu1 %1920 }
0x1624   :  { %v1923_v10 = vmul.f32 %v1921_v11, %v3458_v12 }
0x1627   :  { %v264_v47 = vpop.permute.xlu1 %263 }
0x1628   :  { %268 = vst.msk [vmem:[#allocation7 + $0xe] sm:$0x3] %vm267_vm3, %v264_v47 }
0x1665   :  { %v2224_v43 = vpop.permute.xlu0 %2223 }
0x1666   :  { %v2226_v17 = vmul.f32 %v2224_v43, %v3550_v57 }
0x1668   :  { %2228 = vrot.lane.b32.xlu0 %v2226_v17, %s2866_s25 }
0x1669   :  { %v2267_v60 = vpop.permute.xlu0 %2266 }
0x166a   :  { %v2269_v38 = vmul.f32 %v2267_v60, %v2195_v31 }
0x166c   :  { %v2270_v9 = vadd.f32 %v2269_v38, %v3468_v2 }
0x166d   :  { %v482_v16 = vpop.permute.xlu0 %481 }
0x166e   :  { %2313 = vst.msk [vmem:[#allocation10] sm:$0x3] %vm243_vm2, %v2270_v9  ;;  %v484_v35 = vmul.f32 %v482_v16, %v3066_v14  ;;  %v1353_v14 = vmul.f32 %v1351_v41, %v3294_v33 }
0x1670   :  { %486 = vst.msk [vmem:[#allocation7 + $0x2] sm:$0x3] %vm243_vm2, %v484_v35 }
0x1671   :  { %v1064_v24 = vpop.permute.xlu0 %1063 }
0x1672   :  { %v1066_v21 = vmul.f32 %v1064_v24, %v3218_v62 }
0x1674   :  { %1068 = vst.msk [vmem:[#allocation7 + $0x6] sm:$0x3] %vm243_vm2, %v1066_v21 }
0x1675   :  { %v1636_v20 = vpop.permute.xlu0 %1635 }
0x1676   :  { %v1638_v2 = vmul.f32 %v1636_v20, %v3384_v25 }
0x1679   :  { %v506_v4 = vpop.permute.xlu0 %505 }
0x167a   :  { %509 = vst.msk [vmem:[#allocation7 + $0xc] sm:$0x3] %vm267_vm3, %v506_v4 }
0x167b   :  { %1924 = vst.msk [vmem:[#allocation7 + $0xc] sm:$0x3] %vm243_vm2, %v1923_v10 }
0x167c   :  { %v797_v46 = vpop.permute.xlu1 %796 }
0x167d   :  { %800 = vst.msk [vmem:[#allocation7 + $0xa] sm:$0x3] %vm267_vm3, %v797_v46  ;;  %v1088_v54 = vpop.permute.xlu0 %1087 }
0x167e   :  { %1639 = vst.msk [vmem:[#allocation7 + $0xa] sm:$0x3] %vm243_vm2, %v1638_v2 }
0x167f   :  { %1091 = vst.msk [vmem:[#allocation7 + $0x8] sm:$0x3] %vm267_vm3, %v1088_v54 }
0x1680   :  { %1354 = vst.msk [vmem:[#allocation7 + $0x8] sm:$0x3] %vm243_vm2, %v1353_v14  ;;  %v2292_v62 = vpop.permute.xlu1 %2291 }
0x1681   :  { %v2294_v12 = vmul.f32 %v2292_v62, %v3550_v57  ;;  %v2206_v51 = vpop.permute.xlu0 %2205 }
0x1682   :  { %v2208_v50 = vmul.f32 %v2206_v51, %v2195_v31 }
0x1683   :  { %v2295_v15 = vadd.f32 %v2294_v12, %v3476_v3 }
0x1684   :  { %2209 = vst.msk [vmem:[#allocation7 + $0xe] sm:$0x3] %vm243_vm2, %v2208_v50  ;;  %v1374_v25 = vpop.permute.xlu1 %1373 }
0x1685   :  { %2312 = vst.msk [vmem:[#allocation8 + $0x2] sm:$0x3] %vm243_vm2, %v2295_v15  ;;  %v2253_v33 = vpop.permute.xlu0 %2252 }
0x1686   :  { %1376 = vst.msk [vmem:[#allocation7 + $0x6] sm:$0x3] %vm267_vm3, %v1374_v25  ;;  %v2255_v49 = vmul.f32 %v2253_v33, %v2195_v31 }
0x1688   :  { %v2256_v27 = vadd.f32 %v2255_v49, %v3483_v39  ;;  %v1944_v53 = vpop.permute.xlu1 %1943 }
0x1689   :  { %1946 = vst.msk [vmem:[#allocation7 + $0x2] sm:$0x3] %vm267_vm3, %v1944_v53  ;;  %v1659_v3 = vpop.permute.xlu0 %1658 }
0x168a   :  { %2310 = vst.msk [vmem:[#allocation8] sm:$0x3] %vm243_vm2, %v2256_v27 }
0x168b   :  { %1661 = vst.msk [vmem:[#allocation7 + $0x4] sm:$0x3] %vm267_vm3, %v1659_v3 }
0x168c   :  { %2796 = shalt.err (!%p2793_p6)
}
0x168d   :  { %s2797_s20 = scalar_lea.hbm %s3665_s5, 64 }
0x168e   :  { %p2798_p7 = scmp.ne.s32.totalorder %s3665_s5, %s2797_s20  ;;  %p2801_p8 = scmp.lt.u32.totalorder %s2797_s20, %s3665_s5 }
0x1690   :  { %p2803_p9 = pnand %p2801_p8, %p2798_p7 }
0x1692   :  { %2806 = shalt.err (!%p2803_p9)
}
0x1693   :  { %s2871_s23 = smov 2   ;;  %s2807_s2 = scalar_lea.vmem %s3605_s16, 64 }
0x1694   :  { %2339 = dma.vmem_to_hbm [thread:$0]  %s2334_s7, 64, %s3665_s5, [#allocation9], %s2866_s25, %s2866_s25, %s2871_s23  }
0x1695   :  { %p2808_p10 = scmp.ne.s32.totalorder %s3605_s16, %s2807_s2  ;;  %p2812_p11 = scmp.lt.s32.totalorder %s3605_s16, %s3605_s16 }
0x1696   :  { %p2813_p12 = scmp.lt.s32.totalorder %s2807_s2, %s2807_s2 }
0x1698   :  { %p2814_p13 = por %p2813_p12, %p2812_p11 }
0x169a   :  { %p2815_p0 = pnand %p2814_p13, %p2808_p10 }
0x169c   :  { %2818 = shalt.err (!%p2815_p0)
}
0x169d   :  { %s2819_s29 = scalar_lea.hbm %s3666_s6, 64 }
0x169e   :  { %p2820_p1 = scmp.ne.s32.totalorder %s3666_s6, %s2819_s29  ;;  %p2823_p2 = scmp.lt.u32.totalorder %s2819_s29, %s3666_s6 }
0x16a0   :  { %p2825_p3 = pnand %p2823_p2, %p2820_p1 }
0x16a2   :  { %2828 = shalt.err (!%p2825_p3)
}
0x16a3   :  { %2351 = dma.vmem_to_hbm [thread:$0]  %s3605_s16, 64, %s3666_s6, [#allocation9], %s2866_s25, %s2866_s25, %s2871_s23  }
0x16a4   :  { %s2872_s13 = smov [#allocation7]  }
0x16a5   :  { %s2321_s14 = sshll.u32 %s2872_s13, 4  ;;  %s2322_s14 = int_to_ptr.vmem [resolvable:$true] %s2321_s14 }
0x16a6   :  { %s2829_s15 = scalar_lea.vmem %s2322_s14, 256  ;;  %p2834_p5 = scmp.lt.s32.totalorder %s2322_s14, %s2322_s14 }
0x16a7   :  { %p2830_p4 = scmp.ne.s32.totalorder %s2322_s14, %s2829_s15  ;;  %p2835_p6 = scmp.lt.s32.totalorder %s2829_s15, %s2829_s15 }
0x16a9   :  { %p2836_p7 = por %p2835_p6, %p2834_p5 }
0x16ab   :  { %p2837_p8 = pnand %p2836_p7, %p2830_p4 }
0x16da   :  { %v2229_v39 = vpop.permute.xlu0 %2228 }
0x16db   :  { %2231 = vst.msk [vmem:[#allocation7] sm:$0x3] %vm267_vm3, %v2229_v39 }
0x16dc   :  { %2840 = shalt.err (!%p2837_p8)
}
0x16dd   :  { %s2841_s30 = scalar_lea.hbm %s3664_s4, 256 }
0x16de   :  { %p2842_p9 = scmp.ne.s32.totalorder %s3664_s4, %s2841_s30  ;;  %p2845_p10 = scmp.lt.u32.totalorder %s2841_s30, %s3664_s4 }
0x16e0   :  { %p2847_p11 = pnand %p2845_p10, %p2842_p9 }
0x16e2   :  { %2850 = shalt.err (!%p2847_p11)
}
0x16e3   :  { %2327 = dma.vmem_to_hbm [thread:$0]  %s2322_s14, 256, %s3664_s4, [#allocation4], %s2866_s25, %s2866_s25, %s2871_s23  }
0x16e4   :  { %2855 = dma.done.wait [#allocation4], 256  }
0x16e5   :  { %2856 = vsyncadd [#allocation4], 4294967040 }
0x16e6   :  { %2857 = dma.done.wait [#allocation9], 128  }
0x16e7   :  { %2858 = vsyncadd [#allocation9], 4294967168 }
0x16e8   :  { %2361 = vsyncpa [#allocation3], 1 }
0x16e9   :  { %2362 = vsyncpa [#allocation6], 1 }
0x16ea   :  { %2363 = vsyncpa [#allocation4], 1 }
0x16eb   :  { %2364 = vsyncpa [#allocation9], 1 }

</bundles_post_ra>
